<compile_context>
chip_gen: v6e
topology: v6e:2x2x1
jax: 0.10.0
libtpu: 0.0.40
codegen_flags: <defaults>
</compile_context>

<pallas_src>
import numpy as np

import jax
import jax.numpy as jnp
from jax import lax
from jax.experimental import pallas as pl
from jax.experimental.pallas import tpu as pltpu

MM_DTYPE = jnp.bfloat16   # MXU operand dtype (accumulation stays f32)
EPS = 1e-5


def _round_up(x, m):
    return (x + m - 1) // m * m


# --------------------------------------------------------------------------
# deterministic synthetic graph / parameters
# --------------------------------------------------------------------------
def make_graph(V, K=3):
    """Chain graph over V joints; K=3 partitions: identity / forward / backward."""
    adj = jnp.zeros((V, V), jnp.float32)
    for i in range(V - 1):
        adj = adj.at[i, i + 1].set(1.0).at[i + 1, i].set(1.0)
    idx = jnp.arange(V)
    fwd = adj * (idx[None, :] > idx[:, None])
    bwd = adj * (idx[None, :] < idx[:, None])

    def norm(a):
        d = a.sum(axis=1, keepdims=True)
        return a / jnp.where(d > 0, d, 1.0)

    return jnp.stack([jnp.eye(V), norm(fwd), norm(bwd)], axis=0)[:K]


def init_stgcn_params(key, c_in, num_class, V, K, Kt,
                      channels=(16, 16, 32), strides=(1, 1, 2)):
    keys = iter(jax.random.split(key, 64))

    def nxt():
        return next(keys)

    def bn(c):
        return dict(gamma=1.0 + 0.1 * jax.random.normal(nxt(), (c,)),
                    beta=0.05 * jax.random.normal(nxt(), (c,)),
                    mean=0.05 * jax.random.normal(nxt(), (c,)),
                    var=1.0 + 0.1 * jax.random.uniform(nxt(), (c,)))

    params = {'data_bn': bn(c_in * V)}
    blocks = []
    c_prev = c_in
    for c_out, s in zip(channels, strides):
        blk = dict(
            stride=s,
            gcn_w=0.1 * jax.random.normal(nxt(), (K * c_out, c_prev)),
            gcn_b=0.05 * jax.random.normal(nxt(), (K * c_out,)),
            tcn_bn1=bn(c_out),
            tcn_w=0.1 * jax.random.normal(nxt(), (c_out, c_out, Kt)),
            tcn_b=0.05 * jax.random.normal(nxt(), (c_out,)),
            tcn_bn2=bn(c_out),
            edge_imp=jnp.ones((K, V, V)),
        )
        if c_prev == c_out and s == 1:
            blk['res'] = 'identity'
        else:
            blk['res'] = dict(w=0.1 * jax.random.normal(nxt(), (c_out, c_prev)),
                              b=0.05 * jax.random.normal(nxt(), (c_out,)),
                              bn=bn(c_out))
        blocks.append(blk)
        c_prev = c_out
    blocks[0]['res'] = 'none'          # first ST-GCN block has residual=False
    params['blocks'] = blocks
    params['fcn_w'] = 0.1 * jax.random.normal(nxt(), (num_class, c_prev))
    params['fcn_b'] = 0.05 * jax.random.normal(nxt(), (num_class,))
    return params


# --------------------------------------------------------------------------
# trace-time parameter fusion (BN folding, adjacency folding, layout packing)
# --------------------------------------------------------------------------
def _bn_fold(bn):
    scale = bn['gamma'] * lax.rsqrt(bn['var'] + EPS)
    shift = bn['beta'] - bn['mean'] * scale
    return scale, shift


def fuse_stream_params(params, A, K, Kt, V, c_in, pool_scale):
    """Fold eval-mode BN / adjacency / (c, v) layout into dense matrices.

    Kernel feature-map layout: rows = (n*M + m)*T + t, cols = c * V + v.
    """
    blocks = []
    c_prev = c_in
    eye = jnp.eye(V, dtype=jnp.float32)
    for blk in params['blocks']:
        c_out = blk['tcn_w'].shape[0]
        A_eff = (A * blk['edge_imp']).astype(jnp.float32)           # (K, V, V)
        s1, h1 = _bn_fold(blk['tcn_bn1'])
        s2, h2 = _bn_fold(blk['tcn_bn2'])

        # ConvTemporalGraphical (1x1 conv to K*c_out + einsum with A) + BN1 folded
        wg = blk['gcn_w'].reshape(K, c_out, c_prev)
        bg = blk['gcn_b'].reshape(K, c_out)
        w1 = jnp.einsum('koc,kvw->cvow', wg, A_eff) * s1[None, None, :, None]
        w1 = w1.reshape(c_prev * V, c_out * V)
        b1 = jnp.einsum('ko,kw->ow', bg, A_eff.sum(axis=1)) * s1[:, None] + h1[:, None]
        b1 = b1.reshape(1, c_out * V)

        # temporal (Kt,1) conv + BN2 as Kt Kronecker-structured (c*V, c*V) matrices
        w2 = jnp.stack([jnp.kron(blk['tcn_w'][:, :, kt].T * s2[None, :], eye)
                        for kt in range(Kt)], axis=0)
        b2 = jnp.repeat(s2 * blk['tcn_b'] + h2, V).reshape(1, c_out * V)

        fused = dict(w1=w1, b1=b1, w2=w2, b2=b2)
        if isinstance(blk['res'], dict):                # 1x1-conv + BN residual
            sr, hr = _bn_fold(blk['res']['bn'])
            fused['wr'] = jnp.kron(blk['res']['w'].T * sr[None, :], eye)
            fused['br'] = jnp.repeat(sr * blk['res']['b'] + hr, V).reshape(1, c_out * V)
        blocks.append(fused)
        c_prev = c_out

    # data_bn (reference feature order v*C + c) folded into block 0's matmul
    sd, hd = _bn_fold(params['data_bn'])
    s_cv = sd.reshape(V, c_in).T.reshape(c_in * V)
    h_cv = hd.reshape(V, c_in).T.reshape(c_in * V)
    blocks[0]['b1'] = blocks[0]['b1'] + (h_cv @ blocks[0]['w1']).reshape(1, -1)
    blocks[0]['w1'] = s_cv[:, None] * blocks[0]['w1']

    # head: global avg-pool over (v, t, m) + the 1x1 fcn folded into one matrix
    q = jnp.repeat(params['fcn_w'].T, V, axis=0) * pool_scale       # (c_last*V, ncls)
    return blocks, q


# --------------------------------------------------------------------------
# fused two-stream forward (single pallas_call, grid = (stream,))
# --------------------------------------------------------------------------
def build_forward(params_o, params_m, A, K, Kt, N, C, T, V, M, num_class):
    NM = N * M
    R0 = NM * T                           # all slabs batched into matmul rows
    pad = (Kt - 1) // 2
    cv_in = C * V
    cv_in_p = _round_up(cv_in, 8)

    # static per-block metadata (identical structure for both streams)
    metas = []
    c_prev, t_cur = C, T
    for blk in params_o['blocks']:
        c_out = blk['tcn_w'].shape[0]
        stride = blk['stride']
        res = blk['res'] if isinstance(blk['res'], str) else 'conv'
        t_out = (t_cur - 1) // stride + 1
        metas.append(dict(cv_out=c_out * V, stride=stride, res=res,
                          t_in=t_cur, t_out=t_out,
                          rows_in=NM * t_cur, rows_out=NM * t_out))
        c_prev, t_cur = c_out, t_out
    t_final = t_cur
    rows_final = NM * t_final
    pool_scale = 1.0 / (V * M * t_final)

    # TODO(synk): nn.Dropout inside st_gcn is an eval-mode no-op; intentionally omitted.
    fo, qo = fuse_stream_params(params_o, A, K, Kt, V, C, pool_scale)
    fm, qm = fuse_stream_params(params_m, A, K, Kt, V, C, pool_scale)

    # per-stream temporal pre-matrix: origin = identity; motion = block-diagonal
    # temporal difference m[t] = x[t] - 0.5 x[t-1] - 0.5 x[t+1] (zero boundary
    # frames, matching the reference torch.cat(zeros, diff, zeros)).
    d_np = np.zeros((T, T), np.float32)
    for t in range(1, T - 1):
        d_np[t, t], d_np[t, t - 1], d_np[t, t + 1] = 1.0, -0.5, -0.5
    P_o = np.eye(R0, dtype=np.float32)
    P_m = np.kron(np.eye(NM, dtype=np.float32), d_np)

    # per-block stacked shift-and-stride gather matrices (block-diag over slabs)
    def make_mbig(meta):
        t_in, t_out, s = meta['t_in'], meta['t_out'], meta['stride']
        mats = []
        for kt in range(Kt):
            S = np.zeros((t_out, t_in), np.float32)
            for to in range(t_out):
                src = to * s + kt - pad
                if 0 <= src < t_in:
                    S[to, src] = 1.0
            mats.append(np.kron(np.eye(NM, dtype=np.float32), S))
        return np.concatenate(mats, axis=0)          # (Kt*NM*t_out, NM*t_in)

    def make_sel(meta):                              # residual-path time subsample
        t_in, t_out, s = meta['t_in'], meta['t_out'], meta['stride']
        S = np.zeros((t_out, t_in), np.float32)
        for to in range(t_out):
            S[to, to * s] = 1.0
        return np.kron(np.eye(NM, dtype=np.float32), S)

    # final pool: sum over (person m, frame t) per sample n (scale folded in q)
    pool_np = np.zeros((N, rows_final), np.float32)
    for n in range(N):
        for m in range(M):
            for t in range(t_final):
                pool_np[n, (n * M + m) * t_final + t] = 1.0

    const_ops, const_specs = [], []

    def add_shared(arr, dtype=jnp.float32):
        arr = jnp.asarray(arr, dtype)
        const_ops.append(arr)
        nd = arr.ndim
        const_specs.append(pl.BlockSpec(arr.shape, lambda s, _nd=nd: (0,) * _nd))

    def add_stacked(a_o, a_m, dtype):
        arr = jnp.stack([jnp.asarray(a_o), jnp.asarray(a_m)], axis=0).astype(dtype)
        const_ops.append(arr)
        rest = arr.shape[1:]
        nd = len(rest)
        const_specs.append(
            pl.BlockSpec((None,) + rest, lambda s, _nd=nd: (s,) + (0,) * _nd))

    add_stacked(P_o, P_m, MM_DTYPE)
    for bi, meta in enumerate(metas):
        bo, bm = fo[bi], fm[bi]
        w1o, w1m = bo['w1'], bm['w1']
        if bi == 0 and cv_in_p != cv_in:       # pad reduce dim to match padded x cols
            w1o = jnp.pad(w1o, ((0, cv_in_p - cv_in), (0, 0)))
            w1m = jnp.pad(w1m, ((0, cv_in_p - cv_in), (0, 0)))
        add_stacked(w1o, w1m, MM_DTYPE)
        add_stacked(bo['b1'], bm['b1'], jnp.float32)
        add_shared(make_mbig(meta), MM_DTYPE)        # shared between streams
        add_stacked(bo['w2'], bm['w2'], MM_DTYPE)
        add_stacked(bo['b2'], bm['b2'], jnp.float32)
        if meta['res'] == 'conv':
            if meta['stride'] > 1:
                add_shared(make_sel(meta), MM_DTYPE)
            add_stacked(bo['wr'], bm['wr'], MM_DTYPE)
            add_stacked(bo['br'], bm['br'], jnp.float32)
    add_shared(pool_np, jnp.float32)
    add_stacked(qo, qm, jnp.float32)

    x_spec = pl.BlockSpec((R0, cv_in_p), lambda s: (0, 0))
    n_in = 1 + len(const_ops)

    def kernel(*args):
        in_refs = args[:n_in]
        o_ref = args[n_in]
        it = iter(in_refs)

        x = next(it)[...].astype(MM_DTYPE)            # (R0, cv_in_p)
        p = next(it)[...]                             # (R0, R0), per stream
        # stream input: origin = x, motion = temporal difference (branch-free)
        h = jnp.dot(p, x, preferred_element_type=jnp.float32)

        for bi, meta in enumerate(metas):
            w1, b1 = next(it), next(it)
            mbig, w2, b2 = next(it), next(it), next(it)
            rows_out, cv = meta['rows_out'], meta['cv_out']

            h_bf = h.astype(MM_DTYPE)                 # one cast, reused by residual

            # graph conv (data_bn / BN1 / adjacency / edge-importance folded) + ReLU
            g = jnp.dot(h_bf, w1[...], preferred_element_type=jnp.float32)
            g = jnp.maximum(g + b1[...], 0.0)         # (rows_in, cv)

            # temporal (Kt,1) conv (BN2 + stride folded): one block-diagonal
            # shift/stride gather matmul, then Kt tap matmuls on aligned slices
            gs = jnp.dot(mbig[...], g.astype(MM_DTYPE),
                         preferred_element_type=jnp.float32).astype(MM_DTYPE)
            acc = b2[...]                             # (1, cv), broadcasts
            for kt in range(Kt):
                sl = gs[kt * rows_out:(kt + 1) * rows_out, :]
                acc = acc + jnp.dot(sl, w2[kt], preferred_element_type=jnp.float32)

            if meta['res'] == 'none':
                h = jnp.maximum(acc, 0.0)
            elif meta['res'] == 'identity':           # stride == 1 by construction
                h = jnp.maximum(acc + h, 0.0)
            else:                                     # 1x1-conv + BN residual
                if meta['stride'] > 1:
                    selb = next(it)[...]
                    h_r = jnp.dot(selb, h_bf,
                                  preferred_element_type=jnp.float32).astype(MM_DTYPE)
                else:
                    h_r = h_bf
                wr, br = next(it), next(it)
                r = jnp.dot(h_r, wr[...], preferred_element_type=jnp.float32) + br[...]
                h = jnp.maximum(acc + r, 0.0)

        # head: pool over (m, t) via block matrix; pool over v + 1x1 fcn folded in q
        pool = next(it)[...]                          # (N, rows_final)
        q = next(it)[...]                             # (c_last*V, ncls)
        pooled = jnp.dot(pool, h, preferred_element_type=jnp.float32)    # (N, c*V)
        o_ref[...] = jnp.dot(pooled, q, preferred_element_type=jnp.float32)

    call = pl.pallas_call(
        kernel,
        out_shape=jax.ShapeDtypeStruct((2, N, num_class), jnp.float32),
        grid=(2,),
        in_specs=[x_spec] + const_specs,
        out_specs=pl.BlockSpec((None, N, num_class), lambda s: (s, 0, 0)),
        compiler_params=pltpu.CompilerParams(dimension_semantics=("parallel",)),
    )

    fcn_bias = (params_o['fcn_b'] + params_m['fcn_b']).reshape(1, num_class)

    def forward(x):
        # (N, C, T, V, M) -> rows = (n*M + m)*T + t, cols = c * V + v
        xc = jnp.transpose(x, (0, 4, 2, 1, 3)).reshape(R0, cv_in)
        xc = jnp.pad(xc.astype(jnp.float32), ((0, 0), (0, cv_in_p - cv_in)))
        per = call(xc, *const_ops)                    # (2, N, ncls)
        # sum over {origin, motion} streams; person mean is folded into q
        return per.sum(axis=0) + fcn_bias

    return forward


# --------------------------------------------------------------------------

if __name__ == "__main__":
    N, C, T, V, M = 2, 3, 16, 5, 2
    num_class, K, Kt = 8, 3, 9

    x = jax.random.normal(jax.random.PRNGKey(0), (N, C, T, V, M), dtype=jnp.float32)

    A = make_graph(V, K)
    kp1, kp2 = jax.random.split(jax.random.PRNGKey(1))
    p_origin = init_stgcn_params(kp1, C, num_class, V, K, Kt)
    p_motion = init_stgcn_params(kp2, C, num_class, V, K, Kt)

    fwd = jax.jit(build_forward(p_origin, p_motion, A, K, Kt,
                                N, C, T, V, M, num_class))
    out = fwd(x)
    jax.block_until_ready(out)
    assert out.shape == (N, num_class), out.shape
    assert bool(jnp.all(jnp.isfinite(out)))
    print("KERNEL_OK")
</pallas_src>

<mosaic_0001>
module attributes {stable_mosaic.version = 11 : i64} {
  func.func @kernel(%arg0: i32, %arg1: memref<64x16xf32, #tpu.memory_space<vmem>>, %arg2: memref<1x64x64xbf16, #tpu.memory_space<vmem>>, %arg3: memref<1x16x80xbf16, #tpu.memory_space<vmem>>, %arg4: memref<1x1x80xf32, #tpu.memory_space<vmem>>, %arg5: memref<576x64xbf16, #tpu.memory_space<vmem>>, %arg6: memref<1x9x80x80xbf16, #tpu.memory_space<vmem>>, %arg7: memref<1x1x80xf32, #tpu.memory_space<vmem>>, %arg8: memref<1x80x80xbf16, #tpu.memory_space<vmem>>, %arg9: memref<1x1x80xf32, #tpu.memory_space<vmem>>, %arg10: memref<576x64xbf16, #tpu.memory_space<vmem>>, %arg11: memref<1x9x80x80xbf16, #tpu.memory_space<vmem>>, %arg12: memref<1x1x80xf32, #tpu.memory_space<vmem>>, %arg13: memref<1x80x160xbf16, #tpu.memory_space<vmem>>, %arg14: memref<1x1x160xf32, #tpu.memory_space<vmem>>, %arg15: memref<288x64xbf16, #tpu.memory_space<vmem>>, %arg16: memref<1x9x160x160xbf16, #tpu.memory_space<vmem>>, %arg17: memref<1x1x160xf32, #tpu.memory_space<vmem>>, %arg18: memref<32x64xbf16, #tpu.memory_space<vmem>>, %arg19: memref<1x80x160xbf16, #tpu.memory_space<vmem>>, %arg20: memref<1x1x160xf32, #tpu.memory_space<vmem>>, %arg21: memref<2x32xf32, #tpu.memory_space<vmem>>, %arg22: memref<1x160x8xf32, #tpu.memory_space<vmem>>, %arg23: memref<1x2x8xf32, #tpu.memory_space<vmem>>) attributes {dimension_semantics = [#tpu.dimension_semantics<parallel>], iteration_bounds = array<i64: 2>, scalar_prefetch = 0 : i64, scratch_operands = 0 : i64, tpu.core_type = #tpu.core_type<tc>, window_params = [{pipeline_mode = #tpu.pipeline_mode<synchronous>, transform_indices = @transform_0, window_bounds = array<i64: 64, 16>}, {transform_indices = @transform_1, window_bounds = array<i64: 1, 64, 64>}, {transform_indices = @transform_2, window_bounds = array<i64: 1, 16, 80>}, {transform_indices = @transform_3, window_bounds = array<i64: 1, 1, 80>}, {pipeline_mode = #tpu.pipeline_mode<synchronous>, transform_indices = @transform_4, window_bounds = array<i64: 576, 64>}, {transform_indices = @transform_5, window_bounds = array<i64: 1, 9, 80, 80>}, {transform_indices = @transform_6, window_bounds = array<i64: 1, 1, 80>}, {transform_indices = @transform_7, window_bounds = array<i64: 1, 80, 80>}, {transform_indices = @transform_8, window_bounds = array<i64: 1, 1, 80>}, {pipeline_mode = #tpu.pipeline_mode<synchronous>, transform_indices = @transform_9, window_bounds = array<i64: 576, 64>}, {transform_indices = @transform_10, window_bounds = array<i64: 1, 9, 80, 80>}, {transform_indices = @transform_11, window_bounds = array<i64: 1, 1, 80>}, {transform_indices = @transform_12, window_bounds = array<i64: 1, 80, 160>}, {transform_indices = @transform_13, window_bounds = array<i64: 1, 1, 160>}, {pipeline_mode = #tpu.pipeline_mode<synchronous>, transform_indices = @transform_14, window_bounds = array<i64: 288, 64>}, {transform_indices = @transform_15, window_bounds = array<i64: 1, 9, 160, 160>}, {transform_indices = @transform_16, window_bounds = array<i64: 1, 1, 160>}, {pipeline_mode = #tpu.pipeline_mode<synchronous>, transform_indices = @transform_17, window_bounds = array<i64: 32, 64>}, {transform_indices = @transform_18, window_bounds = array<i64: 1, 80, 160>}, {transform_indices = @transform_19, window_bounds = array<i64: 1, 1, 160>}, {pipeline_mode = #tpu.pipeline_mode<synchronous>, transform_indices = @transform_20, window_bounds = array<i64: 2, 32>}, {transform_indices = @transform_21, window_bounds = array<i64: 1, 160, 8>}, {transform_indices = @transform_22, window_bounds = array<i64: 1, 2, 8>}]} {
    %c0 = arith.constant 0 : index
    %c0_0 = arith.constant 0 : index
    %0 = vector.load %arg1[%c0, %c0_0] : memref<64x16xf32, #tpu.memory_space<vmem>>, vector<64x16xf32>
    %1 = arith.truncf %0 : vector<64x16xf32> to vector<64x16xbf16>
    %c0_1 = arith.constant 0 : index
    %c0_2 = arith.constant 0 : index
    %c0_3 = arith.constant 0 : index
    %2 = vector.load %arg2[%c0_1, %c0_2, %c0_3] : memref<1x64x64xbf16, #tpu.memory_space<vmem>>, vector<1x64x64xbf16>
    %3 = vector.shape_cast %2 : vector<1x64x64xbf16> to vector<64x64xbf16>
    %cst = arith.constant dense<0.000000e+00> : vector<64x16xf32>
    %4 = tpu.matmul %3, %1, %cst {dimension_numbers = #tpu.dot_dimension_numbers<[1], [0], [0], [1], [0, 0, 1, 1], [], []>} : vector<64x64xbf16>, vector<64x16xbf16>, vector<64x16xf32> -> vector<64x16xf32>
    %5 = arith.truncf %4 : vector<64x16xf32> to vector<64x16xbf16>
    %c0_4 = arith.constant 0 : index
    %c0_5 = arith.constant 0 : index
    %c0_6 = arith.constant 0 : index
    %6 = vector.load %arg3[%c0_4, %c0_5, %c0_6] : memref<1x16x80xbf16, #tpu.memory_space<vmem>>, vector<1x16x80xbf16>
    %7 = vector.shape_cast %6 : vector<1x16x80xbf16> to vector<16x80xbf16>
    %cst_7 = arith.constant dense<0.000000e+00> : vector<64x80xf32>
    %8 = tpu.matmul %5, %7, %cst_7 {dimension_numbers = #tpu.dot_dimension_numbers<[1], [0], [0], [1], [0, 0, 1, 1], [], []>} : vector<64x16xbf16>, vector<16x80xbf16>, vector<64x80xf32> -> vector<64x80xf32>
    %c0_8 = arith.constant 0 : index
    %c0_9 = arith.constant 0 : index
    %c0_10 = arith.constant 0 : index
    %9 = vector.load %arg4[%c0_8, %c0_9, %c0_10] : memref<1x1x80xf32, #tpu.memory_space<vmem>>, vector<1x1x80xf32>
    %10 = vector.shape_cast %9 : vector<1x1x80xf32> to vector<1x80xf32>
    %11 = vector.broadcast %10 : vector<1x80xf32> to vector<64x80xf32>
    %12 = arith.addf %8, %11 : vector<64x80xf32>
    %cst_11 = arith.constant 0.000000e+00 : f32
    %13 = vector.broadcast %cst_11 : f32 to vector<64x80xf32>
    %14 = arith.maximumf %12, %13 : vector<64x80xf32>
    %c0_12 = arith.constant 0 : index
    %c0_13 = arith.constant 0 : index
    %15 = vector.load %arg5[%c0_12, %c0_13] : memref<576x64xbf16, #tpu.memory_space<vmem>>, vector<576x64xbf16>
    %16 = arith.truncf %14 : vector<64x80xf32> to vector<64x80xbf16>
    %cst_14 = arith.constant dense<0.000000e+00> : vector<576x80xf32>
    %17 = tpu.matmul %15, %16, %cst_14 {dimension_numbers = #tpu.dot_dimension_numbers<[1], [0], [0], [1], [0, 0, 1, 1], [], []>} : vector<576x64xbf16>, vector<64x80xbf16>, vector<576x80xf32> -> vector<576x80xf32>
    %18 = arith.truncf %17 : vector<576x80xf32> to vector<576x80xbf16>
    %c0_15 = arith.constant 0 : index
    %c0_16 = arith.constant 0 : index
    %c0_17 = arith.constant 0 : index
    %19 = vector.load %arg7[%c0_15, %c0_16, %c0_17] : memref<1x1x80xf32, #tpu.memory_space<vmem>>, vector<1x1x80xf32>
    %20 = vector.shape_cast %19 : vector<1x1x80xf32> to vector<1x80xf32>
    %21 = vector.extract_strided_slice %18 {offsets = [0, 0], sizes = [64, 80], strides = [1, 1]} : vector<576x80xbf16> to vector<64x80xbf16>
    %c0_18 = arith.constant 0 : index
    %c0_19 = arith.constant 0 : index
    %c0_20 = arith.constant 0 : index
    %c0_21 = arith.constant 0 : index
    %22 = vector.load %arg6[%c0_18, %c0_19, %c0_20, %c0_21] : memref<1x9x80x80xbf16, #tpu.memory_space<vmem>>, vector<1x1x80x80xbf16>
    %23 = vector.shape_cast %22 : vector<1x1x80x80xbf16> to vector<80x80xbf16>
    %cst_22 = arith.constant dense<0.000000e+00> : vector<64x80xf32>
    %24 = tpu.matmul %21, %23, %cst_22 {dimension_numbers = #tpu.dot_dimension_numbers<[1], [0], [0], [1], [0, 0, 1, 1], [], []>} : vector<64x80xbf16>, vector<80x80xbf16>, vector<64x80xf32> -> vector<64x80xf32>
    %25 = vector.broadcast %20 : vector<1x80xf32> to vector<64x80xf32>
    %26 = arith.addf %25, %24 : vector<64x80xf32>
    %27 = vector.extract_strided_slice %18 {offsets = [64, 0], sizes = [64, 80], strides = [1, 1]} : vector<576x80xbf16> to vector<64x80xbf16>
    %c0_23 = arith.constant 0 : index
    %c1 = arith.constant 1 : index
    %c0_24 = arith.constant 0 : index
    %c0_25 = arith.constant 0 : index
    %28 = vector.load %arg6[%c0_23, %c1, %c0_24, %c0_25] : memref<1x9x80x80xbf16, #tpu.memory_space<vmem>>, vector<1x1x80x80xbf16>
    %29 = vector.shape_cast %28 : vector<1x1x80x80xbf16> to vector<80x80xbf16>
    %cst_26 = arith.constant dense<0.000000e+00> : vector<64x80xf32>
    %30 = tpu.matmul %27, %29, %cst_26 {dimension_numbers = #tpu.dot_dimension_numbers<[1], [0], [0], [1], [0, 0, 1, 1], [], []>} : vector<64x80xbf16>, vector<80x80xbf16>, vector<64x80xf32> -> vector<64x80xf32>
    %31 = arith.addf %26, %30 : vector<64x80xf32>
    %32 = vector.extract_strided_slice %18 {offsets = [128, 0], sizes = [64, 80], strides = [1, 1]} : vector<576x80xbf16> to vector<64x80xbf16>
    %c0_27 = arith.constant 0 : index
    %c2 = arith.constant 2 : index
    %c0_28 = arith.constant 0 : index
    %c0_29 = arith.constant 0 : index
    %33 = vector.load %arg6[%c0_27, %c2, %c0_28, %c0_29] : memref<1x9x80x80xbf16, #tpu.memory_space<vmem>>, vector<1x1x80x80xbf16>
    %34 = vector.shape_cast %33 : vector<1x1x80x80xbf16> to vector<80x80xbf16>
    %cst_30 = arith.constant dense<0.000000e+00> : vector<64x80xf32>
    %35 = tpu.matmul %32, %34, %cst_30 {dimension_numbers = #tpu.dot_dimension_numbers<[1], [0], [0], [1], [0, 0, 1, 1], [], []>} : vector<64x80xbf16>, vector<80x80xbf16>, vector<64x80xf32> -> vector<64x80xf32>
    %36 = arith.addf %31, %35 : vector<64x80xf32>
    %37 = vector.extract_strided_slice %18 {offsets = [192, 0], sizes = [64, 80], strides = [1, 1]} : vector<576x80xbf16> to vector<64x80xbf16>
    %c0_31 = arith.constant 0 : index
    %c3 = arith.constant 3 : index
    %c0_32 = arith.constant 0 : index
    %c0_33 = arith.constant 0 : index
    %38 = vector.load %arg6[%c0_31, %c3, %c0_32, %c0_33] : memref<1x9x80x80xbf16, #tpu.memory_space<vmem>>, vector<1x1x80x80xbf16>
    %39 = vector.shape_cast %38 : vector<1x1x80x80xbf16> to vector<80x80xbf16>
    %cst_34 = arith.constant dense<0.000000e+00> : vector<64x80xf32>
    %40 = tpu.matmul %37, %39, %cst_34 {dimension_numbers = #tpu.dot_dimension_numbers<[1], [0], [0], [1], [0, 0, 1, 1], [], []>} : vector<64x80xbf16>, vector<80x80xbf16>, vector<64x80xf32> -> vector<64x80xf32>
    %41 = arith.addf %36, %40 : vector<64x80xf32>
    %42 = vector.extract_strided_slice %18 {offsets = [256, 0], sizes = [64, 80], strides = [1, 1]} : vector<576x80xbf16> to vector<64x80xbf16>
    %c0_35 = arith.constant 0 : index
    %c4 = arith.constant 4 : index
    %c0_36 = arith.constant 0 : index
    %c0_37 = arith.constant 0 : index
    %43 = vector.load %arg6[%c0_35, %c4, %c0_36, %c0_37] : memref<1x9x80x80xbf16, #tpu.memory_space<vmem>>, vector<1x1x80x80xbf16>
    %44 = vector.shape_cast %43 : vector<1x1x80x80xbf16> to vector<80x80xbf16>
    %cst_38 = arith.constant dense<0.000000e+00> : vector<64x80xf32>
    %45 = tpu.matmul %42, %44, %cst_38 {dimension_numbers = #tpu.dot_dimension_numbers<[1], [0], [0], [1], [0, 0, 1, 1], [], []>} : vector<64x80xbf16>, vector<80x80xbf16>, vector<64x80xf32> -> vector<64x80xf32>
    %46 = arith.addf %41, %45 : vector<64x80xf32>
    %47 = vector.extract_strided_slice %18 {offsets = [320, 0], sizes = [64, 80], strides = [1, 1]} : vector<576x80xbf16> to vector<64x80xbf16>
    %c0_39 = arith.constant 0 : index
    %c5 = arith.constant 5 : index
    %c0_40 = arith.constant 0 : index
    %c0_41 = arith.constant 0 : index
    %48 = vector.load %arg6[%c0_39, %c5, %c0_40, %c0_41] : memref<1x9x80x80xbf16, #tpu.memory_space<vmem>>, vector<1x1x80x80xbf16>
    %49 = vector.shape_cast %48 : vector<1x1x80x80xbf16> to vector<80x80xbf16>
    %cst_42 = arith.constant dense<0.000000e+00> : vector<64x80xf32>
    %50 = tpu.matmul %47, %49, %cst_42 {dimension_numbers = #tpu.dot_dimension_numbers<[1], [0], [0], [1], [0, 0, 1, 1], [], []>} : vector<64x80xbf16>, vector<80x80xbf16>, vector<64x80xf32> -> vector<64x80xf32>
    %51 = arith.addf %46, %50 : vector<64x80xf32>
    %52 = vector.extract_strided_slice %18 {offsets = [384, 0], sizes = [64, 80], strides = [1, 1]} : vector<576x80xbf16> to vector<64x80xbf16>
    %c0_43 = arith.constant 0 : index
    %c6 = arith.constant 6 : index
    %c0_44 = arith.constant 0 : index
    %c0_45 = arith.constant 0 : index
    %53 = vector.load %arg6[%c0_43, %c6, %c0_44, %c0_45] : memref<1x9x80x80xbf16, #tpu.memory_space<vmem>>, vector<1x1x80x80xbf16>
    %54 = vector.shape_cast %53 : vector<1x1x80x80xbf16> to vector<80x80xbf16>
    %cst_46 = arith.constant dense<0.000000e+00> : vector<64x80xf32>
    %55 = tpu.matmul %52, %54, %cst_46 {dimension_numbers = #tpu.dot_dimension_numbers<[1], [0], [0], [1], [0, 0, 1, 1], [], []>} : vector<64x80xbf16>, vector<80x80xbf16>, vector<64x80xf32> -> vector<64x80xf32>
    %56 = arith.addf %51, %55 : vector<64x80xf32>
    %57 = vector.extract_strided_slice %18 {offsets = [448, 0], sizes = [64, 80], strides = [1, 1]} : vector<576x80xbf16> to vector<64x80xbf16>
    %c0_47 = arith.constant 0 : index
    %c7 = arith.constant 7 : index
    %c0_48 = arith.constant 0 : index
    %c0_49 = arith.constant 0 : index
    %58 = vector.load %arg6[%c0_47, %c7, %c0_48, %c0_49] : memref<1x9x80x80xbf16, #tpu.memory_space<vmem>>, vector<1x1x80x80xbf16>
    %59 = vector.shape_cast %58 : vector<1x1x80x80xbf16> to vector<80x80xbf16>
    %cst_50 = arith.constant dense<0.000000e+00> : vector<64x80xf32>
    %60 = tpu.matmul %57, %59, %cst_50 {dimension_numbers = #tpu.dot_dimension_numbers<[1], [0], [0], [1], [0, 0, 1, 1], [], []>} : vector<64x80xbf16>, vector<80x80xbf16>, vector<64x80xf32> -> vector<64x80xf32>
    %61 = arith.addf %56, %60 : vector<64x80xf32>
    %62 = vector.extract_strided_slice %18 {offsets = [512, 0], sizes = [64, 80], strides = [1, 1]} : vector<576x80xbf16> to vector<64x80xbf16>
    %c0_51 = arith.constant 0 : index
    %c8 = arith.constant 8 : index
    %c0_52 = arith.constant 0 : index
    %c0_53 = arith.constant 0 : index
    %63 = vector.load %arg6[%c0_51, %c8, %c0_52, %c0_53] : memref<1x9x80x80xbf16, #tpu.memory_space<vmem>>, vector<1x1x80x80xbf16>
    %64 = vector.shape_cast %63 : vector<1x1x80x80xbf16> to vector<80x80xbf16>
    %cst_54 = arith.constant dense<0.000000e+00> : vector<64x80xf32>
    %65 = tpu.matmul %62, %64, %cst_54 {dimension_numbers = #tpu.dot_dimension_numbers<[1], [0], [0], [1], [0, 0, 1, 1], [], []>} : vector<64x80xbf16>, vector<80x80xbf16>, vector<64x80xf32> -> vector<64x80xf32>
    %66 = arith.addf %61, %65 : vector<64x80xf32>
    %cst_55 = arith.constant 0.000000e+00 : f32
    %67 = vector.broadcast %cst_55 : f32 to vector<64x80xf32>
    %68 = arith.maximumf %66, %67 : vector<64x80xf32>
    %69 = arith.truncf %68 : vector<64x80xf32> to vector<64x80xbf16>
    %c0_56 = arith.constant 0 : index
    %c0_57 = arith.constant 0 : index
    %c0_58 = arith.constant 0 : index
    %70 = vector.load %arg8[%c0_56, %c0_57, %c0_58] : memref<1x80x80xbf16, #tpu.memory_space<vmem>>, vector<1x80x80xbf16>
    %71 = vector.shape_cast %70 : vector<1x80x80xbf16> to vector<80x80xbf16>
    %cst_59 = arith.constant dense<0.000000e+00> : vector<64x80xf32>
    %72 = tpu.matmul %69, %71, %cst_59 {dimension_numbers = #tpu.dot_dimension_numbers<[1], [0], [0], [1], [0, 0, 1, 1], [], []>} : vector<64x80xbf16>, vector<80x80xbf16>, vector<64x80xf32> -> vector<64x80xf32>
    %c0_60 = arith.constant 0 : index
    %c0_61 = arith.constant 0 : index
    %c0_62 = arith.constant 0 : index
    %73 = vector.load %arg9[%c0_60, %c0_61, %c0_62] : memref<1x1x80xf32, #tpu.memory_space<vmem>>, vector<1x1x80xf32>
    %74 = vector.shape_cast %73 : vector<1x1x80xf32> to vector<1x80xf32>
    %75 = vector.broadcast %74 : vector<1x80xf32> to vector<64x80xf32>
    %76 = arith.addf %72, %75 : vector<64x80xf32>
    %cst_63 = arith.constant 0.000000e+00 : f32
    %77 = vector.broadcast %cst_63 : f32 to vector<64x80xf32>
    %78 = arith.maximumf %76, %77 : vector<64x80xf32>
    %c0_64 = arith.constant 0 : index
    %c0_65 = arith.constant 0 : index
    %79 = vector.load %arg10[%c0_64, %c0_65] : memref<576x64xbf16, #tpu.memory_space<vmem>>, vector<576x64xbf16>
    %80 = arith.truncf %78 : vector<64x80xf32> to vector<64x80xbf16>
    %cst_66 = arith.constant dense<0.000000e+00> : vector<576x80xf32>
    %81 = tpu.matmul %79, %80, %cst_66 {dimension_numbers = #tpu.dot_dimension_numbers<[1], [0], [0], [1], [0, 0, 1, 1], [], []>} : vector<576x64xbf16>, vector<64x80xbf16>, vector<576x80xf32> -> vector<576x80xf32>
    %82 = arith.truncf %81 : vector<576x80xf32> to vector<576x80xbf16>
    %c0_67 = arith.constant 0 : index
    %c0_68 = arith.constant 0 : index
    %c0_69 = arith.constant 0 : index
    %83 = vector.load %arg12[%c0_67, %c0_68, %c0_69] : memref<1x1x80xf32, #tpu.memory_space<vmem>>, vector<1x1x80xf32>
    %84 = vector.shape_cast %83 : vector<1x1x80xf32> to vector<1x80xf32>
    %85 = vector.extract_strided_slice %82 {offsets = [0, 0], sizes = [64, 80], strides = [1, 1]} : vector<576x80xbf16> to vector<64x80xbf16>
    %c0_70 = arith.constant 0 : index
    %c0_71 = arith.constant 0 : index
    %c0_72 = arith.constant 0 : index
    %c0_73 = arith.constant 0 : index
    %86 = vector.load %arg11[%c0_70, %c0_71, %c0_72, %c0_73] : memref<1x9x80x80xbf16, #tpu.memory_space<vmem>>, vector<1x1x80x80xbf16>
    %87 = vector.shape_cast %86 : vector<1x1x80x80xbf16> to vector<80x80xbf16>
    %cst_74 = arith.constant dense<0.000000e+00> : vector<64x80xf32>
    %88 = tpu.matmul %85, %87, %cst_74 {dimension_numbers = #tpu.dot_dimension_numbers<[1], [0], [0], [1], [0, 0, 1, 1], [], []>} : vector<64x80xbf16>, vector<80x80xbf16>, vector<64x80xf32> -> vector<64x80xf32>
    %89 = vector.broadcast %84 : vector<1x80xf32> to vector<64x80xf32>
    %90 = arith.addf %89, %88 : vector<64x80xf32>
    %91 = vector.extract_strided_slice %82 {offsets = [64, 0], sizes = [64, 80], strides = [1, 1]} : vector<576x80xbf16> to vector<64x80xbf16>
    %c0_75 = arith.constant 0 : index
    %c1_76 = arith.constant 1 : index
    %c0_77 = arith.constant 0 : index
    %c0_78 = arith.constant 0 : index
    %92 = vector.load %arg11[%c0_75, %c1_76, %c0_77, %c0_78] : memref<1x9x80x80xbf16, #tpu.memory_space<vmem>>, vector<1x1x80x80xbf16>
    %93 = vector.shape_cast %92 : vector<1x1x80x80xbf16> to vector<80x80xbf16>
    %cst_79 = arith.constant dense<0.000000e+00> : vector<64x80xf32>
    %94 = tpu.matmul %91, %93, %cst_79 {dimension_numbers = #tpu.dot_dimension_numbers<[1], [0], [0], [1], [0, 0, 1, 1], [], []>} : vector<64x80xbf16>, vector<80x80xbf16>, vector<64x80xf32> -> vector<64x80xf32>
    %95 = arith.addf %90, %94 : vector<64x80xf32>
    %96 = vector.extract_strided_slice %82 {offsets = [128, 0], sizes = [64, 80], strides = [1, 1]} : vector<576x80xbf16> to vector<64x80xbf16>
    %c0_80 = arith.constant 0 : index
    %c2_81 = arith.constant 2 : index
    %c0_82 = arith.constant 0 : index
    %c0_83 = arith.constant 0 : index
    %97 = vector.load %arg11[%c0_80, %c2_81, %c0_82, %c0_83] : memref<1x9x80x80xbf16, #tpu.memory_space<vmem>>, vector<1x1x80x80xbf16>
    %98 = vector.shape_cast %97 : vector<1x1x80x80xbf16> to vector<80x80xbf16>
    %cst_84 = arith.constant dense<0.000000e+00> : vector<64x80xf32>
    %99 = tpu.matmul %96, %98, %cst_84 {dimension_numbers = #tpu.dot_dimension_numbers<[1], [0], [0], [1], [0, 0, 1, 1], [], []>} : vector<64x80xbf16>, vector<80x80xbf16>, vector<64x80xf32> -> vector<64x80xf32>
    %100 = arith.addf %95, %99 : vector<64x80xf32>
    %101 = vector.extract_strided_slice %82 {offsets = [192, 0], sizes = [64, 80], strides = [1, 1]} : vector<576x80xbf16> to vector<64x80xbf16>
    %c0_85 = arith.constant 0 : index
    %c3_86 = arith.constant 3 : index
    %c0_87 = arith.constant 0 : index
    %c0_88 = arith.constant 0 : index
    %102 = vector.load %arg11[%c0_85, %c3_86, %c0_87, %c0_88] : memref<1x9x80x80xbf16, #tpu.memory_space<vmem>>, vector<1x1x80x80xbf16>
    %103 = vector.shape_cast %102 : vector<1x1x80x80xbf16> to vector<80x80xbf16>
    %cst_89 = arith.constant dense<0.000000e+00> : vector<64x80xf32>
    %104 = tpu.matmul %101, %103, %cst_89 {dimension_numbers = #tpu.dot_dimension_numbers<[1], [0], [0], [1], [0, 0, 1, 1], [], []>} : vector<64x80xbf16>, vector<80x80xbf16>, vector<64x80xf32> -> vector<64x80xf32>
    %105 = arith.addf %100, %104 : vector<64x80xf32>
    %106 = vector.extract_strided_slice %82 {offsets = [256, 0], sizes = [64, 80], strides = [1, 1]} : vector<576x80xbf16> to vector<64x80xbf16>
    %c0_90 = arith.constant 0 : index
    %c4_91 = arith.constant 4 : index
    %c0_92 = arith.constant 0 : index
    %c0_93 = arith.constant 0 : index
    %107 = vector.load %arg11[%c0_90, %c4_91, %c0_92, %c0_93] : memref<1x9x80x80xbf16, #tpu.memory_space<vmem>>, vector<1x1x80x80xbf16>
    %108 = vector.shape_cast %107 : vector<1x1x80x80xbf16> to vector<80x80xbf16>
    %cst_94 = arith.constant dense<0.000000e+00> : vector<64x80xf32>
    %109 = tpu.matmul %106, %108, %cst_94 {dimension_numbers = #tpu.dot_dimension_numbers<[1], [0], [0], [1], [0, 0, 1, 1], [], []>} : vector<64x80xbf16>, vector<80x80xbf16>, vector<64x80xf32> -> vector<64x80xf32>
    %110 = arith.addf %105, %109 : vector<64x80xf32>
    %111 = vector.extract_strided_slice %82 {offsets = [320, 0], sizes = [64, 80], strides = [1, 1]} : vector<576x80xbf16> to vector<64x80xbf16>
    %c0_95 = arith.constant 0 : index
    %c5_96 = arith.constant 5 : index
    %c0_97 = arith.constant 0 : index
    %c0_98 = arith.constant 0 : index
    %112 = vector.load %arg11[%c0_95, %c5_96, %c0_97, %c0_98] : memref<1x9x80x80xbf16, #tpu.memory_space<vmem>>, vector<1x1x80x80xbf16>
    %113 = vector.shape_cast %112 : vector<1x1x80x80xbf16> to vector<80x80xbf16>
    %cst_99 = arith.constant dense<0.000000e+00> : vector<64x80xf32>
    %114 = tpu.matmul %111, %113, %cst_99 {dimension_numbers = #tpu.dot_dimension_numbers<[1], [0], [0], [1], [0, 0, 1, 1], [], []>} : vector<64x80xbf16>, vector<80x80xbf16>, vector<64x80xf32> -> vector<64x80xf32>
    %115 = arith.addf %110, %114 : vector<64x80xf32>
    %116 = vector.extract_strided_slice %82 {offsets = [384, 0], sizes = [64, 80], strides = [1, 1]} : vector<576x80xbf16> to vector<64x80xbf16>
    %c0_100 = arith.constant 0 : index
    %c6_101 = arith.constant 6 : index
    %c0_102 = arith.constant 0 : index
    %c0_103 = arith.constant 0 : index
    %117 = vector.load %arg11[%c0_100, %c6_101, %c0_102, %c0_103] : memref<1x9x80x80xbf16, #tpu.memory_space<vmem>>, vector<1x1x80x80xbf16>
    %118 = vector.shape_cast %117 : vector<1x1x80x80xbf16> to vector<80x80xbf16>
    %cst_104 = arith.constant dense<0.000000e+00> : vector<64x80xf32>
    %119 = tpu.matmul %116, %118, %cst_104 {dimension_numbers = #tpu.dot_dimension_numbers<[1], [0], [0], [1], [0, 0, 1, 1], [], []>} : vector<64x80xbf16>, vector<80x80xbf16>, vector<64x80xf32> -> vector<64x80xf32>
    %120 = arith.addf %115, %119 : vector<64x80xf32>
    %121 = vector.extract_strided_slice %82 {offsets = [448, 0], sizes = [64, 80], strides = [1, 1]} : vector<576x80xbf16> to vector<64x80xbf16>
    %c0_105 = arith.constant 0 : index
    %c7_106 = arith.constant 7 : index
    %c0_107 = arith.constant 0 : index
    %c0_108 = arith.constant 0 : index
    %122 = vector.load %arg11[%c0_105, %c7_106, %c0_107, %c0_108] : memref<1x9x80x80xbf16, #tpu.memory_space<vmem>>, vector<1x1x80x80xbf16>
    %123 = vector.shape_cast %122 : vector<1x1x80x80xbf16> to vector<80x80xbf16>
    %cst_109 = arith.constant dense<0.000000e+00> : vector<64x80xf32>
    %124 = tpu.matmul %121, %123, %cst_109 {dimension_numbers = #tpu.dot_dimension_numbers<[1], [0], [0], [1], [0, 0, 1, 1], [], []>} : vector<64x80xbf16>, vector<80x80xbf16>, vector<64x80xf32> -> vector<64x80xf32>
    %125 = arith.addf %120, %124 : vector<64x80xf32>
    %126 = vector.extract_strided_slice %82 {offsets = [512, 0], sizes = [64, 80], strides = [1, 1]} : vector<576x80xbf16> to vector<64x80xbf16>
    %c0_110 = arith.constant 0 : index
    %c8_111 = arith.constant 8 : index
    %c0_112 = arith.constant 0 : index
    %c0_113 = arith.constant 0 : index
    %127 = vector.load %arg11[%c0_110, %c8_111, %c0_112, %c0_113] : memref<1x9x80x80xbf16, #tpu.memory_space<vmem>>, vector<1x1x80x80xbf16>
    %128 = vector.shape_cast %127 : vector<1x1x80x80xbf16> to vector<80x80xbf16>
    %cst_114 = arith.constant dense<0.000000e+00> : vector<64x80xf32>
    %129 = tpu.matmul %126, %128, %cst_114 {dimension_numbers = #tpu.dot_dimension_numbers<[1], [0], [0], [1], [0, 0, 1, 1], [], []>} : vector<64x80xbf16>, vector<80x80xbf16>, vector<64x80xf32> -> vector<64x80xf32>
    %130 = arith.addf %125, %129 : vector<64x80xf32>
    %131 = arith.addf %130, %68 : vector<64x80xf32>
    %cst_115 = arith.constant 0.000000e+00 : f32
    %132 = vector.broadcast %cst_115 : f32 to vector<64x80xf32>
    %133 = arith.maximumf %131, %132 : vector<64x80xf32>
    %134 = arith.truncf %133 : vector<64x80xf32> to vector<64x80xbf16>
    %c0_116 = arith.constant 0 : index
    %c0_117 = arith.constant 0 : index
    %c0_118 = arith.constant 0 : index
    %135 = vector.load %arg13[%c0_116, %c0_117, %c0_118] : memref<1x80x160xbf16, #tpu.memory_space<vmem>>, vector<1x80x160xbf16>
    %136 = vector.shape_cast %135 : vector<1x80x160xbf16> to vector<80x160xbf16>
    %cst_119 = arith.constant dense<0.000000e+00> : vector<64x160xf32>
    %137 = tpu.matmul %134, %136, %cst_119 {dimension_numbers = #tpu.dot_dimension_numbers<[1], [0], [0], [1], [0, 0, 1, 1], [], []>} : vector<64x80xbf16>, vector<80x160xbf16>, vector<64x160xf32> -> vector<64x160xf32>
    %c0_120 = arith.constant 0 : index
    %c0_121 = arith.constant 0 : index
    %c0_122 = arith.constant 0 : index
    %138 = vector.load %arg14[%c0_120, %c0_121, %c0_122] : memref<1x1x160xf32, #tpu.memory_space<vmem>>, vector<1x1x160xf32>
    %139 = vector.shape_cast %138 : vector<1x1x160xf32> to vector<1x160xf32>
    %140 = vector.broadcast %139 : vector<1x160xf32> to vector<64x160xf32>
    %141 = arith.addf %137, %140 : vector<64x160xf32>
    %cst_123 = arith.constant 0.000000e+00 : f32
    %142 = vector.broadcast %cst_123 : f32 to vector<64x160xf32>
    %143 = arith.maximumf %141, %142 : vector<64x160xf32>
    %c0_124 = arith.constant 0 : index
    %c0_125 = arith.constant 0 : index
    %144 = vector.load %arg15[%c0_124, %c0_125] : memref<288x64xbf16, #tpu.memory_space<vmem>>, vector<288x64xbf16>
    %145 = arith.truncf %143 : vector<64x160xf32> to vector<64x160xbf16>
    %cst_126 = arith.constant dense<0.000000e+00> : vector<288x160xf32>
    %146 = tpu.matmul %144, %145, %cst_126 {dimension_numbers = #tpu.dot_dimension_numbers<[1], [0], [0], [1], [0, 0, 1, 1], [], []>} : vector<288x64xbf16>, vector<64x160xbf16>, vector<288x160xf32> -> vector<288x160xf32>
    %147 = arith.truncf %146 : vector<288x160xf32> to vector<288x160xbf16>
    %c0_127 = arith.constant 0 : index
    %c0_128 = arith.constant 0 : index
    %c0_129 = arith.constant 0 : index
    %148 = vector.load %arg17[%c0_127, %c0_128, %c0_129] : memref<1x1x160xf32, #tpu.memory_space<vmem>>, vector<1x1x160xf32>
    %149 = vector.shape_cast %148 : vector<1x1x160xf32> to vector<1x160xf32>
    %150 = vector.extract_strided_slice %147 {offsets = [0, 0], sizes = [32, 160], strides = [1, 1]} : vector<288x160xbf16> to vector<32x160xbf16>
    %c0_130 = arith.constant 0 : index
    %c0_131 = arith.constant 0 : index
    %c0_132 = arith.constant 0 : index
    %c0_133 = arith.constant 0 : index
    %151 = vector.load %arg16[%c0_130, %c0_131, %c0_132, %c0_133] : memref<1x9x160x160xbf16, #tpu.memory_space<vmem>>, vector<1x1x160x160xbf16>
    %152 = vector.shape_cast %151 : vector<1x1x160x160xbf16> to vector<160x160xbf16>
    %cst_134 = arith.constant dense<0.000000e+00> : vector<32x160xf32>
    %153 = tpu.matmul %150, %152, %cst_134 {dimension_numbers = #tpu.dot_dimension_numbers<[1], [0], [0], [1], [0, 0, 1, 1], [], []>} : vector<32x160xbf16>, vector<160x160xbf16>, vector<32x160xf32> -> vector<32x160xf32>
    %154 = vector.broadcast %149 : vector<1x160xf32> to vector<32x160xf32>
    %155 = arith.addf %154, %153 : vector<32x160xf32>
    %156 = vector.extract_strided_slice %147 {offsets = [32, 0], sizes = [32, 160], strides = [1, 1]} : vector<288x160xbf16> to vector<32x160xbf16>
    %c0_135 = arith.constant 0 : index
    %c1_136 = arith.constant 1 : index
    %c0_137 = arith.constant 0 : index
    %c0_138 = arith.constant 0 : index
    %157 = vector.load %arg16[%c0_135, %c1_136, %c0_137, %c0_138] : memref<1x9x160x160xbf16, #tpu.memory_space<vmem>>, vector<1x1x160x160xbf16>
    %158 = vector.shape_cast %157 : vector<1x1x160x160xbf16> to vector<160x160xbf16>
    %cst_139 = arith.constant dense<0.000000e+00> : vector<32x160xf32>
    %159 = tpu.matmul %156, %158, %cst_139 {dimension_numbers = #tpu.dot_dimension_numbers<[1], [0], [0], [1], [0, 0, 1, 1], [], []>} : vector<32x160xbf16>, vector<160x160xbf16>, vector<32x160xf32> -> vector<32x160xf32>
    %160 = arith.addf %155, %159 : vector<32x160xf32>
    %161 = vector.extract_strided_slice %147 {offsets = [64, 0], sizes = [32, 160], strides = [1, 1]} : vector<288x160xbf16> to vector<32x160xbf16>
    %c0_140 = arith.constant 0 : index
    %c2_141 = arith.constant 2 : index
    %c0_142 = arith.constant 0 : index
    %c0_143 = arith.constant 0 : index
    %162 = vector.load %arg16[%c0_140, %c2_141, %c0_142, %c0_143] : memref<1x9x160x160xbf16, #tpu.memory_space<vmem>>, vector<1x1x160x160xbf16>
    %163 = vector.shape_cast %162 : vector<1x1x160x160xbf16> to vector<160x160xbf16>
    %cst_144 = arith.constant dense<0.000000e+00> : vector<32x160xf32>
    %164 = tpu.matmul %161, %163, %cst_144 {dimension_numbers = #tpu.dot_dimension_numbers<[1], [0], [0], [1], [0, 0, 1, 1], [], []>} : vector<32x160xbf16>, vector<160x160xbf16>, vector<32x160xf32> -> vector<32x160xf32>
    %165 = arith.addf %160, %164 : vector<32x160xf32>
    %166 = vector.extract_strided_slice %147 {offsets = [96, 0], sizes = [32, 160], strides = [1, 1]} : vector<288x160xbf16> to vector<32x160xbf16>
    %c0_145 = arith.constant 0 : index
    %c3_146 = arith.constant 3 : index
    %c0_147 = arith.constant 0 : index
    %c0_148 = arith.constant 0 : index
    %167 = vector.load %arg16[%c0_145, %c3_146, %c0_147, %c0_148] : memref<1x9x160x160xbf16, #tpu.memory_space<vmem>>, vector<1x1x160x160xbf16>
    %168 = vector.shape_cast %167 : vector<1x1x160x160xbf16> to vector<160x160xbf16>
    %cst_149 = arith.constant dense<0.000000e+00> : vector<32x160xf32>
    %169 = tpu.matmul %166, %168, %cst_149 {dimension_numbers = #tpu.dot_dimension_numbers<[1], [0], [0], [1], [0, 0, 1, 1], [], []>} : vector<32x160xbf16>, vector<160x160xbf16>, vector<32x160xf32> -> vector<32x160xf32>
    %170 = arith.addf %165, %169 : vector<32x160xf32>
    %171 = vector.extract_strided_slice %147 {offsets = [128, 0], sizes = [32, 160], strides = [1, 1]} : vector<288x160xbf16> to vector<32x160xbf16>
    %c0_150 = arith.constant 0 : index
    %c4_151 = arith.constant 4 : index
    %c0_152 = arith.constant 0 : index
    %c0_153 = arith.constant 0 : index
    %172 = vector.load %arg16[%c0_150, %c4_151, %c0_152, %c0_153] : memref<1x9x160x160xbf16, #tpu.memory_space<vmem>>, vector<1x1x160x160xbf16>
    %173 = vector.shape_cast %172 : vector<1x1x160x160xbf16> to vector<160x160xbf16>
    %cst_154 = arith.constant dense<0.000000e+00> : vector<32x160xf32>
    %174 = tpu.matmul %171, %173, %cst_154 {dimension_numbers = #tpu.dot_dimension_numbers<[1], [0], [0], [1], [0, 0, 1, 1], [], []>} : vector<32x160xbf16>, vector<160x160xbf16>, vector<32x160xf32> -> vector<32x160xf32>
    %175 = arith.addf %170, %174 : vector<32x160xf32>
    %176 = vector.extract_strided_slice %147 {offsets = [160, 0], sizes = [32, 160], strides = [1, 1]} : vector<288x160xbf16> to vector<32x160xbf16>
    %c0_155 = arith.constant 0 : index
    %c5_156 = arith.constant 5 : index
    %c0_157 = arith.constant 0 : index
    %c0_158 = arith.constant 0 : index
    %177 = vector.load %arg16[%c0_155, %c5_156, %c0_157, %c0_158] : memref<1x9x160x160xbf16, #tpu.memory_space<vmem>>, vector<1x1x160x160xbf16>
    %178 = vector.shape_cast %177 : vector<1x1x160x160xbf16> to vector<160x160xbf16>
    %cst_159 = arith.constant dense<0.000000e+00> : vector<32x160xf32>
    %179 = tpu.matmul %176, %178, %cst_159 {dimension_numbers = #tpu.dot_dimension_numbers<[1], [0], [0], [1], [0, 0, 1, 1], [], []>} : vector<32x160xbf16>, vector<160x160xbf16>, vector<32x160xf32> -> vector<32x160xf32>
    %180 = arith.addf %175, %179 : vector<32x160xf32>
    %181 = vector.extract_strided_slice %147 {offsets = [192, 0], sizes = [32, 160], strides = [1, 1]} : vector<288x160xbf16> to vector<32x160xbf16>
    %c0_160 = arith.constant 0 : index
    %c6_161 = arith.constant 6 : index
    %c0_162 = arith.constant 0 : index
    %c0_163 = arith.constant 0 : index
    %182 = vector.load %arg16[%c0_160, %c6_161, %c0_162, %c0_163] : memref<1x9x160x160xbf16, #tpu.memory_space<vmem>>, vector<1x1x160x160xbf16>
    %183 = vector.shape_cast %182 : vector<1x1x160x160xbf16> to vector<160x160xbf16>
    %cst_164 = arith.constant dense<0.000000e+00> : vector<32x160xf32>
    %184 = tpu.matmul %181, %183, %cst_164 {dimension_numbers = #tpu.dot_dimension_numbers<[1], [0], [0], [1], [0, 0, 1, 1], [], []>} : vector<32x160xbf16>, vector<160x160xbf16>, vector<32x160xf32> -> vector<32x160xf32>
    %185 = arith.addf %180, %184 : vector<32x160xf32>
    %186 = vector.extract_strided_slice %147 {offsets = [224, 0], sizes = [32, 160], strides = [1, 1]} : vector<288x160xbf16> to vector<32x160xbf16>
    %c0_165 = arith.constant 0 : index
    %c7_166 = arith.constant 7 : index
    %c0_167 = arith.constant 0 : index
    %c0_168 = arith.constant 0 : index
    %187 = vector.load %arg16[%c0_165, %c7_166, %c0_167, %c0_168] : memref<1x9x160x160xbf16, #tpu.memory_space<vmem>>, vector<1x1x160x160xbf16>
    %188 = vector.shape_cast %187 : vector<1x1x160x160xbf16> to vector<160x160xbf16>
    %cst_169 = arith.constant dense<0.000000e+00> : vector<32x160xf32>
    %189 = tpu.matmul %186, %188, %cst_169 {dimension_numbers = #tpu.dot_dimension_numbers<[1], [0], [0], [1], [0, 0, 1, 1], [], []>} : vector<32x160xbf16>, vector<160x160xbf16>, vector<32x160xf32> -> vector<32x160xf32>
    %190 = arith.addf %185, %189 : vector<32x160xf32>
    %191 = vector.extract_strided_slice %147 {offsets = [256, 0], sizes = [32, 160], strides = [1, 1]} : vector<288x160xbf16> to vector<32x160xbf16>
    %c0_170 = arith.constant 0 : index
    %c8_171 = arith.constant 8 : index
    %c0_172 = arith.constant 0 : index
    %c0_173 = arith.constant 0 : index
    %192 = vector.load %arg16[%c0_170, %c8_171, %c0_172, %c0_173] : memref<1x9x160x160xbf16, #tpu.memory_space<vmem>>, vector<1x1x160x160xbf16>
    %193 = vector.shape_cast %192 : vector<1x1x160x160xbf16> to vector<160x160xbf16>
    %cst_174 = arith.constant dense<0.000000e+00> : vector<32x160xf32>
    %194 = tpu.matmul %191, %193, %cst_174 {dimension_numbers = #tpu.dot_dimension_numbers<[1], [0], [0], [1], [0, 0, 1, 1], [], []>} : vector<32x160xbf16>, vector<160x160xbf16>, vector<32x160xf32> -> vector<32x160xf32>
    %195 = arith.addf %190, %194 : vector<32x160xf32>
    %c0_175 = arith.constant 0 : index
    %c0_176 = arith.constant 0 : index
    %196 = vector.load %arg18[%c0_175, %c0_176] : memref<32x64xbf16, #tpu.memory_space<vmem>>, vector<32x64xbf16>
    %cst_177 = arith.constant dense<0.000000e+00> : vector<32x80xf32>
    %197 = tpu.matmul %196, %134, %cst_177 {dimension_numbers = #tpu.dot_dimension_numbers<[1], [0], [0], [1], [0, 0, 1, 1], [], []>} : vector<32x64xbf16>, vector<64x80xbf16>, vector<32x80xf32> -> vector<32x80xf32>
    %198 = arith.truncf %197 : vector<32x80xf32> to vector<32x80xbf16>
    %c0_178 = arith.constant 0 : index
    %c0_179 = arith.constant 0 : index
    %c0_180 = arith.constant 0 : index
    %199 = vector.load %arg19[%c0_178, %c0_179, %c0_180] : memref<1x80x160xbf16, #tpu.memory_space<vmem>>, vector<1x80x160xbf16>
    %200 = vector.shape_cast %199 : vector<1x80x160xbf16> to vector<80x160xbf16>
    %cst_181 = arith.constant dense<0.000000e+00> : vector<32x160xf32>
    %201 = tpu.matmul %198, %200, %cst_181 {dimension_numbers = #tpu.dot_dimension_numbers<[1], [0], [0], [1], [0, 0, 1, 1], [], []>} : vector<32x80xbf16>, vector<80x160xbf16>, vector<32x160xf32> -> vector<32x160xf32>
    %c0_182 = arith.constant 0 : index
    %c0_183 = arith.constant 0 : index
    %c0_184 = arith.constant 0 : index
    %202 = vector.load %arg20[%c0_182, %c0_183, %c0_184] : memref<1x1x160xf32, #tpu.memory_space<vmem>>, vector<1x1x160xf32>
    %203 = vector.shape_cast %202 : vector<1x1x160xf32> to vector<1x160xf32>
    %204 = vector.broadcast %203 : vector<1x160xf32> to vector<32x160xf32>
    %205 = arith.addf %201, %204 : vector<32x160xf32>
    %206 = arith.addf %195, %205 : vector<32x160xf32>
    %cst_185 = arith.constant 0.000000e+00 : f32
    %207 = vector.broadcast %cst_185 : f32 to vector<32x160xf32>
    %208 = arith.maximumf %206, %207 : vector<32x160xf32>
    %c0_186 = arith.constant 0 : index
    %c0_187 = arith.constant 0 : index
    %209 = vector.load %arg21[%c0_186, %c0_187] : memref<2x32xf32, #tpu.memory_space<vmem>>, vector<2x32xf32>
    %c0_188 = arith.constant 0 : index
    %c0_189 = arith.constant 0 : index
    %c0_190 = arith.constant 0 : index
    %210 = vector.load %arg22[%c0_188, %c0_189, %c0_190] : memref<1x160x8xf32, #tpu.memory_space<vmem>>, vector<1x160x8xf32>
    %211 = vector.shape_cast %210 : vector<1x160x8xf32> to vector<160x8xf32>
    %cst_191 = arith.constant dense<0.000000e+00> : vector<2x160xf32>
    %212 = tpu.matmul %209, %208, %cst_191 {dimension_numbers = #tpu.dot_dimension_numbers<[1], [0], [0], [1], [0, 0, 1, 1], [], []>} : vector<2x32xf32>, vector<32x160xf32>, vector<2x160xf32> -> vector<2x160xf32>
    %cst_192 = arith.constant dense<0.000000e+00> : vector<2x8xf32>
    %213 = tpu.matmul %212, %211, %cst_192 {dimension_numbers = #tpu.dot_dimension_numbers<[1], [0], [0], [1], [0, 0, 1, 1], [], []>} : vector<2x160xf32>, vector<160x8xf32>, vector<2x8xf32> -> vector<2x8xf32>
    %c0_193 = arith.constant 0 : index
    %c0_194 = arith.constant 0 : index
    %c0_195 = arith.constant 0 : index
    %214 = vector.load %arg23[%c0_193, %c0_194, %c0_195] : memref<1x2x8xf32, #tpu.memory_space<vmem>>, vector<1x2x8xf32>
    %215 = vector.shape_cast %214 : vector<1x2x8xf32> to vector<2x8xf32>
    %216 = vector.shape_cast %213 : vector<2x8xf32> to vector<1x2x8xf32>
    tpu.vector_store %arg23[%c0_193, %c0_194, %c0_195], %216 {strides = array<i32>} : memref<1x2x8xf32, #tpu.memory_space<vmem>>, vector<1x2x8xf32>,
    return
  }
  func.func @transform_0(%arg0: i32) -> (i32, i32) {
    %c0_i32 = arith.constant 0 : i32
    %c0_i32_0 = arith.constant 0 : i32
    %c0_i32_1 = arith.constant 0 : i32
    return %c0_i32, %c0_i32_0 : i32, i32
  }
  func.func @transform_1(%arg0: i32) -> (i32, i32, i32) {
    %c0_i32 = arith.constant 0 : i32
    %c0_i32_0 = arith.constant 0 : i32
    %c0_i32_1 = arith.constant 0 : i32
    return %arg0, %c0_i32, %c0_i32_0 : i32, i32, i32
  }
  func.func @transform_2(%arg0: i32) -> (i32, i32, i32) {
    %c0_i32 = arith.constant 0 : i32
    %c0_i32_0 = arith.constant 0 : i32
    %c0_i32_1 = arith.constant 0 : i32
    return %arg0, %c0_i32, %c0_i32_0 : i32, i32, i32
  }
  func.func @transform_3(%arg0: i32) -> (i32, i32, i32) {
    %c0_i32 = arith.constant 0 : i32
    %c0_i32_0 = arith.constant 0 : i32
    %c0_i32_1 = arith.constant 0 : i32
    return %arg0, %c0_i32, %c0_i32_0 : i32, i32, i32
  }
  func.func @transform_4(%arg0: i32) -> (i32, i32) {
    %c0_i32 = arith.constant 0 : i32
    %c0_i32_0 = arith.constant 0 : i32
    %c0_i32_1 = arith.constant 0 : i32
    return %c0_i32, %c0_i32_0 : i32, i32
  }
  func.func @transform_5(%arg0: i32) -> (i32, i32, i32, i32) {
    %c0_i32 = arith.constant 0 : i32
    %c0_i32_0 = arith.constant 0 : i32
    %c0_i32_1 = arith.constant 0 : i32
    %c0_i32_2 = arith.constant 0 : i32
    return %arg0, %c0_i32, %c0_i32_0, %c0_i32_1 : i32, i32, i32, i32
  }
  func.func @transform_6(%arg0: i32) -> (i32, i32, i32) {
    %c0_i32 = arith.constant 0 : i32
    %c0_i32_0 = arith.constant 0 : i32
    %c0_i32_1 = arith.constant 0 : i32
    return %arg0, %c0_i32, %c0_i32_0 : i32, i32, i32
  }
  func.func @transform_7(%arg0: i32) -> (i32, i32, i32) {
    %c0_i32 = arith.constant 0 : i32
    %c0_i32_0 = arith.constant 0 : i32
    %c0_i32_1 = arith.constant 0 : i32
    return %arg0, %c0_i32, %c0_i32_0 : i32, i32, i32
  }
  func.func @transform_8(%arg0: i32) -> (i32, i32, i32) {
    %c0_i32 = arith.constant 0 : i32
    %c0_i32_0 = arith.constant 0 : i32
    %c0_i32_1 = arith.constant 0 : i32
    return %arg0, %c0_i32, %c0_i32_0 : i32, i32, i32
  }
  func.func @transform_9(%arg0: i32) -> (i32, i32) {
    %c0_i32 = arith.constant 0 : i32
    %c0_i32_0 = arith.constant 0 : i32
    %c0_i32_1 = arith.constant 0 : i32
    return %c0_i32, %c0_i32_0 : i32, i32
  }
  func.func @transform_10(%arg0: i32) -> (i32, i32, i32, i32) {
    %c0_i32 = arith.constant 0 : i32
    %c0_i32_0 = arith.constant 0 : i32
    %c0_i32_1 = arith.constant 0 : i32
    %c0_i32_2 = arith.constant 0 : i32
    return %arg0, %c0_i32, %c0_i32_0, %c0_i32_1 : i32, i32, i32, i32
  }
  func.func @transform_11(%arg0: i32) -> (i32, i32, i32) {
    %c0_i32 = arith.constant 0 : i32
    %c0_i32_0 = arith.constant 0 : i32
    %c0_i32_1 = arith.constant 0 : i32
    return %arg0, %c0_i32, %c0_i32_0 : i32, i32, i32
  }
  func.func @transform_12(%arg0: i32) -> (i32, i32, i32) {
    %c0_i32 = arith.constant 0 : i32
    %c0_i32_0 = arith.constant 0 : i32
    %c0_i32_1 = arith.constant 0 : i32
    return %arg0, %c0_i32, %c0_i32_0 : i32, i32, i32
  }
  func.func @transform_13(%arg0: i32) -> (i32, i32, i32) {
    %c0_i32 = arith.constant 0 : i32
    %c0_i32_0 = arith.constant 0 : i32
    %c0_i32_1 = arith.constant 0 : i32
    return %arg0, %c0_i32, %c0_i32_0 : i32, i32, i32
  }
  func.func @transform_14(%arg0: i32) -> (i32, i32) {
    %c0_i32 = arith.constant 0 : i32
    %c0_i32_0 = arith.constant 0 : i32
    %c0_i32_1 = arith.constant 0 : i32
    return %c0_i32, %c0_i32_0 : i32, i32
  }
  func.func @transform_15(%arg0: i32) -> (i32, i32, i32, i32) {
    %c0_i32 = arith.constant 0 : i32
    %c0_i32_0 = arith.constant 0 : i32
    %c0_i32_1 = arith.constant 0 : i32
    %c0_i32_2 = arith.constant 0 : i32
    return %arg0, %c0_i32, %c0_i32_0, %c0_i32_1 : i32, i32, i32, i32
  }
  func.func @transform_16(%arg0: i32) -> (i32, i32, i32) {
    %c0_i32 = arith.constant 0 : i32
    %c0_i32_0 = arith.constant 0 : i32
    %c0_i32_1 = arith.constant 0 : i32
    return %arg0, %c0_i32, %c0_i32_0 : i32, i32, i32
  }
  func.func @transform_17(%arg0: i32) -> (i32, i32) {
    %c0_i32 = arith.constant 0 : i32
    %c0_i32_0 = arith.constant 0 : i32
    %c0_i32_1 = arith.constant 0 : i32
    return %c0_i32, %c0_i32_0 : i32, i32
  }
  func.func @transform_18(%arg0: i32) -> (i32, i32, i32) {
    %c0_i32 = arith.constant 0 : i32
    %c0_i32_0 = arith.constant 0 : i32
    %c0_i32_1 = arith.constant 0 : i32
    return %arg0, %c0_i32, %c0_i32_0 : i32, i32, i32
  }
  func.func @transform_19(%arg0: i32) -> (i32, i32, i32) {
    %c0_i32 = arith.constant 0 : i32
    %c0_i32_0 = arith.constant 0 : i32
    %c0_i32_1 = arith.constant 0 : i32
    return %arg0, %c0_i32, %c0_i32_0 : i32, i32, i32
  }
  func.func @transform_20(%arg0: i32) -> (i32, i32) {
    %c0_i32 = arith.constant 0 : i32
    %c0_i32_0 = arith.constant 0 : i32
    %c0_i32_1 = arith.constant 0 : i32
    return %c0_i32, %c0_i32_0 : i32, i32
  }
  func.func @transform_21(%arg0: i32) -> (i32, i32, i32) {
    %c0_i32 = arith.constant 0 : i32
    %c0_i32_0 = arith.constant 0 : i32
    %c0_i32_1 = arith.constant 0 : i32
    return %arg0, %c0_i32, %c0_i32_0 : i32, i32, i32
  }
  func.func @transform_22(%arg0: i32) -> (i32, i32, i32) {
    %c0_i32 = arith.constant 0 : i32
    %c0_i32_0 = arith.constant 0 : i32
    %c0_i32_1 = arith.constant 0 : i32
    return %arg0, %c0_i32, %c0_i32_0 : i32, i32, i32
  }
}

</mosaic_0001>

<bundles_post_ra>
// kernel: forward.1
= control target key start
LH: loop header
LB: loop body
LE: loop exit
PB: predicated region body
PF: predicated region fallthrough
CT: control target
= control target key end

     0   :  { %s13335_s0 = inlined_call_operand.vmem [shape: f32[64,16], index: 0, kind: input, shape index: {}]   ;;  %s13336_s1 = inlined_call_operand.hbm [shape: bf16[2,64,64], index: 1, kind: input, shape index: {}]   ;;  %s13337_s2 = inlined_call_operand.hbm [shape: bf16[2,16,80], index: 2, kind: input, shape index: {}]   ;;  %s13338_s3 = inlined_call_operand.hbm [shape: f32[2,1,80], index: 3, kind: input, shape index: {}]   ;;  %s13339_s4 = inlined_call_operand.hbm [shape: bf16[576,64], index: 4, kind: input, shape index: {}, may-alias: {4,9}]   ;;  %s13340_s5 = inlined_call_operand.hbm [shape: bf16[2,9,80,80], index: 5, kind: input, shape index: {}]   ;;  %s13341_s6 = inlined_call_operand.hbm [shape: f32[2,1,80], index: 6, kind: input, shape index: {}]   ;;  %s13342_s7 = inlined_call_operand.hbm [shape: bf16[2,80,80], index: 7, kind: input, shape index: {}]   ;;  %s13343_s8 = inlined_call_operand.hbm [shape: f32[2,1,80], index: 8, kind: input, shape index: {}]   ;;  %s13344_s9 = inlined_call_operand.hbm [shape: bf16[576,64], index: 9, kind: input, shape index: {}, may-alias: {4,9}]   ;;  %s13345_s10 = inlined_call_operand.hbm [shape: bf16[2,9,80,80], index: 10, kind: input, shape index: {}]   ;;  %s13346_s11 = inlined_call_operand.hbm [shape: f32[2,1,80], index: 11, kind: input, shape index: {}]   ;;  %s13347_s12 = inlined_call_operand.hbm [shape: bf16[2,80,160], index: 12, kind: input, shape index: {}]   ;;  %s13348_s13 = inlined_call_operand.hbm [shape: f32[2,1,160], index: 13, kind: input, shape index: {}]   ;;  %s13349_s14 = inlined_call_operand.hbm [shape: bf16[288,64], index: 14, kind: input, shape index: {}]   ;;  %s13350_s15 = inlined_call_operand.hbm [shape: bf16[2,9,160,160], index: 15, kind: input, shape index: {}]   ;;  %s13351_s16 = inlined_call_operand.hbm [shape: f32[2,1,160], index: 16, kind: input, shape index: {}]   ;;  %s13352_s17 = inlined_call_operand.hbm [shape: bf16[32,64], index: 17, kind: input, shape index: {}]   ;;  %s13353_s18 = inlined_call_operand.hbm [shape: bf16[2,80,160], index: 18, kind: input, shape index: {}]   ;;  %s13354_s19 = inlined_call_operand.hbm [shape: f32[2,1,160], index: 19, kind: input, shape index: {}]   ;;  %s13355_s20 = inlined_call_operand.hbm [shape: f32[2,32], index: 20, kind: input, shape index: {}]   ;;  %s13356_s21 = inlined_call_operand.hbm [shape: f32[2,160,8], index: 21, kind: input, shape index: {}]   ;;  %s13357_s22 = inlined_call_operand.vmem [shape: f32[2,2,8], index: 22, kind: output, shape index: {}]  }
   0x1   :  { %13407 = sst [smem:[#allocation57_spill]] %s13335_s0 }
   0x2   :  { %13408 = sst [smem:[#allocation58_spill]] %s13336_s1 }
   0x3   :  { %13409 = sst [smem:[#allocation59_spill]] %s13337_s2 }
   0x4   :  { %13410 = sst [smem:[#allocation60_spill]] %s13338_s3 }
   0x5   :  { %13411 = sst [smem:[#allocation61_spill]] %s13339_s4 }
   0x6   :  { %13412 = sst [smem:[#allocation62_spill]] %s13340_s5 }
   0x7   :  { %13413 = sst [smem:[#allocation63_spill]] %s13341_s6 }
   0x8   :  { %13414 = sst [smem:[#allocation64_spill]] %s13342_s7 }
   0x9   :  { %13415 = sst [smem:[#allocation65_spill]] %s13343_s8 }
   0xa   :  { %13416 = sst [smem:[#allocation66_spill]] %s13344_s9 }
   0xb   :  { %13417 = sst [smem:[#allocation67_spill]] %s13345_s10 }
   0xc   :  { %13418 = sst [smem:[#allocation68_spill]] %s13349_s14 }
   0xd   :  { %13419 = sst [smem:[#allocation69_spill]] %s13352_s17 }
   0xe   :  { %13420 = sst [smem:[#allocation70_spill]] %s13353_s18 }
   0xf   :  { %13421 = sst [smem:[#allocation71_spill]] %s13354_s19 }
  0x10   :  { %13422 = sst [smem:[#allocation72_spill]] %s13355_s20 }
  0x11   :  { %13423 = sst [smem:[#allocation73_spill]] %s13356_s21 }
  0x12   :  { %13424 = sst [smem:[#allocation74_spill]] %s13357_s22 }
  0x13   :  { %27 = vsyncpa [#allocation3], 0 }
  0x14   :  { %29 = vsyncpa [#allocation3 + $0x1], 0 }
  0x15   :  { %30 = vsyncpa [#allocation5], 0 }
  0x16   :  { %32 = vsyncpa [#allocation5 + $0x1], 0 }
  0x17   :  { %33 = vsyncpa [#allocation8], 0 }
  0x18   :  { %34 = vsyncpa [#allocation15], 0 }
  0x19   :  { %36 = vsyncpa [#allocation15 + $0x1], 0 }
  0x1a   :  { %37 = vsyncpa [#allocation18], 0 }
  0x1b   :  { %39 = vsyncpa [#allocation18 + $0x1], 0 }
  0x1c   :  { %40 = vsyncpa [#allocation21], 0 }
  0x1d   :  { %41 = vsyncpa [#allocation29], 0 }
  0x1e   :  { %43 = vsyncpa [#allocation29 + $0x1], 0  ;;  %s11743_s3 = smov 0   ;;  %s11745_s28 = smov 0  }
  0x1f   :  { %s11747_s29 = smov 0   ;;  %s11749_s30 = smov 0  }
  0x20 LB: > { %13425 = sst [smem:[#allocation48_spill]] %s11589_s28  ;;  %s11762_s4 = sadd.s32 4294967295, %s11597_s30   ;;  %s11597_s30 = sphi %s11749_s30, %s13498_s30   ;;  %s11593_s29 = sphi %s11747_s29, %s13501_s29   ;;  %s11589_s28 = sphi %s11745_s28, %s13500_s28   ;;  %s11585_s3 = sphi %s11743_s3, %s13499_s3  }
  0x21   : > { %13426 = sst [smem:[#allocation49_spill]] %s11593_s29  ;;  %s11765_s0 = sadd.s32 1, %s11597_s30  }
  0x22   : > { %13427 = sst [smem:[#allocation50_spill]] %s11762_s4  ;;  %s74_s23 = ssub.s32 %s11597_s30, %s11765_s0 }
  0x23   : > { %13428 = sst [smem:[#allocation51_spill]] %s11765_s0  ;;  %s77_s1 = sadd.s32 1, %s11593_s29 }
  0x24   : > { %p75_p0 = scmp.eq.s32.totalorder %s74_s23, 0  ;;  %p84_p1 = scmp.ne.s32.totalorder %s11593_s29, %s11589_s28 }
  0x25   : > { %p85_p2 = scmp.eq.s32.totalorder %s11597_s30, 0  ;;  %p90_p3 = scmp.ne.s32.totalorder %s11589_s28, %s11585_s3 }
  0x26   : > { %s11775_s5 = scalar_select %p75_p0, %s11593_s29, %s77_s1  }
  0x27   : > { %p11777_p4 = por %p85_p2, %p84_p1  ;;  %p13372_p5 = scmp.eq.s32.totalorder %s11762_s4, 0 }
  0x28   : > { %13429 = sst [smem:[#allocation52_spill]] %s11775_s5  ;;  %p8535_p6 = scmp.ge.s32.totalorder %s11597_s30, 1 }
  0x29   : > { %p622_p7 = scmp.lt.s32.totalorder %s11597_s30, 3  ;;  %p11786_p8 = por %p13372_p5, %p90_p3 }
  0x2a   : > { %s11599_s26 = smov [#allocation7]   ;;  %s11600_s3 = smov [#allocation13]  }
  0x2b   : > { %s13431_s6 = scalar_select %p11786_p8, 1, 0 }
  0x2c   : > { %p11790_p9 = pnand %p8535_p6, %p622_p7  ;;  %s637_s2 = sshll.u32 %s11599_s26, 4  ;;  %s638_s2 = int_to_ptr.vmem [resolvable:$true] %s637_s2 }
  0x2d   : > { %13432 = sst [smem:[#allocation53_spill]] %s13431_s6  ;;  %s650_s23 = sshll.u32 %s11600_s3, 4  ;;  %s651_s23 = int_to_ptr.vmem [resolvable:$true] %s650_s23 }
  0x2e   : > { %s13433_s25 = scalar_select %p11790_p9, 1, 0 }
  0x2f   : > { %p10386_p10 = pneg %p11790_p9  ;;  %s11601_s1 = smov [#allocation20]  }
  0x30   : > { %13434 = sst [smem:[#allocation54_spill]] %s13433_s25  ;;  %s663_s5 = sshll.u32 %s11601_s1, 4  ;;  %s664_s5 = int_to_ptr.vmem [resolvable:$true] %s663_s5 }
  0x31   : > { %p11798_p11 = pnand %p10386_p10, %p13372_p5  ;;  %s10960_s26 = scalar_lea.vmem %s638_s2, 4608 }
  0x32   : > { %p10961_p13 = scmp.ne.s32.totalorder %s638_s2, %s10960_s26  ;;  %p10968_p2 = scmp.lt.s32.totalorder %s638_s2, %s638_s2 }
  0x33   : > { %p11804_p12 = pneg %p11798_p11  ;;  %p10969_p3 = scmp.lt.s32.totalorder %s10960_s26, %s10960_s26 }
  0x35   : > { %p10963_p0 = pnand %p10961_p13, %p11804_p12  ;;  %p10970_p6 = por %p10969_p3, %p10968_p2 }
  0x37   : > { %p10964_p1 = pneg %p10963_p0 }
  0x39   : > { %p10971_p7 = pnand %p10970_p6, %p10964_p1 }
  0x3b   : > { %10974 = shalt.err (!%p10971_p7)
}
  0x3c   : > { %s11602_s3 = smov 64   ;;  %s11603_s1 = smov 4  }
  0x3d   : > { %s13437_s28 = sld [smem:[#allocation61_spill]]  ;;  %s10986_s4 = scalar_lea.vmem %s651_s23, 4608 }
  0x3e   : > { %p10987_p10 = scmp.ne.s32.totalorder %s651_s23, %s10986_s4  ;;  %p10994_p2 = scmp.lt.s32.totalorder %s651_s23, %s651_s23 }
  0x3f   : > { %p10995_p1 = scmp.lt.s32.totalorder %s10986_s4, %s10986_s4 }
  0x40   : > { %p10989_p13 = pnand %p10987_p10, %p11804_p12 }
  0x41   : > { %p10996_p3 = por %p10995_p1, %p10994_p2 }
  0x42   : > { %p10990_p0 = pneg %p10989_p13 }
  0x43   : > { %10389 = dma.hbm_to_vmem [thread:$0]  (!%p11798_p11), %s13437_s28, 4608, %s638_s2, [#allocation8], %s11602_s3, %s11602_s3, %s11603_s1  }
  0x44   : > { %p10997_p6 = pnand %p10996_p3, %p10990_p0 }
  0x46   : > { %11000 = shalt.err (!%p10997_p6)
}
  0x47   : > { %s13438_s9 = sld [smem:[#allocation66_spill]]  ;;  %s11012_s22 = scalar_lea.vmem %s664_s5, 2304 }
  0x48   : > { %p11013_p7 = scmp.ne.s32.totalorder %s664_s5, %s11012_s22  ;;  %p11020_p5 = scmp.lt.s32.totalorder %s664_s5, %s664_s5 }
  0x49   : > { %p11021_p2 = scmp.lt.s32.totalorder %s11012_s22, %s11012_s22 }
  0x4a   : > { %p11015_p10 = pnand %p11013_p7, %p11804_p12 }
  0x4b   : > { %p11022_p0 = por %p11021_p2, %p11020_p5 }
  0x4c   : > { %p11016_p13 = pneg %p11015_p10 }
  0x4d   : > { %10392 = dma.hbm_to_vmem [thread:$0]  (!%p11798_p11), %s13438_s9, 4608, %s651_s23, [#allocation8], %s11602_s3, %s11602_s3, %s11603_s1  }
  0x4e   : > { %p11023_p1 = pnand %p11022_p0, %p11016_p13 }
  0x50   : > { %11026 = shalt.err (!%p11023_p1)
}
  0x51   : > { %s13439_s14 = sld [smem:[#allocation68_spill]]  ;;  %s11604_s6 = smov [#allocation24]  }
  0x52   : > { %s676_s25 = sshll.u32 %s11604_s6, 4  ;;  %s11605_s2 = smov [#allocation27]   ;;  %s677_s25 = int_to_ptr.vmem [resolvable:$true] %s676_s25 }
  0x53   : > { %s690_s23 = sshll.u32 %s11605_s2, 4  ;;  %s11038_s26 = scalar_lea.vmem %s677_s25, 256  ;;  %s691_s23 = int_to_ptr.vmem [resolvable:$true] %s690_s23 }
  0x54   : > { %p11039_p3 = scmp.ne.s32.totalorder %s677_s25, %s11038_s26  ;;  %p11046_p7 = scmp.lt.s32.totalorder %s677_s25, %s677_s25 }
  0x55   : > { %p11047_p10 = scmp.lt.s32.totalorder %s11038_s26, %s11038_s26 }
  0x56   : > { %p11041_p5 = pnand %p11039_p3, %p11804_p12 }
  0x57   : > { %10395 = dma.hbm_to_vmem [thread:$0]  (!%p11798_p11), %s13439_s14, 2304, %s664_s5, [#allocation21], %s11602_s3, %s11602_s3, %s11603_s1  }
  0x58   : > { %p11042_p6 = pneg %p11041_p5  ;;  %p11048_p13 = por %p11047_p10, %p11046_p7 }
  0x5a   : > { %p11049_p2 = pnand %p11048_p13, %p11042_p6 }
  0x5c   : > { %11052 = shalt.err (!%p11049_p2)
}
  0x5d   : > { %s13440_s17 = sld [smem:[#allocation69_spill]]  ;;  %s11064_s28 = scalar_lea.vmem %s691_s23, 32 }
  0x5e   : > { %p11065_p0 = scmp.ne.s32.totalorder %s691_s23, %s11064_s28  ;;  %p11072_p5 = scmp.lt.s32.totalorder %s691_s23, %s691_s23 }
  0x5f   : > { %p11073_p7 = scmp.lt.s32.totalorder %s11064_s28, %s11064_s28 }
  0x60   : > { %p11067_p1 = pnand %p11065_p0, %p11804_p12 }
  0x61   : > { %p11074_p6 = por %p11073_p7, %p11072_p5 }
  0x62   : > { %p11068_p3 = pneg %p11067_p1 }
  0x63   : > { %10398 = dma.hbm_to_vmem [thread:$0]  (!%p11798_p11), %s13440_s17, 256, %s677_s25, [#allocation8], %s11602_s3, %s11602_s3, %s11603_s1  }
  0x64   : > { %p11075_p10 = pnand %p11074_p6, %p11068_p3 }
  0x66   : > { %11078 = shalt.err (!%p11075_p10)
}
  0x67   : > { %s13441_s20 = sld [smem:[#allocation72_spill]]  ;;  %p8541_p13 = scmp.ge.s32.totalorder %s11597_s30, 2 }
  0x68   : > { %s11857_s0 = sand.u32 (!%p8541_p13), 1, %s11597_s30   ;;  %s11860_s3 = sand.u32 (!%p8541_p13), 1, %s11593_s29  }
  0x69   : > { %697 = sbr.rel (%p8541_p13) target bundleno = 537 (0x219), region = 40  ;;  %s8545_s1 = sshll.u32 (!%p8541_p13), %s11860_s3, 3 }
  0x6a   : > { %s9501_s25 = sshll.u32 (!%p8541_p13), %s11597_s30, 7  ;;  %s13442_s26 = sld [smem:[#allocation59_spill]] (!%p8541_p13) }
  0x6b   : > { %s11872_s28 = scalar_lea.sflag (!%p8541_p13), [#allocation5], %s11857_s0 }
  0x6d   : > { %10401 = dma.hbm_to_vmem [thread:$0]  (!%p11798_p11), %s13441_s20, 32, %s691_s23, [#allocation21]  }
  0x6e   : > { %s726_s23 = scalar_lea.vmem [#allocation4], %s8545_s1 }
  0x6f   : > { %s733_s22 = sshll.u32 %s726_s23, 4  ;;  %s11869_s22 = int_to_ptr.vmem [resolvable:$true] %s733_s22 }
  0x70   : > { %s11867_s5 = scalar_lea.hbm %s13442_s26, %s9501_s25  ;;  %s11083_s27 = scalar_lea.hbm %s13442_s26, 256 }
  0x71   : > { %s11079_s4 = scalar_lea.hbm %s11867_s5, 128  ;;  %p11084_p0 = scmp.lt.s32.totalorder %s11867_s5, %s13442_s26 }
  0x72   : > { %p11080_p11 = scmp.ne.s32.totalorder %s11867_s5, %s11079_s4  ;;  %p11085_p1 = scmp.lt.s32.totalorder %s11083_s27, %s11079_s4 }
  0x74   : > { %p11081_p12 = pnand %p11080_p11, %p11777_p4  ;;  %p11086_p3 = por %p11085_p1, %p11084_p0 }
  0x76   : > { %p11082_p2 = pneg %p11081_p12 }
  0x78   : > { %p11087_p5 = pnand %p11086_p3, %p11082_p2 }
  0x7a   : > { %11090 = shalt.err (!%p11087_p5)
}
  0x7b   : > { %s11091_s1 = scalar_lea.vmem %s11869_s22, 128  ;;  %s11606_s23 = smov [#allocation4]  }
  0x7c   : > { %p11092_p7 = scmp.ne.s32.totalorder %s11869_s22, %s11091_s1  ;;  %s11095_s9 = sshll.u32 %s11606_s23, 4  ;;  %s11096_s9 = int_to_ptr.vmem [resolvable:$false] %s11095_s9 }
  0x7d   : > { %s11097_s6 = scalar_lea.vmem %s11096_s9, 256  ;;  %p11098_p13 = scmp.lt.s32.totalorder %s11869_s22, %s11096_s9 }
  0x7e   : > { %p11093_p6 = pnand %p11092_p7, %p11777_p4  ;;  %p11099_p11 = scmp.lt.s32.totalorder %s11097_s6, %s11091_s1 }
  0x80   : > { %p11094_p10 = pneg %p11093_p6  ;;  %p11100_p12 = por %p11099_p11, %p11098_p13 }
  0x82   : > { %p11101_p8 = pnand %p11100_p12, %p11094_p10 }
  0x84   : > { %11104 = shalt.err (!%p11101_p8)
}
  0x85   : > { %s13378_s4 = smov 64   ;;  %s13380_s27 = smov 4  }
  0x86   : > { %10345 = dma.hbm_to_vmem [thread:$0]  (%p11777_p4), %s11867_s5, 128, %s11869_s22, %s11872_s28, %s13378_s4, %s13378_s4, %s13380_s27  }
  0x87   : > { %s8542_s25 = sshll.u32 %s11860_s3, 5  ;;  %s9500_s2 = sshll.u32 %s11597_s30, 9 }
  0x88   : > { %s13443_s9 = sld [smem:[#allocation58_spill]]  ;;  %s705_s14 = scalar_lea.vmem [#allocation2], %s8542_s25 }
  0x89   : > { %s712_s17 = sshll.u32 %s705_s14, 4  ;;  %s11908_s20 = sshll.u32 %s11597_s30, 4  ;;  %s11905_s17 = int_to_ptr.vmem [resolvable:$true] %s712_s17 }
  0x8a   : > { %s11911_s26 = scalar_lea.sflag [#allocation3], %s11857_s0 }
  0x8e   : > { %s11903_s6 = scalar_lea.hbm %s13443_s9, %s9500_s2  ;;  %s11109_s2 = scalar_lea.hbm %s13443_s9, 1024 }
  0x8f   : > { %s11105_s29 = scalar_lea.hbm %s11903_s6, 512  ;;  %p11110_p1 = scmp.lt.s32.totalorder %s11903_s6, %s13443_s9 }
  0x90   : > { %p11106_p8 = scmp.ne.s32.totalorder %s11903_s6, %s11105_s29  ;;  %p11111_p3 = scmp.lt.s32.totalorder %s11109_s2, %s11105_s29 }
  0x92   : > { %p11107_p2 = pnand %p11106_p8, %p11777_p4  ;;  %p11112_p5 = por %p11111_p3, %p11110_p1 }
  0x94   : > { %p11108_p0 = pneg %p11107_p2 }
  0x96   : > { %p11113_p7 = pnand %p11112_p5, %p11108_p0 }
  0x98   : > { %11116 = shalt.err (!%p11113_p7)
}
  0x99   : > { %s11117_s14 = scalar_lea.vmem %s11905_s17, 512  ;;  %s11609_s25 = smov [#allocation2]  }
  0x9a   : > { %p11118_p6 = scmp.ne.s32.totalorder %s11905_s17, %s11117_s14  ;;  %s11121_s5 = sshll.u32 %s11609_s25, 4  ;;  %s11122_s5 = int_to_ptr.vmem [resolvable:$false] %s11121_s5 }
  0x9b   : > { %s11123_s22 = scalar_lea.vmem %s11122_s5, 1024  ;;  %p11124_p11 = scmp.lt.s32.totalorder %s11905_s17, %s11122_s5 }
  0x9c   : > { %p11119_p10 = pnand %p11118_p6, %p11777_p4  ;;  %p11125_p12 = scmp.lt.s32.totalorder %s11123_s22, %s11117_s14 }
  0x9e   : > { %p11120_p13 = pneg %p11119_p10  ;;  %p11126_p8 = por %p11125_p12, %p11124_p11 }
  0xa0   : > { %p11127_p2 = pnand %p11126_p8, %p11120_p13 }
  0xa2   : > { %11130 = shalt.err (!%p11127_p2)
}
  0xa3   : > { %10344 = dma.hbm_to_vmem [thread:$0]  (%p11777_p4), %s11903_s6, 512, %s11905_s17, %s11911_s26, %s13378_s4, %s13378_s4, %s13380_s27  }
  0xa4   : > { %s13444_s1 = sld [smem:[#allocation60_spill]]  ;;  %s746_s14 = scalar_lea.vmem [#allocation6], %s11860_s3 }
  0xa5   : > { %s753_s25 = sshll.u32 %s746_s14, 4  ;;  %s13382_s5 = smul.u32 360, %s11860_s3  ;;  %s754_s25 = int_to_ptr.vmem [resolvable:$true] %s753_s25 }
  0xaa   : > { %s11941_s23 = scalar_lea.hbm %s13444_s1, %s11908_s20  ;;  %s11135_s17 = scalar_lea.hbm %s13444_s1, 32 }
  0xab   : > { %s11131_s22 = scalar_lea.hbm %s11941_s23, 16  ;;  %p11136_p5 = scmp.lt.s32.totalorder %s11941_s23, %s13444_s1 }
  0xac   : > { %p11132_p0 = scmp.ne.s32.totalorder %s11941_s23, %s11131_s22  ;;  %p11137_p7 = scmp.lt.s32.totalorder %s11135_s17, %s11131_s22 }
  0xae   : > { %p11133_p1 = pnand %p11132_p0, %p11777_p4  ;;  %p11138_p6 = por %p11137_p7, %p11136_p5 }
  0xb0   : > { %p11134_p3 = pneg %p11133_p1 }
  0xb2   : > { %p11139_p10 = pnand %p11138_p6, %p11134_p3 }
  0xb4   : > { %11142 = shalt.err (!%p11139_p10)
}
  0xb5   : > { %s11143_s2 = scalar_lea.vmem %s754_s25, 16  ;;  %s11610_s14 = smov [#allocation6]  }
  0xb6   : > { %p11144_p13 = scmp.ne.s32.totalorder %s754_s25, %s11143_s2  ;;  %s11147_s4 = sshll.u32 %s11610_s14, 4  ;;  %s11148_s4 = int_to_ptr.vmem [resolvable:$false] %s11147_s4 }
  0xb7   : > { %s11149_s27 = scalar_lea.vmem %s11148_s4, 32  ;;  %p11150_p8 = scmp.lt.s32.totalorder %s754_s25, %s11148_s4 }
  0xb8   : > { %p11145_p11 = pnand %p11144_p13, %p11777_p4  ;;  %p11151_p2 = scmp.lt.s32.totalorder %s11149_s27, %s11143_s2 }
  0xba   : > { %p11146_p12 = pneg %p11145_p11  ;;  %p11152_p0 = por %p11151_p2, %p11150_p8 }
  0xbc   : > { %p11153_p1 = pnand %p11152_p0, %p11146_p12 }
  0xbe   : > { %11156 = shalt.err (!%p11153_p1)
}
  0xbf   : > { %10346 = dma.hbm_to_vmem [thread:$0]  (%p11777_p4), %s11941_s23, 16, %s754_s25, %s11872_s28  }
  0xc0   : > { %s13383_s21 = smul.u32 5760, %s11597_s30  ;;  %s764_s9 = scalar_lea.vmem [#allocation9], %s13382_s5 }
  0xc1   : > { %s771_s22 = sshll.u32 %s764_s9, 4  ;;  %s13445_s27 = sld [smem:[#allocation62_spill]]  ;;  %s772_s22 = int_to_ptr.vmem [resolvable:$true] %s771_s22 }
  0xc7   : > { %s11970_s6 = scalar_lea.hbm %s13445_s27, %s13383_s21  ;;  %s11161_s2 = scalar_lea.hbm %s13445_s27, 11520 }
  0xc8   : > { %s11157_s29 = scalar_lea.hbm %s11970_s6, 5760  ;;  %p11162_p6 = scmp.lt.s32.totalorder %s11970_s6, %s13445_s27 }
  0xc9   : > { %p11158_p3 = scmp.ne.s32.totalorder %s11970_s6, %s11157_s29  ;;  %p11163_p10 = scmp.lt.s32.totalorder %s11161_s2, %s11157_s29 }
  0xcb   : > { %p11159_p5 = pnand %p11158_p3, %p11777_p4  ;;  %p11164_p13 = por %p11163_p10, %p11162_p6 }
  0xcd   : > { %p11160_p7 = pneg %p11159_p5 }
  0xcf   : > { %p11165_p11 = pnand %p11164_p13, %p11160_p7 }
  0xd1   : > { %11168 = shalt.err (!%p11165_p11)
}
  0xd2   : > { %s11169_s17 = scalar_lea.vmem %s772_s22, 5760  ;;  %s11611_s4 = smov [#allocation9]  }
  0xd3   : > { %p11170_p12 = scmp.ne.s32.totalorder %s772_s22, %s11169_s17  ;;  %s11173_s5 = sshll.u32 %s11611_s4, 4  ;;  %s11174_s5 = int_to_ptr.vmem [resolvable:$false] %s11173_s5 }
  0xd4   : > { %s11175_s21 = scalar_lea.vmem %s11174_s5, 11520  ;;  %p11176_p0 = scmp.lt.s32.totalorder %s772_s22, %s11174_s5 }
  0xd5   : > { %p11171_p8 = pnand %p11170_p12, %p11777_p4  ;;  %p11177_p1 = scmp.lt.s32.totalorder %s11175_s21, %s11169_s17 }
  0xd7   : > { %p11172_p2 = pneg %p11171_p8  ;;  %p11178_p3 = por %p11177_p1, %p11176_p0 }
  0xd9   : > { %p11179_p5 = pnand %p11178_p3, %p11172_p2 }
  0xdb   : > { %11182 = shalt.err (!%p11179_p5)
}
  0xdc   : > { %s13446_s29 = smov 4   ;;  %s13447_s23 = smov 64  }
  0xdd   : > { %10347 = dma.hbm_to_vmem [thread:$0]  (%p11777_p4), %s11970_s6, 5760, %s772_s22, %s11911_s26, %s13447_s23, %s13447_s23, %s13446_s29  }
  0xde   : > { %s13448_s14 = sld [smem:[#allocation63_spill]]  ;;  %s784_s5 = scalar_lea.vmem [#allocation10], %s11860_s3 }
  0xdf   : > { %s791_s21 = sshll.u32 %s784_s5, 4  ;;  %s792_s21 = int_to_ptr.vmem [resolvable:$true] %s791_s21 }
  0xe4   : > { %s789_s9 = scalar_lea.hbm %s13448_s14, %s11908_s20  ;;  %s11187_s27 = scalar_lea.hbm %s13448_s14, 32 }
  0xe5   : > { %s11183_s17 = scalar_lea.hbm %s789_s9, 16  ;;  %p11188_p13 = scmp.lt.s32.totalorder %s789_s9, %s13448_s14 }
  0xe6   : > { %p11184_p7 = scmp.ne.s32.totalorder %s789_s9, %s11183_s17  ;;  %p11189_p11 = scmp.lt.s32.totalorder %s11187_s27, %s11183_s17 }
  0xe8   : > { %p11185_p6 = pnand %p11184_p7, %p11777_p4  ;;  %p11190_p12 = por %p11189_p11, %p11188_p13 }
  0xea   : > { %p11186_p10 = pneg %p11185_p6 }
  0xec   : > { %p11191_p8 = pnand %p11190_p12, %p11186_p10 }
  0xee   : > { %11194 = shalt.err (!%p11191_p8)
}
  0xef   : > { %s11195_s22 = scalar_lea.vmem %s792_s21, 16  ;;  %s11612_s6 = smov [#allocation10]  }
  0xf0   : > { %p11196_p2 = scmp.ne.s32.totalorder %s792_s21, %s11195_s22  ;;  %s11199_s25 = sshll.u32 %s11612_s6, 4  ;;  %s11200_s25 = int_to_ptr.vmem [resolvable:$false] %s11199_s25 }
  0xf1   : > { %s11201_s2 = scalar_lea.vmem %s11200_s25, 32  ;;  %p11202_p3 = scmp.lt.s32.totalorder %s792_s21, %s11200_s25 }
  0xf2   : > { %p11197_p0 = pnand %p11196_p2, %p11777_p4  ;;  %p11203_p5 = scmp.lt.s32.totalorder %s11201_s2, %s11195_s22 }
  0xf4   : > { %p11198_p1 = pneg %p11197_p0  ;;  %p11204_p7 = por %p11203_p5, %p11202_p3 }
  0xf6   : > { %p11205_p6 = pnand %p11204_p7, %p11198_p1 }
  0xf8   : > { %11208 = shalt.err (!%p11205_p6)
}
  0xf9   : > { %10348 = dma.hbm_to_vmem [thread:$0]  (%p11777_p4), %s789_s9, 16, %s792_s21, %s11872_s28  }
  0xfa   : > { %s13449_s18 = smul.u32 5760, %s11597_s30  ;;  %s13450_s10 = sld [smem:[#allocation67_spill]] }
  0xfb   : > { %s13451_s5 = smul.u32 360, %s11860_s3  ;;  %s12023_s6 = scalar_lea.sflag [#allocation15], %s11857_s0 }
  0xfc   : > { %s13388_s22 = smul.u32 80, %s11860_s3 }
  0xfd   : > { %s840_s17 = scalar_lea.vmem [#allocation14], %s13451_s5 }
  0xfe   : > { %s847_s4 = sshll.u32 %s840_s17, 4  ;;  %s12019_s4 = int_to_ptr.vmem [resolvable:$true] %s847_s4 }
 0x100   : > { %s12015_s27 = scalar_lea.hbm %s13450_s10, %s13449_s18  ;;  %s11213_s2 = scalar_lea.hbm %s13450_s10, 11520 }
 0x101   : > { %s11209_s25 = scalar_lea.hbm %s12015_s27, 5760  ;;  %p11214_p12 = scmp.lt.s32.totalorder %s12015_s27, %s13450_s10 }
 0x102   : > { %p11210_p10 = scmp.ne.s32.totalorder %s12015_s27, %s11209_s25  ;;  %p11215_p8 = scmp.lt.s32.totalorder %s11213_s2, %s11209_s25 }
 0x104   : > { %p11211_p13 = pnand %p11210_p10, %p11777_p4  ;;  %p11216_p2 = por %p11215_p8, %p11214_p12 }
 0x106   : > { %p11212_p11 = pneg %p11211_p13 }
 0x108   : > { %p11217_p0 = pnand %p11216_p2, %p11212_p11 }
 0x10a   : > { %11220 = shalt.err (!%p11217_p0)
}
 0x10b   : > { %s11221_s1 = scalar_lea.vmem %s12019_s4, 5760  ;;  %s11613_s5 = smov [#allocation14]  }
 0x10c   : > { %p11222_p1 = scmp.ne.s32.totalorder %s12019_s4, %s11221_s1  ;;  %s11225_s17 = sshll.u32 %s11613_s5, 4  ;;  %s11226_s17 = int_to_ptr.vmem [resolvable:$false] %s11225_s17 }
 0x10d   : > { %s11227_s9 = scalar_lea.vmem %s11226_s17, 11520  ;;  %p11228_p7 = scmp.lt.s32.totalorder %s12019_s4, %s11226_s17 }
 0x10e   : > { %p11223_p3 = pnand %p11222_p1, %p11777_p4  ;;  %p11229_p6 = scmp.lt.s32.totalorder %s11227_s9, %s11221_s1 }
 0x110   : > { %p11224_p5 = pneg %p11223_p3  ;;  %p11230_p10 = por %p11229_p6, %p11228_p7 }
 0x112   : > { %p11231_p13 = pnand %p11230_p10, %p11224_p5 }
 0x114   : > { %11234 = shalt.err (!%p11231_p13)
}
 0x115   : > { %10351 = dma.hbm_to_vmem [thread:$0]  (%p11777_p4), %s12015_s27, 5760, %s12019_s4, %s12023_s6, %s13447_s23, %s13447_s23, %s13446_s29  }
 0x116   : > { %s13389_s25 = smul.u32 1280, %s11597_s30  ;;  %s878_s21 = scalar_lea.vmem [#allocation17], %s13388_s22 }
 0x117   : > { %s885_s2 = sshll.u32 %s878_s21, 4  ;;  %s10317_s5 = smul.u32 40, %s11860_s3  ;;  %s12059_s2 = int_to_ptr.vmem [resolvable:$true] %s885_s2 }
 0x118   : > { %s12057_s1 = scalar_lea.hbm %s13347_s12, %s13389_s25  ;;  %s12063_s17 = scalar_lea.sflag [#allocation18], %s11857_s0 }
 0x119   : > { %s11235_s9 = scalar_lea.hbm %s12057_s1, 1280  ;;  %s11239_s21 = scalar_lea.hbm %s13347_s12, 2560 }
 0x11a   : > { %p11236_p11 = scmp.ne.s32.totalorder %s12057_s1, %s11235_s9  ;;  %p11240_p2 = scmp.lt.s32.totalorder %s12057_s1, %s13347_s12 }
 0x11b   : > { %p11241_p0 = scmp.lt.s32.totalorder %s11239_s21, %s11235_s9 }
 0x11c   : > { %p11237_p12 = pnand %p11236_p11, %p11777_p4 }
 0x11d   : > { %p11242_p1 = por %p11241_p0, %p11240_p2 }
 0x11e   : > { %p11238_p8 = pneg %p11237_p12 }
 0x120   : > { %p11243_p3 = pnand %p11242_p1, %p11238_p8 }
 0x122   : > { %11246 = shalt.err (!%p11243_p3)
}
 0x123   : > { %s11247_s0 = scalar_lea.vmem %s12059_s2, 1280  ;;  %s11614_s22 = smov [#allocation17]  }
 0x124   : > { %p11248_p5 = scmp.ne.s32.totalorder %s12059_s2, %s11247_s0  ;;  %s11251_s27 = sshll.u32 %s11614_s22, 4  ;;  %s11252_s27 = int_to_ptr.vmem [resolvable:$false] %s11251_s27 }
 0x125   : > { %s11253_s4 = scalar_lea.vmem %s11252_s27, 2560  ;;  %p11254_p10 = scmp.lt.s32.totalorder %s12059_s2, %s11252_s27 }
 0x126   : > { %p11249_p7 = pnand %p11248_p5, %p11777_p4  ;;  %p11255_p13 = scmp.lt.s32.totalorder %s11253_s4, %s11247_s0 }
 0x128   : > { %p11250_p6 = pneg %p11249_p7  ;;  %p11256_p11 = por %p11255_p13, %p11254_p10 }
 0x12a   : > { %p11257_p12 = pnand %p11256_p11, %p11250_p6 }
 0x12c   : > { %11260 = shalt.err (!%p11257_p12)
}
 0x12d   : > { %s13390_s9 = smov 128   ;;  %s13392_s21 = smov 8  }
 0x12e   : > { %10353 = dma.hbm_to_vmem [thread:$0]  (%p11777_p4), %s12057_s1, 1280, %s12059_s2, %s12063_s17, %s13390_s9, %s13390_s9, %s13392_s21  }
 0x12f   : > { %s10318_s22 = smul.u32 640, %s11597_s30  ;;  %s802_s18 = scalar_lea.vmem [#allocation11], %s10317_s5 }
 0x130   : > { %s809_s19 = sshll.u32 %s802_s18, 4  ;;  %s13452_s7 = sld [smem:[#allocation64_spill]]  ;;  %s810_s19 = int_to_ptr.vmem [resolvable:$true] %s809_s19 }
 0x136   : > { %s12095_s4 = scalar_lea.hbm %s13452_s7, %s10318_s22  ;;  %s11265_s1 = scalar_lea.hbm %s13452_s7, 1280 }
 0x137   : > { %s11261_s25 = scalar_lea.hbm %s12095_s4, 640  ;;  %p11266_p1 = scmp.lt.s32.totalorder %s12095_s4, %s13452_s7 }
 0x138   : > { %p11262_p8 = scmp.ne.s32.totalorder %s12095_s4, %s11261_s25  ;;  %p11267_p3 = scmp.lt.s32.totalorder %s11265_s1, %s11261_s25 }
 0x13a   : > { %p11263_p2 = pnand %p11262_p8, %p11777_p4  ;;  %p11268_p5 = por %p11267_p3, %p11266_p1 }
 0x13c   : > { %p11264_p0 = pneg %p11263_p2 }
 0x13e   : > { %p11269_p7 = pnand %p11268_p5, %p11264_p0 }
 0x140   : > { %11272 = shalt.err (!%p11269_p7)
}
 0x141   : > { %s11273_s22 = scalar_lea.vmem %s810_s19, 640  ;;  %s11617_s0 = smov [#allocation11]  }
 0x142   : > { %p11274_p6 = scmp.ne.s32.totalorder %s810_s19, %s11273_s22  ;;  %s11277_s27 = sshll.u32 %s11617_s0, 4  ;;  %s11278_s27 = int_to_ptr.vmem [resolvable:$false] %s11277_s27 }
 0x143   : > { %s11279_s9 = scalar_lea.vmem %s11278_s27, 1280  ;;  %p11280_p11 = scmp.lt.s32.totalorder %s810_s19, %s11278_s27 }
 0x144   : > { %p11275_p10 = pnand %p11274_p6, %p11777_p4  ;;  %p11281_p12 = scmp.lt.s32.totalorder %s11279_s9, %s11273_s22 }
 0x146   : > { %p11276_p13 = pneg %p11275_p10  ;;  %p11282_p8 = por %p11281_p12, %p11280_p11 }
 0x148   : > { %p11283_p2 = pnand %p11282_p8, %p11276_p13 }
 0x14a   : > { %11286 = shalt.err (!%p11283_p2)
}
 0x14b   : > { %10349 = dma.hbm_to_vmem [thread:$0]  (%p11777_p4), %s12095_s4, 640, %s810_s19, %s11911_s26, %s13447_s23, %s13447_s23, %s13446_s29  }
 0x14c   : > { %s13453_s8 = sld [smem:[#allocation65_spill]]  ;;  %s822_s1 = scalar_lea.vmem [#allocation12], %s11860_s3 }
 0x14d   : > { %s829_s9 = sshll.u32 %s822_s1, 4  ;;  %s830_s9 = int_to_ptr.vmem [resolvable:$true] %s829_s9 }
 0x152   : > { %s827_s2 = scalar_lea.hbm %s13453_s8, %s11908_s20  ;;  %s11291_s0 = scalar_lea.hbm %s13453_s8, 32 }
 0x153   : > { %s11287_s5 = scalar_lea.hbm %s827_s2, 16  ;;  %p11292_p5 = scmp.lt.s32.totalorder %s827_s2, %s13453_s8 }
 0x154   : > { %p11288_p0 = scmp.ne.s32.totalorder %s827_s2, %s11287_s5  ;;  %p11293_p7 = scmp.lt.s32.totalorder %s11291_s0, %s11287_s5 }
 0x156   : > { %p11289_p1 = pnand %p11288_p0, %p11777_p4  ;;  %p11294_p6 = por %p11293_p7, %p11292_p5 }
 0x158   : > { %p11290_p3 = pneg %p11289_p1 }
 0x15a   : > { %p11295_p10 = pnand %p11294_p6, %p11290_p3 }
 0x15c   : > { %11298 = shalt.err (!%p11295_p10)
}
 0x15d   : > { %s11299_s29 = scalar_lea.vmem %s830_s9, 16  ;;  %s11618_s23 = smov [#allocation12]  }
 0x15e   : > { %p11300_p13 = scmp.ne.s32.totalorder %s830_s9, %s11299_s29  ;;  %s11303_s19 = sshll.u32 %s11618_s23, 4  ;;  %s11304_s19 = int_to_ptr.vmem [resolvable:$false] %s11303_s19 }
 0x15f   : > { %s11305_s4 = scalar_lea.vmem %s11304_s19, 32  ;;  %p11306_p8 = scmp.lt.s32.totalorder %s830_s9, %s11304_s19 }
 0x160   : > { %p11301_p11 = pnand %p11300_p13, %p11777_p4  ;;  %p11307_p2 = scmp.lt.s32.totalorder %s11305_s4, %s11299_s29 }
 0x162   : > { %p11302_p12 = pneg %p11301_p11  ;;  %p11308_p0 = por %p11307_p2, %p11306_p8 }
 0x164   : > { %p11309_p1 = pnand %p11308_p0, %p11302_p12 }
 0x166   : > { %11312 = shalt.err (!%p11309_p1)
}
 0x167   : > { %10350 = dma.hbm_to_vmem [thread:$0]  (%p11777_p4), %s827_s2, 16, %s830_s9, %s11872_s28  }
 0x168   : > { %s12139_s25 = scalar_lea.hbm %s13346_s11, %s11908_s20  ;;  %s860_s1 = scalar_lea.vmem [#allocation16], %s11860_s3 }
 0x169   : > { %s867_s5 = sshll.u32 %s860_s1, 4  ;;  %s12143_s18 = sshll.u32 %s11860_s3, 1  ;;  %s868_s5 = int_to_ptr.vmem [resolvable:$true] %s867_s5 }
 0x16a   : > { %s11313_s22 = scalar_lea.hbm %s12139_s25, 16  ;;  %s11317_s9 = scalar_lea.hbm %s13346_s11, 32 }
 0x16b   : > { %p11314_p3 = scmp.ne.s32.totalorder %s12139_s25, %s11313_s22  ;;  %p11318_p6 = scmp.lt.s32.totalorder %s12139_s25, %s13346_s11 }
 0x16c   : > { %p11319_p10 = scmp.lt.s32.totalorder %s11317_s9, %s11313_s22 }
 0x16d   : > { %p11315_p5 = pnand %p11314_p3, %p11777_p4 }
 0x16e   : > { %p11320_p13 = por %p11319_p10, %p11318_p6 }
 0x16f   : > { %p11316_p7 = pneg %p11315_p5 }
 0x171   : > { %p11321_p11 = pnand %p11320_p13, %p11316_p7 }
 0x173   : > { %11324 = shalt.err (!%p11321_p11)
}
 0x174   : > { %s11325_s29 = scalar_lea.vmem %s868_s5, 16  ;;  %s11619_s23 = smov [#allocation16]  }
 0x175   : > { %p11326_p12 = scmp.ne.s32.totalorder %s868_s5, %s11325_s29  ;;  %s11329_s19 = sshll.u32 %s11619_s23, 4  ;;  %s11330_s19 = int_to_ptr.vmem [resolvable:$false] %s11329_s19 }
 0x176   : > { %s11331_s4 = scalar_lea.vmem %s11330_s19, 32  ;;  %p11332_p0 = scmp.lt.s32.totalorder %s868_s5, %s11330_s19 }
 0x177   : > { %p11327_p8 = pnand %p11326_p12, %p11777_p4  ;;  %p11333_p1 = scmp.lt.s32.totalorder %s11331_s4, %s11325_s29 }
 0x179   : > { %p11328_p2 = pneg %p11327_p8  ;;  %p11334_p3 = por %p11333_p1, %p11332_p0 }
 0x17b   : > { %p11335_p5 = pnand %p11334_p3, %p11328_p2 }
 0x17d   : > { %11338 = shalt.err (!%p11335_p5)
}
 0x17e   : > { %10352 = dma.hbm_to_vmem [thread:$0]  (%p11777_p4), %s12139_s25, 16, %s868_s5, %s12023_s6  }
 0x17f   : > { %s12163_s21 = sshll.u32 %s11597_s30, 5  ;;  %s899_s0 = scalar_lea.vmem [#allocation19], %s12143_s18 }
 0x180   : > { %s12169_s22 = scalar_lea.hbm %s13348_s13, %s12163_s21  ;;  %s907_s2 = sshll.u32 %s899_s0, 4  ;;  %s908_s2 = int_to_ptr.vmem [resolvable:$true] %s907_s2 }
 0x181   : > { %s10323_s9 = smul.u32 1440, %s11860_s3  ;;  %s11339_s27 = scalar_lea.hbm %s12169_s22, 32 }
 0x182   : > { %p11340_p7 = scmp.ne.s32.totalorder %s12169_s22, %s11339_s27  ;;  %s11343_s20 = scalar_lea.hbm %s13348_s13, 64 }
 0x183   : > { %p11344_p13 = scmp.lt.s32.totalorder %s12169_s22, %s13348_s13  ;;  %p11345_p11 = scmp.lt.s32.totalorder %s11343_s20, %s11339_s27 }
 0x184   : > { %p11341_p6 = pnand %p11340_p7, %p11777_p4 }
 0x185   : > { %p11346_p12 = por %p11345_p11, %p11344_p13 }
 0x186   : > { %p11342_p10 = pneg %p11341_p6 }
 0x188   : > { %p11347_p8 = pnand %p11346_p12, %p11342_p10 }
 0x18a   : > { %11350 = shalt.err (!%p11347_p8)
}
 0x18b   : > { %s11351_s19 = scalar_lea.vmem %s908_s2, 32  ;;  %s11620_s4 = smov [#allocation19]  }
 0x18c   : > { %p11352_p2 = scmp.ne.s32.totalorder %s908_s2, %s11351_s19  ;;  %s11355_s10 = sshll.u32 %s11620_s4, 4  ;;  %s11356_s10 = int_to_ptr.vmem [resolvable:$false] %s11355_s10 }
 0x18d   : > { %s11357_s1 = scalar_lea.vmem %s11356_s10, 64  ;;  %p11358_p3 = scmp.lt.s32.totalorder %s908_s2, %s11356_s10 }
 0x18e   : > { %p11353_p0 = pnand %p11352_p2, %p11777_p4  ;;  %p11359_p5 = scmp.lt.s32.totalorder %s11357_s1, %s11351_s19 }
 0x190   : > { %p11354_p1 = pneg %p11353_p0  ;;  %p11360_p7 = por %p11359_p5, %p11358_p3 }
 0x192   : > { %p11361_p6 = pnand %p11360_p7, %p11354_p1 }
 0x194   : > { %11364 = shalt.err (!%p11361_p6)
}
 0x195   : > { %10354 = dma.hbm_to_vmem [thread:$0]  (%p11777_p4), %s12169_s22, 32, %s908_s2, %s12063_s17  }
 0x196   : > { %s10324_s0 = smul.u32 23040, %s11597_s30  ;;  %s918_s27 = scalar_lea.vmem [#allocation22], %s10323_s9 }
 0x197   : > { %s925_s25 = sshll.u32 %s918_s27, 4  ;;  %s11369_s22 = scalar_lea.hbm %s13350_s15, 46080  ;;  %s926_s25 = int_to_ptr.vmem [resolvable:$true] %s925_s25 }
 0x198   : > { %s12194_s29 = scalar_lea.hbm %s13350_s15, %s10324_s0 }
 0x199   : > { %s11365_s23 = scalar_lea.hbm %s12194_s29, 23040  ;;  %p11370_p12 = scmp.lt.s32.totalorder %s12194_s29, %s13350_s15 }
 0x19a   : > { %p11366_p10 = scmp.ne.s32.totalorder %s12194_s29, %s11365_s23  ;;  %p11371_p8 = scmp.lt.s32.totalorder %s11369_s22, %s11365_s23 }
 0x19c   : > { %p11367_p13 = pnand %p11366_p10, %p11777_p4  ;;  %p11372_p2 = por %p11371_p8, %p11370_p12 }
 0x19e   : > { %p11368_p11 = pneg %p11367_p13 }
 0x1a0   : > { %p11373_p0 = pnand %p11372_p2, %p11368_p11 }
 0x1a2   : > { %11376 = shalt.err (!%p11373_p0)
}
 0x1a3   : > { %s11377_s10 = scalar_lea.vmem %s926_s25, 23040  ;;  %s11621_s1 = smov [#allocation22]  }
 0x1a4   : > { %p11378_p1 = scmp.ne.s32.totalorder %s926_s25, %s11377_s10  ;;  %s11381_s0 = sshll.u32 %s11621_s1, 4  ;;  %s11382_s0 = int_to_ptr.vmem [resolvable:$false] %s11381_s0 }
 0x1a5   : > { %s11383_s27 = scalar_lea.vmem %s11382_s0, 46080  ;;  %p11384_p7 = scmp.lt.s32.totalorder %s926_s25, %s11382_s0 }
 0x1a6   : > { %p11379_p3 = pnand %p11378_p1, %p11777_p4  ;;  %p11385_p6 = scmp.lt.s32.totalorder %s11383_s27, %s11377_s10 }
 0x1a8   : > { %p11380_p5 = pneg %p11379_p3  ;;  %p11386_p10 = por %p11385_p6, %p11384_p7 }
 0x1aa   : > { %p11387_p13 = pnand %p11386_p10, %p11380_p5 }
 0x1ac   : > { %11390 = shalt.err (!%p11387_p13)
}
 0x1ad   : > { %s13454_s5 = smov 8   ;;  %s13455_s20 = smov 128  }
 0x1ae   : > { %10355 = dma.hbm_to_vmem [thread:$0]  (%p11777_p4), %s12194_s29, 23040, %s926_s25, %s11911_s26, %s13455_s20, %s13455_s20, %s13454_s5  }
 0x1af   : > { %s945_s4 = scalar_lea.hbm %s13351_s16, %s12163_s21  ;;  %s939_s22 = scalar_lea.vmem [#allocation23], %s12143_s18 }
 0x1b0   : > { %s947_s2 = sshll.u32 %s939_s22, 4  ;;  %s11391_s9 = scalar_lea.hbm %s945_s4, 32  ;;  %s948_s2 = int_to_ptr.vmem [resolvable:$true] %s947_s2 }
 0x1b1   : > { %p11392_p11 = scmp.ne.s32.totalorder %s945_s4, %s11391_s9  ;;  %s11395_s0 = scalar_lea.hbm %s13351_s16, 64 }
 0x1b2   : > { %p11396_p2 = scmp.lt.s32.totalorder %s945_s4, %s13351_s16  ;;  %p11397_p0 = scmp.lt.s32.totalorder %s11395_s0, %s11391_s9 }
 0x1b3   : > { %p11393_p12 = pnand %p11392_p11, %p11777_p4 }
 0x1b4   : > { %p11398_p1 = por %p11397_p0, %p11396_p2 }
 0x1b5   : > { %p11394_p8 = pneg %p11393_p12 }
 0x1b7   : > { %p11399_p3 = pnand %p11398_p1, %p11394_p8 }
 0x1b9   : > { %11402 = shalt.err (!%p11399_p3)
}
 0x1ba   : > { %s11403_s26 = scalar_lea.vmem %s948_s2, 32  ;;  %s11622_s25 = smov [#allocation23]  }
 0x1bb   : > { %p11404_p5 = scmp.ne.s32.totalorder %s948_s2, %s11403_s26  ;;  %s11407_s29 = sshll.u32 %s11622_s25, 4  ;;  %s11408_s29 = int_to_ptr.vmem [resolvable:$false] %s11407_s29 }
 0x1bc   : > { %s11409_s23 = scalar_lea.vmem %s11408_s29, 64  ;;  %p11410_p10 = scmp.lt.s32.totalorder %s948_s2, %s11408_s29 }
 0x1bd   : > { %p11405_p7 = pnand %p11404_p5, %p11777_p4  ;;  %p11411_p13 = scmp.lt.s32.totalorder %s11409_s23, %s11403_s26 }
 0x1bf   : > { %p11406_p6 = pneg %p11405_p7  ;;  %p11412_p11 = por %p11411_p13, %p11410_p10 }
 0x1c1   : > { %p11413_p12 = pnand %p11412_p11, %p11406_p6 }
 0x1c3   : > { %11416 = shalt.err (!%p11413_p12)
}
 0x1c4   : > { %10356 = dma.hbm_to_vmem [thread:$0]  (%p11777_p4), %s945_s4, 32, %s948_s2, %s11872_s28  }
 0x1c5   : > { %s13456_s7 = smul.u32 1280, %s11597_s30  ;;  %s13457_s9 = sld [smem:[#allocation70_spill]] }
 0x1c6   : > { %s13458_s1 = smul.u32 80, %s11860_s3 }
 0x1c8   : > { %s958_s0 = scalar_lea.vmem [#allocation25], %s13458_s1 }
 0x1c9   : > { %s965_s27 = sshll.u32 %s958_s0, 4  ;;  %s966_s27 = int_to_ptr.vmem [resolvable:$true] %s965_s27 }
 0x1cb   : > { %s12239_s10 = scalar_lea.hbm %s13457_s9, %s13456_s7  ;;  %s11421_s4 = scalar_lea.hbm %s13457_s9, 2560 }
 0x1cc   : > { %s11417_s26 = scalar_lea.hbm %s12239_s10, 1280  ;;  %p11422_p1 = scmp.lt.s32.totalorder %s12239_s10, %s13457_s9 }
 0x1cd   : > { %p11418_p8 = scmp.ne.s32.totalorder %s12239_s10, %s11417_s26  ;;  %p11423_p3 = scmp.lt.s32.totalorder %s11421_s4, %s11417_s26 }
 0x1cf   : > { %p11419_p2 = pnand %p11418_p8, %p11777_p4  ;;  %p11424_p5 = por %p11423_p3, %p11422_p1 }
 0x1d1   : > { %p11420_p0 = pneg %p11419_p2 }
 0x1d3   : > { %p11425_p7 = pnand %p11424_p5, %p11420_p0 }
 0x1d5   : > { %11428 = shalt.err (!%p11425_p7)
}
 0x1d6   : > { %s11429_s23 = scalar_lea.vmem %s966_s27, 1280  ;;  %s11623_s7 = smov [#allocation25]  }
 0x1d7   : > { %p11430_p6 = scmp.ne.s32.totalorder %s966_s27, %s11429_s23  ;;  %s11433_s19 = sshll.u32 %s11623_s7, 4  ;;  %s11434_s19 = int_to_ptr.vmem [resolvable:$false] %s11433_s19 }
 0x1d8   : > { %s11435_s22 = scalar_lea.vmem %s11434_s19, 2560  ;;  %p11436_p11 = scmp.lt.s32.totalorder %s966_s27, %s11434_s19 }
 0x1d9   : > { %p11431_p10 = pnand %p11430_p6, %p11777_p4  ;;  %p11437_p12 = scmp.lt.s32.totalorder %s11435_s22, %s11429_s23 }
 0x1db   : > { %p11432_p13 = pneg %p11431_p10  ;;  %p11438_p8 = por %p11437_p12, %p11436_p11 }
 0x1dd   : > { %p11439_p2 = pnand %p11438_p8, %p11432_p13 }
 0x1df   : > { %11442 = shalt.err (!%p11439_p2)
}
 0x1e0   : > { %10357 = dma.hbm_to_vmem [thread:$0]  (%p11777_p4), %s12239_s10, 1280, %s966_s27, %s12023_s6, %s13455_s20, %s13455_s20, %s13454_s5  }
 0x1e1   : > { %s13459_s26 = sld [smem:[#allocation71_spill]]  ;;  %s979_s28 = scalar_lea.vmem [#allocation26], %s12143_s18 }
 0x1e2   : > { %s987_s4 = sshll.u32 %s979_s28, 4  ;;  %s988_s4 = int_to_ptr.vmem [resolvable:$true] %s987_s4 }
 0x1e7   : > { %s985_s25 = scalar_lea.hbm %s13459_s26, %s12163_s21  ;;  %s11447_s7 = scalar_lea.hbm %s13459_s26, 64 }
 0x1e8   : > { %s11443_s2 = scalar_lea.hbm %s985_s25, 32  ;;  %p11448_p5 = scmp.lt.s32.totalorder %s985_s25, %s13459_s26 }
 0x1e9   : > { %p11444_p0 = scmp.ne.s32.totalorder %s985_s25, %s11443_s2  ;;  %p11449_p7 = scmp.lt.s32.totalorder %s11447_s7, %s11443_s2 }
 0x1eb   : > { %p11445_p1 = pnand %p11444_p0, %p11777_p4  ;;  %p11450_p6 = por %p11449_p7, %p11448_p5 }
 0x1ed   : > { %p11446_p3 = pneg %p11445_p1 }
 0x1ef   : > { %p11451_p10 = pnand %p11450_p6, %p11446_p3 }
 0x1f1   : > { %11454 = shalt.err (!%p11451_p10)
}
 0x1f2   : > { %s11455_s6 = scalar_lea.vmem %s988_s4, 32  ;;  %s11624_s18 = smov [#allocation26]  }
 0x1f3   : > { %p11456_p13 = scmp.ne.s32.totalorder %s988_s4, %s11455_s6  ;;  %s11459_s21 = sshll.u32 %s11624_s18, 4  ;;  %s11460_s21 = int_to_ptr.vmem [resolvable:$false] %s11459_s21 }
 0x1f4   : > { %s11461_s10 = scalar_lea.vmem %s11460_s21, 64  ;;  %p11462_p8 = scmp.lt.s32.totalorder %s988_s4, %s11460_s21 }
 0x1f5   : > { %p11457_p11 = pnand %p11456_p13, %p11777_p4  ;;  %p11463_p2 = scmp.lt.s32.totalorder %s11461_s10, %s11455_s6 }
 0x1f7   : > { %p11458_p12 = pneg %p11457_p11  ;;  %p11464_p0 = por %p11463_p2, %p11462_p8 }
 0x1f9   : > { %p11465_p1 = pnand %p11464_p0, %p11458_p12 }
 0x1fb   : > { %11468 = shalt.err (!%p11465_p1)
}
 0x1fc   : > { %10358 = dma.hbm_to_vmem [thread:$0]  (%p11777_p4), %s985_s25, 32, %s988_s4, %s12063_s17  }
 0x1fd   : > { %s10327_s27 = smul.u32 160, %s11860_s3  ;;  %s13460_s2 = sld [smem:[#allocation73_spill]] }
 0x1fe   : > { %s10328_s1 = smul.u32 2560, %s11597_s30  ;;  %s995_s19 = scalar_lea.sflag [#allocation29], %s11860_s3 }
 0x1ff   : > { %s998_s23 = scalar_lea.vmem [#allocation28], %s10327_s27 }
 0x200   : > { %s1005_s7 = sshll.u32 %s998_s23, 4  ;;  %s12288_s7 = int_to_ptr.vmem [resolvable:$true] %s1005_s7 }
 0x203   : > { %s12286_s29 = scalar_lea.hbm %s13460_s2, %s10328_s1  ;;  %s11473_s25 = scalar_lea.hbm %s13460_s2, 5120 }
 0x204   : > { %s11469_s22 = scalar_lea.hbm %s12286_s29, 2560  ;;  %p11474_p6 = scmp.lt.s32.totalorder %s12286_s29, %s13460_s2 }
 0x205   : > { %p11470_p3 = scmp.ne.s32.totalorder %s12286_s29, %s11469_s22  ;;  %p11475_p10 = scmp.lt.s32.totalorder %s11473_s25, %s11469_s22 }
 0x207   : > { %p11471_p5 = pnand %p11470_p3, %p11777_p4  ;;  %p11476_p13 = por %p11475_p10, %p11474_p6 }
 0x209   : > { %p11472_p7 = pneg %p11471_p5 }
 0x20b   : > { %p11477_p11 = pnand %p11476_p13, %p11472_p7 }
 0x20d   : > { %11480 = shalt.err (!%p11477_p11)
}
 0x20e   : > { %s11481_s3 = scalar_lea.vmem %s12288_s7, 2560  ;;  %s11625_s18 = smov [#allocation28]  }
 0x20f   : > { %p11482_p12 = scmp.ne.s32.totalorder %s12288_s7, %s11481_s3  ;;  %s11485_s21 = sshll.u32 %s11625_s18, 4  ;;  %s11486_s21 = int_to_ptr.vmem [resolvable:$false] %s11485_s21 }
 0x210   : > { %s11487_s10 = scalar_lea.vmem %s11486_s21, 5120  ;;  %p11488_p0 = scmp.lt.s32.totalorder %s12288_s7, %s11486_s21 }
 0x211   : > { %p11483_p8 = pnand %p11482_p12, %p11777_p4  ;;  %p11489_p1 = scmp.lt.s32.totalorder %s11487_s10, %s11481_s3 }
 0x213   : > { %p11484_p2 = pneg %p11483_p8  ;;  %p11490_p3 = por %p11489_p1, %p11488_p0 }
 0x215   : > { %p11491_p5 = pnand %p11490_p3, %p11484_p2 }
 0x217   : > { %11494 = shalt.err (!%p11491_p5)
}
 0x218   : > { %10359 = dma.hbm_to_vmem [thread:$0]  (%p11777_p4), %s12286_s29, 2560, %s12288_s7, %s995_s19, %s13455_s20, %s13455_s20, %s13454_s5  }
 0x219 PF: > { %1017 = sbr.rel (%p11790_p9) target bundleno = 3788 (0xecc), region = 108 }
 0x21e   : > { %s13462_s1 = sld [smem:[#allocation50_spill]] }
 0x21f   : > { %s13463_s0 = sld [smem:[#allocation48_spill]] }
 0x220   : > { %s13464_s28 = sld [smem:[#allocation53_spill]] }
 0x224   : > { %s12317_s23 = sand.u32 1, %s13462_s1  }
 0x225   : > { %s12320_s22 = sand.u32 1, %s13463_s0   ;;  %s12324_s17 = scalar_lea.sflag [#allocation3], %s12317_s23 }
 0x226   : > { %s8569_s24 = sshll.u32 %s12320_s22, 5  ;;  %p13465_p4 = scmp.ne.s32.totalorder %s13464_s28, 0 }
 0x227   : > { %s12326_s30 = scalar_lea.vmem [#allocation2], %s8569_s24 }
 0x228   : > { %11512 = dma.done.wait (%p13465_p4), %s12324_s17, 512  }
 0x229   : > { %11514 = vsyncadd (%p13465_p4), %s12324_s17, 4294966784  ;;  %s8570_s5 = sshll.u32 %s12320_s22, 3  ;;  %s12336_s20 = scalar_lea.sflag [#allocation5], %s12317_s23 }
 0x22a   : > { %s12338_s29 = scalar_lea.vmem [#allocation4], %s8570_s5 }
 0x22b   : > { %11516 = dma.done.wait (%p13465_p4), %s12336_s20, 144  }
 0x22c   : > { %11518 = vsyncadd (%p13465_p4), %s12336_s20, 4294967152  ;;  %p13466_p9 = scmp.eq.s32.totalorder %s13462_s1, 0 }
 0x22e   : > { %11520 = dma.done.wait (%p13466_p9), [#allocation8], 4608   ;;  %p13467_p7 = pmov %p13466_p9 }
 0x22f   : > { %s10329_s19 = smul.u32 360, %s12320_s22 }
 0x230   : > { %11522 = vsyncadd (%p13467_p7), [#allocation8], 4294962688 }
 0x231   : > { %s12352_s25 = scalar_lea.vmem [#allocation9], %s10329_s19 }
 0x232   : > { %11524 = dma.done.wait (%p13465_p4), %s12324_s17, 5760  }
 0x233   : > { %11526 = vsyncadd (%p13465_p4), %s12324_s17, 4294961536 }
 0x234   : > { %11528 = dma.done.wait (%p13465_p4), %s12336_s20, 16  }
 0x235   : > { %11530 = vsyncadd (%p13465_p4), %s12336_s20, 4294967280  ;;  %s10330_s6 = smul.u32 40, %s12320_s22 }
 0x237   : > { %s12368_s3 = scalar_lea.vmem [#allocation11], %s10330_s6 }
 0x238   : > { %11532 = dma.done.wait (%p13465_p4), %s12324_s17, 640  }
 0x239   : > { %11534 = vsyncadd (%p13465_p4), %s12324_s17, 4294966656 }
 0x23a   : > { %11536 = dma.done.wait (%p13465_p4), %s12336_s20, 16  }
 0x23b   : > { %11538 = vsyncadd (%p13465_p4), %s12336_s20, 4294967280  ;;  %p13468_p6 = pmov %p13467_p7 }
 0x23d   : > { %11540 = dma.done.wait (%p13468_p6), [#allocation8], 4608   ;;  %p13469_p10 = pmov %p13468_p6 }
 0x23e   : > { %s1088_s21 = scalar_lea.sflag [#allocation15], %s12317_s23  ;;  %s12388_s10 = scalar_lea.vmem [#allocation14], %s10329_s19 }
 0x23f   : > { %11542 = vsyncadd (%p13469_p10), [#allocation8], 4294962688 }
 0x240   : > { %11544 = dma.done.wait (%p13465_p4), %s1088_s21, 5776  }
 0x241   : > { %11546 = vsyncadd (%p13465_p4), %s1088_s21, 4294961520  ;;  %s10331_s27 = smul.u32 80, %s12320_s22  ;;  %s1105_s24 = scalar_lea.sflag [#allocation18], %s12317_s23 }
 0x243   : > { %s12397_s5 = scalar_lea.vmem [#allocation17], %s10331_s27 }
 0x244   : > { %11548 = dma.done.wait (%p13465_p4), %s1105_s24, 1312  }
 0x245   : > { %11550 = vsyncadd (%p13465_p4), %s1105_s24, 4294965984  ;;  %s12404_s19 = sshll.u32 %s12320_s22, 1  ;;  %p13470_p13 = pmov %p13468_p6 }
 0x246   : > { %p13471_p11 = pmov %p13468_p6 }
 0x247   : > { %11552 = dma.done.wait (%p13470_p13), [#allocation21], 2304  }
 0x248   : > { %11554 = vsyncadd (%p13471_p11), [#allocation21], 4294964992  ;;  %s10332_s23 = smul.u32 1440, %s12320_s22 }
 0x24a   : > { %s12412_s0 = scalar_lea.vmem [#allocation22], %s10332_s23 }
 0x24b   : > { %11556 = dma.done.wait (%p13465_p4), %s12324_s17, 23040  }
 0x24c   : > { %11558 = vsyncadd (%p13465_p4), %s12324_s17, 4294944256 }
 0x24d   : > { %11560 = dma.done.wait (%p13465_p4), %s12336_s20, 32  }
 0x24e   : > { %11562 = vsyncadd (%p13465_p4), %s12336_s20, 4294967264  ;;  %p13472_p12 = pmov %p13468_p6 }
 0x24f   : > { %p13473_p8 = pmov %p13468_p6 }
 0x250   : > { %11564 = dma.done.wait (%p13472_p12), [#allocation8], 256  }
 0x251   : > { %11566 = vsyncadd (%p13473_p8), [#allocation8], 4294967040  ;;  %s12431_s23 = scalar_lea.vmem [#allocation25], %s10331_s27 }
 0x252   : > { %11568 = dma.done.wait (%p13465_p4), %s1088_s21, 1280  }
 0x253   : > { %11570 = vsyncadd (%p13465_p4), %s1088_s21, 4294966016 }
 0x254   : > { %11572 = dma.done.wait (%p13465_p4), %s1105_s24, 32  }
 0x255   : > { %11574 = vsyncadd (%p13465_p4), %s1105_s24, 4294967264  ;;  %p13474_p2 = pmov %p13468_p6 }
 0x257   : > { %11576 = dma.done.wait (%p13474_p2), [#allocation21], 32   ;;  %p13475_p0 = pmov %p13474_p2 }
 0x258   : > { %s10333_s20 = smul.u32 160, %s12320_s22  ;;  %s1171_s27 = scalar_lea.sflag [#allocation29], %s12320_s22 }
 0x259   : > { %11578 = vsyncadd (%p13475_p0), [#allocation21], 4294967264 }
 0x25a   : > { %s12448_s21 = scalar_lea.vmem [#allocation28], %s10333_s20 }
 0x25b   : > { %11580 = dma.done.wait (%p13465_p4), %s1171_s27, 2560  }
 0x25c   : > { %11582 = vsyncadd (%p13465_p4), %s1171_s27, 4294964736  ;;  %s13476_s6 = sld [smem:[#allocation57_spill]]  ;;  %vm1350_vm0 = vcmask 523264   ;;  %v10457_v8 = vld [vmem:[%s12326_s30] sm:$0xff]   ;;  %v10458_v13 = vld [vmem:[%s12326_s30 + $0x8] sm:$0xff]   ;;  %vm1447_vm1 = vcmask 130048  }
 0x25d   : > { %9783 = vmatprep.mubr.msk.bf16.mxu0 %vm1350_vm0, %v10457_v8  ;;  %v10459_v14 = vld [vmem:[%s12326_s30 + $0x10] sm:$0xff]   ;;  %v10460_v15 = vld [vmem:[%s12326_s30 + $0x18] sm:$0xff]   ;;  %v10461_v16 = vld [vmem:[%s12338_s29] sm:$0xff]   ;;  %s13477_s30 = scalar_lea.vmem [#allocation6], %s12320_s22  ;;  %vm2295_vm2 = vcmask 654336   ;;  %s13478_s29 = scalar_lea.vmem [#allocation10], %s12320_s22 }
 0x25e   : > { %9791 = vmatprep.subr.bf16.mxu1 %v10461_v16  ;;  %v10462_v29 = vld [vmem:[#allocation7] sm:$0xff]   ;;  %v8588_v35 = vld [vmem:[%s13477_s30] ss:$0 sm:$0xff]  ;;  %v10464_v60 = vld [vmem:[#allocation7 + $0x10] sm:$0xff]   ;;  %vm6151_vm3 = vcmask 261120   ;;  %s13495_s18 = scalar_lea.vmem [#allocation23], %s12404_s19 }
 0x25f   : > { %9792 = vmatpush3.bf16.msra.mxu1 %v10461_v16  ;;  %v10463_v59 = vld [vmem:[#allocation7 + $0x8] sm:$0xff]   ;;  %v10465_v61 = vld [vmem:[#allocation7 + $0x18] sm:$0xff]   ;;  %v10466_v62 = vld [vmem:[#allocation7 + $0x20] sm:$0xff]   ;;  %p1305_p1 = scmp.lt.s32.totalorder %s13462_s1, 1  ;;  %vm8120_vm4 = vcmask 58368  }
 0x260   : > { %v10498_v63 = vld [vmem:[%s12352_s25 + $0x20] sm:$0xff]   ;;  %v10473_v8 = vld [vmem:[#allocation7 + $0x58] sm:$0xff]   ;;  %v10501_v16 = vld [vmem:[%s12352_s25 + $0x8] sm:$0xff]  }
 0x261   : > { %s13503_s1 = smov (!%p1305_p1, %s13462_s1), 1 }
 0x262   : > { %v1316_v0 = vld [vmem:[%s13476_s6 + $0x30] sm:$0xff]  ;;  %v1317_v1 = vld [vmem:[%s13476_s6 + $0x38] sm:$0xff]  ;;  %v1314_v2 = vld [vmem:[%s13476_s6 + $0x20] sm:$0xff] }
 0x263   : > { %v1321_v3 = vpack.c.bf16 %v1317_v1, %v1316_v0  ;;  %v1315_v4 = vld [vmem:[%s13476_s6 + $0x28] sm:$0xff]  ;;  %v1312_v6 = vld [vmem:[%s13476_s6 + $0x10] sm:$0xff]  ;;  %v1313_v7 = vld [vmem:[%s13476_s6 + $0x18] sm:$0xff] }
 0x264   : > { %v1320_v5 = vpack.c.bf16 %v1315_v4, %v1314_v2  ;;  %v1319_v9 = vpack.c.bf16 %v1313_v7, %v1312_v6  ;;  %v1310_v10 = vld [vmem:[%s13476_s6] sm:$0xff]  ;;  %v1311_v11 = vld [vmem:[%s13476_s6 + $0x8] sm:$0xff] }
 0x265   : > { %9775 = vmatprep.subr.bf16.mxu0 %v1321_v3  ;;  %v1318_v12 = vpack.c.bf16 %v1311_v11, %v1310_v10  ;;  %v10499_v0 = vld [vmem:[%s12352_s25 + $0x18] sm:$0xff]   ;;  %v10467_v1 = vld [vmem:[#allocation7 + $0x28] sm:$0xff]   ;;  %v10500_v2 = vld [vmem:[%s12352_s25 + $0x10] sm:$0xff]  }
 0x266   : > { %9776 = vmatpush3.bf16.msra.mxu0 %v1321_v3  ;;  %v10468_v3 = vld [vmem:[#allocation7 + $0x30] sm:$0xff]   ;;  %v10469_v4 = vld [vmem:[#allocation7 + $0x38] sm:$0xff]   ;;  %v10471_v6 = vld [vmem:[#allocation7 + $0x48] sm:$0xff]  }
 0x267   : > { %9777 = vmatprep.subr.bf16.mxu0 %v1320_v5  ;;  %v10472_v7 = vld [vmem:[#allocation7 + $0x50] sm:$0xff]   ;;  %v10475_v10 = vld [vmem:[#allocation7 + $0x68] sm:$0xff]  }
 0x268   : > { %v10476_v11 = vld [vmem:[#allocation7 + $0x70] sm:$0xff]  }
 0x26a   : > { %9778 = vmatpush3.bf16.msra.mxu0 %v1320_v5  ;;  %v10470_v5 = vld [vmem:[#allocation7 + $0x40] sm:$0xff]  }
 0x26b   : > { %9779 = vmatprep.subr.bf16.mxu0 %v1319_v9 }
 0x26e   : > { %9780 = vmatpush3.bf16.msra.mxu0 %v1319_v9  ;;  %v10474_v9 = vld [vmem:[#allocation7 + $0x60] sm:$0xff]  }
 0x26f   : > { %9781 = vmatprep.subr.bf16.mxu0 %v1318_v12 }
 0x272   : > { %9782 = vmatpush3.bf16.msra.mxu0 %v1318_v12  ;;  %v10477_v12 = vld [vmem:[#allocation7 + $0x78] sm:$0xff]  }
 0x273   : > { %9881 = vmatprep.subr.bf16.mxu0 %v10498_v63 }
 0x275   : > { %9784 = vmatmul.mubr.msk.bf16.vlgmr.msra.gmra.mxu0 %vm1350_vm0, %v10458_v13  ;;  %v10478_v13 = vld [vmem:[#allocation7 + $0x80] sm:$0xff]  }
 0x276   : > { %9787 = vmatprep.mubr.msk.bf16.mxu0 %vm1350_vm0, %v10459_v14  ;;  %9882 = vmatpush3.bf16.msra.mxu0 %v10498_v63  ;;  %v10479_v14 = vld [vmem:[#allocation7 + $0x88] sm:$0xff]   ;;  %v10509_v63 = vld [vmem:[%s12352_s25 + $0x70] sm:$0xff]  }
 0x277   : > { %9883 = vmatprep.subr.bf16.mxu0 %v10499_v0 }
 0x27a   : > { %9884 = vmatpush3.bf16.msra.mxu0 %v10499_v0 }
 0x27b   : > { %9885 = vmatprep.subr.bf16.mxu0 %v10500_v2 }
 0x27d   : > { %9788 = vmatmul.mubr.msk.bf16.gmra.mxu0 %vm1350_vm0, %v10460_v15  ;;  %v10480_v15 = vld [vmem:[#allocation7 + $0x90] sm:$0xff]  }
 0x27e   : > { %9886 = vmatpush3.bf16.msra.mxu0 %v10500_v2 }
 0x27f   : > { %9887 = vmatprep.subr.bf16.mxu0 %v10501_v16 }
 0x282   : > { %9888 = vmatpush3.bf16.msra.mxu0 %v10501_v16 }
 0x335   : > { %v9785_v17 = vpop.f32.mrf.mxu0 }
 0x337   : > { %v1397_v18 = vpop.f32.mrf.mxu0 }
 0x339   : > { %v9786_v19 = vpop.f32.mrf.mxu0 }
 0x33a   : > { %v1429_v22 = vpack.c.bf16 %v9786_v19, %v9785_v17  ;;  %v10502_v17 = vld [vmem:[%s12352_s25] sm:$0xff]  }
 0x33b   : > { %v1400_v20 = vpop.f32.mrf.mxu0  ;;  %v10482_v19 = vld [vmem:[#allocation7 + $0xa0] sm:$0xff]   ;;  %9889 = vmatprep.subr.bf16.mxu0 %v10502_v17 }
 0x33c   : > { %v1428_v21 = vpack.c.bf16 %v1400_v20, %v1397_v18  ;;  %v10481_v18 = vld [vmem:[#allocation7 + $0x98] sm:$0xff]   ;;  %9890 = vmatpush3.bf16.msra.mxu0 %v10502_v17  ;;  %v10503_v20 = vld [vmem:[%s12352_s25 + $0x48] sm:$0xff]  }
 0x33d   : > { %v9789_v23 = vpop.f32.mrf.mxu0  ;;  %9899 = vmatprep.subr.bf16.mxu0 %v10503_v20 }
 0x33e   : > { %9793 = vmatprep.mubr.msk.bf16.mxu1 %vm1447_vm1, %v1428_v21  ;;  %v10504_v21 = vld [vmem:[%s12352_s25 + $0x138] sm:$0xff]  }
 0x33f   : > { %v1413_v24 = vpop.f32.mrf.mxu0  ;;  %9794 = vmatmul.mubr.msk.bf16.vlgmr.msra.gmra.mxu1 %vm1447_vm1, %v1429_v22  ;;  %v10483_v22 = vld [vmem:[#allocation7 + $0xa8] sm:$0xff]  }
 0x341   : > { %v9790_v25 = vpop.f32.mrf.mxu0 }
 0x342   : > { %v1431_v28 = vpack.c.bf16 %v9790_v25, %v9789_v23  ;;  %v10484_v23 = vld [vmem:[#allocation7 + $0xb0] sm:$0xff]   ;;  %v10486_v25 = vld [vmem:[#allocation7 + $0xc0] sm:$0xff]  }
 0x343   : > { %v1416_v26 = vpop.f32.mrf.mxu0 }
 0x344   : > { %v1430_v27 = vpack.c.bf16 %v1416_v26, %v1413_v24  ;;  %v10485_v24 = vld [vmem:[#allocation7 + $0xb8] sm:$0xff]   ;;  %v10487_v26 = vld [vmem:[#allocation7 + $0xc8] sm:$0xff]  }
 0x346   : > { %9797 = vmatprep.mubr.msk.bf16.mxu1 %vm1447_vm1, %v1430_v27  ;;  %v10488_v27 = vld [vmem:[#allocation7 + $0xd0] sm:$0xff]  }
 0x347   : > { %9798 = vmatmul.mubr.msk.bf16.gmra.mxu1 %vm1447_vm1, %v1431_v28  ;;  %v10489_v28 = vld [vmem:[#allocation7 + $0xd8] sm:$0xff]  }
 0x348   : > { %9809 = vmatprep.mubr.msk.bf16.mxu1 %vm1350_vm0, %v10462_v29  ;;  %v10490_v29 = vld [vmem:[#allocation7 + $0xe0] sm:$0xff]  }
 0x3ff   : > { %v9795_v30 = vpop.f32.mrf.mxu1 }
 0x400   : > { %v1503_v46 = vadd.f32 %v9795_v30, %v8588_v35  ;;  %v10512_v30 = vld [vmem:[%s12352_s25 + $0x130] sm:$0xff]  }
 0x401   : > { %v1494_v31 = vpop.f32.mrf.mxu1 }
 0x402   : > { %v1527_v53 = vmax.f32 %v1503_v46, 0.0  ;;  %v1495_v54 = vadd.f32 %v8588_v35, %v1494_v31  ;;  %v10491_v31 = vld [vmem:[#allocation7 + $0xe8] sm:$0xff]  }
 0x403   : > { %v9796_v32 = vpop.f32.mrf.mxu1 }
 0x404   : > { %v1506_v42 = vadd.f32 %v9796_v32, %v8588_v35  ;;  %v1525_v57 = vmax.f32 %v1495_v54, 0.0  ;;  %v10492_v32 = vld [vmem:[#allocation7 + $0xf0] sm:$0xff]  }
 0x405   : > { %v1497_v33 = vpop.f32.mrf.mxu1 }
 0x406   : > { %v1528_v50 = vmax.f32 %v1506_v42, 0.0  ;;  %v1498_v51 = vadd.f32 %v8588_v35, %v1497_v33  ;;  %v10493_v33 = vld [vmem:[#allocation7 + $0xf8] sm:$0xff]  }
 0x407   : > { %v9799_v34 = vpop.f32.mrf.mxu1 }
 0x408   : > { %v1519_v37 = vadd.f32 %v9799_v34, %v8588_v35  ;;  %v1606_v55 = vpack.c.bf16 %v1528_v50, %v1527_v53  ;;  %v1526_v56 = vmax.f32 %v1498_v51, 0.0  ;;  %v10494_v34 = vld [vmem:[#allocation7 + $0x100] sm:$0xff]  }
 0x409   : > { %v1510_v36 = vpop.f32.mrf.mxu1  ;;  %v10506_v51 = vld [vmem:[%s12352_s25 + $0x38] sm:$0xff]  }
 0x40a   : > { %v1511_v39 = vadd.f32 %v8588_v35, %v1510_v36  ;;  %v1531_v43 = vmax.f32 %v1519_v37, 0.0  ;;  %v1605_v58 = vpack.c.bf16 %v1526_v56, %v1525_v57  ;;  %v10496_v36 = vld [vmem:[#allocation7 + $0x110] sm:$0xff]   ;;  %v10497_v37 = vld [vmem:[#allocation7 + $0x118] sm:$0xff]  }
 0x40b   : > { %v9800_v38 = vpop.f32.mrf.mxu1  ;;  %v10507_v56 = vld [vmem:[%s12352_s25 + $0x30] sm:$0xff]  }
 0x40c   : > { %v1522_v40 = vadd.f32 %v9800_v38, %v8588_v35  ;;  %v1529_v47 = vmax.f32 %v1511_v39, 0.0  ;;  %v10521_v38 = vld [vmem:[%s12352_s25 + $0x128] sm:$0xff]   ;;  %v10529_v39 = vld [vmem:[%s12352_s25 + $0x120] sm:$0xff]  }
 0x40d   : > { %v1513_v41 = vpop.f32.mrf.mxu1 }
 0x40e   : > { %v1532_v44 = vmax.f32 %v1522_v40, 0.0  ;;  %v1514_v45 = vadd.f32 %v8588_v35, %v1513_v41  ;;  %v10495_v35 = vld [vmem:[#allocation7 + $0x108] sm:$0xff]   ;;  %v10535_v40 = vld [vmem:[%s12352_s25 + $0x118] sm:$0xff]  }
 0x410   : > { %v1608_v48 = vpack.c.bf16 %v1532_v44, %v1531_v43  ;;  %v1530_v49 = vmax.f32 %v1514_v45, 0.0 }
 0x412   : > { %9801 = vmatprep.subr.bf16.mxu1 %v1608_v48  ;;  %v1607_v52 = vpack.c.bf16 %v1530_v49, %v1529_v47 }
 0x413   : > { %9802 = vmatpush3.bf16.msra.mxu1 %v1608_v48  ;;  %v10505_v48 = vld [vmem:[%s12352_s25 + $0x40] sm:$0xff]  }
 0x414   : > { %9803 = vmatprep.subr.bf16.mxu1 %v1607_v52 }
 0x417   : > { %9804 = vmatpush3.bf16.msra.mxu1 %v1607_v52 }
 0x418   : > { %9805 = vmatprep.subr.bf16.mxu1 %v1606_v55 }
 0x41b   : > { %9806 = vmatpush3.bf16.msra.mxu1 %v1606_v55 }
 0x41c   : > { %9807 = vmatprep.subr.bf16.mxu1 %v1605_v58 }
 0x41f   : > { %9808 = vmatpush3.bf16.msra.mxu1 %v1605_v58 }
 0x420   : > { %10007 = vmatprep.subr.bf16.mxu1 %v10504_v21 }
 0x422   : > { %9810 = vmatmul.mubr.msk.bf16.vlgmr.msra.gmra.mxu1 %vm1350_vm0, %v10463_v59  ;;  %v10508_v59 = vld [vmem:[%s12352_s25 + $0x28] sm:$0xff]  }
 0x423   : > { %9813 = vmatprep.mubr.msk.bf16.mxu1 %vm1350_vm0, %v10464_v60  ;;  %10008 = vmatpush3.bf16.msra.mxu1 %v10504_v21 }
 0x424   : > { %10009 = vmatprep.subr.bf16.mxu1 %v10512_v30 }
 0x427   : > { %10010 = vmatpush3.bf16.msra.mxu1 %v10512_v30 }
 0x428   : > { %10011 = vmatprep.subr.bf16.mxu1 %v10521_v38 }
 0x42a   : > { %9814 = vmatmul.mubr.msk.bf16.gmra.mxu1 %vm1350_vm0, %v10465_v61 }
 0x42b   : > { %9817 = vmatprep.mubr.msk.bf16.mxu1 %vm1350_vm0, %v10466_v62  ;;  %10012 = vmatpush3.bf16.msra.mxu1 %v10521_v38 }
 0x42c   : > { %10013 = vmatprep.subr.bf16.mxu1 %v10529_v39 }
 0x42f   : > { %10014 = vmatpush3.bf16.msra.mxu1 %v10529_v39 }
 0x430   : > { %10015 = vmatprep.subr.bf16.mxu1 %v10535_v40 }
 0x432   : > { %9818 = vmatmul.mubr.msk.bf16.gmra.mxu1 %vm1350_vm0, %v10467_v1 }
 0x433   : > { %9821 = vmatprep.mubr.msk.bf16.mxu1 %vm1350_vm0, %v10468_v3  ;;  %10016 = vmatpush3.bf16.msra.mxu1 %v10535_v40  ;;  %v10510_v3 = vld [vmem:[%s12352_s25 + $0x68] sm:$0xff]  }
 0x43a   : > { %9822 = vmatmul.mubr.msk.bf16.gmra.mxu1 %vm1350_vm0, %v10469_v4 }
 0x43b   : > { %9825 = vmatprep.mubr.msk.bf16.mxu1 %vm1350_vm0, %v10470_v5 }
 0x442   : > { %9826 = vmatmul.mubr.msk.bf16.gmra.mxu1 %vm1350_vm0, %v10471_v6 }
 0x443   : > { %9829 = vmatprep.mubr.msk.bf16.mxu1 %vm1350_vm0, %v10472_v7  ;;  %v10511_v7 = vld [vmem:[%s12352_s25 + $0x60] sm:$0xff]  }
 0x44a   : > { %9830 = vmatmul.mubr.msk.bf16.gmra.mxu1 %vm1350_vm0, %v10473_v8 }
 0x44b   : > { %9833 = vmatprep.mubr.msk.bf16.mxu1 %vm1350_vm0, %v10474_v9 }
 0x452   : > { %9834 = vmatmul.mubr.msk.bf16.gmra.mxu1 %vm1350_vm0, %v10475_v10 }
 0x453   : > { %9837 = vmatprep.mubr.msk.bf16.mxu1 %vm1350_vm0, %v10476_v11  ;;  %v10513_v11 = vld [vmem:[%s12352_s25 + $0x58] sm:$0xff]  }
 0x45a   : > { %9838 = vmatmul.mubr.msk.bf16.gmra.mxu1 %vm1350_vm0, %v10477_v12 }
 0x45b   : > { %9841 = vmatprep.mubr.msk.bf16.mxu1 %vm1350_vm0, %v10478_v13 }
 0x462   : > { %9842 = vmatmul.mubr.msk.bf16.gmra.mxu1 %vm1350_vm0, %v10479_v14 }
 0x463   : > { %9845 = vmatprep.mubr.msk.bf16.mxu1 %vm1350_vm0, %v10480_v15  ;;  %v10514_v15 = vld [vmem:[%s12352_s25 + $0x50] sm:$0xff]  }
 0x46a   : > { %9846 = vmatmul.mubr.msk.bf16.gmra.mxu1 %vm1350_vm0, %v10481_v18  ;;  %v10515_v18 = vld [vmem:[%s12352_s25 + $0x98] sm:$0xff]  }
 0x46b   : > { %9849 = vmatprep.mubr.msk.bf16.mxu1 %vm1350_vm0, %v10482_v19 }
 0x472   : > { %9850 = vmatmul.mubr.msk.bf16.gmra.mxu1 %vm1350_vm0, %v10483_v22 }
 0x473   : > { %9853 = vmatprep.mubr.msk.bf16.mxu1 %vm1350_vm0, %v10484_v23  ;;  %v10516_v23 = vld [vmem:[%s12352_s25 + $0x90] sm:$0xff]  }
 0x47a   : > { %9854 = vmatmul.mubr.msk.bf16.gmra.mxu1 %vm1350_vm0, %v10485_v24 }
 0x47b   : > { %9857 = vmatprep.mubr.msk.bf16.mxu1 %vm1350_vm0, %v10486_v25 }
 0x482   : > { %9858 = vmatmul.mubr.msk.bf16.gmra.mxu1 %vm1350_vm0, %v10487_v26  ;;  %v10517_v26 = vld [vmem:[%s12352_s25 + $0x88] sm:$0xff]  }
 0x483   : > { %9861 = vmatprep.mubr.msk.bf16.mxu1 %vm1350_vm0, %v10488_v27 }
 0x48a   : > { %9862 = vmatmul.mubr.msk.bf16.gmra.mxu1 %vm1350_vm0, %v10489_v28 }
 0x48b   : > { %9865 = vmatprep.mubr.msk.bf16.mxu1 %vm1350_vm0, %v10490_v29 }
 0x492   : > { %9866 = vmatmul.mubr.msk.bf16.gmra.mxu1 %vm1350_vm0, %v10491_v31  ;;  %v10518_v31 = vld [vmem:[%s12352_s25 + $0x80] sm:$0xff]  }
 0x493   : > { %9869 = vmatprep.mubr.msk.bf16.mxu1 %vm1350_vm0, %v10492_v32 }
 0x49a   : > { %9870 = vmatmul.mubr.msk.bf16.gmra.mxu1 %vm1350_vm0, %v10493_v33 }
 0x49b   : > { %9873 = vmatprep.mubr.msk.bf16.mxu1 %vm1350_vm0, %v10494_v34  ;;  %v10519_v34 = vld [vmem:[%s12352_s25 + $0x78] sm:$0xff]  }
 0x4a2   : > { %9874 = vmatmul.mubr.msk.bf16.gmra.mxu1 %vm1350_vm0, %v10495_v35 }
 0x4a3   : > { %9877 = vmatprep.mubr.msk.bf16.mxu1 %vm1350_vm0, %v10496_v36 }
 0x4aa   : > { %9878 = vmatmul.mubr.msk.bf16.gmra.mxu1 %vm1350_vm0, %v10497_v37  ;;  %v10520_v37 = vld [vmem:[%s12352_s25 + $0xc0] sm:$0xff]  }
 0x4e2   : > { %v9811_v41 = vpop.f32.mrf.mxu1 }
 0x4e4   : > { %v1931_v42 = vpop.f32.mrf.mxu1 }
 0x4e6   : > { %v9812_v43 = vpop.f32.mrf.mxu1 }
 0x4e7   : > { %v2219_v46 = vpack.c.bf16 %v9812_v43, %v9811_v41 }
 0x4e8   : > { %v1934_v44 = vpop.f32.mrf.mxu1 }
 0x4e9   : > { %v2218_v45 = vpack.c.bf16 %v1934_v44, %v1931_v42  ;;  %v10522_v42 = vld [vmem:[%s12352_s25 + $0xb8] sm:$0xff]  }
 0x4ea   : > { %v9815_v47 = vpop.f32.mrf.mxu1 }
 0x4eb   : > { %9891 = vmatprep.mubr.msk.bf16.mxu0 %vm2295_vm2, %v2218_v45  ;;  %v10523_v45 = vld [vmem:[%s12352_s25 + $0xb0] sm:$0xff]  }
 0x4ec   : > { %v1947_v49 = vpop.f32.mrf.mxu1  ;;  %9892 = vmatmul.mubr.msk.bf16.vlgmr.msra.gmra.mxu0 %vm2295_vm2, %v2219_v46 }
 0x4ed   : > { %9900 = vmatpush3.bf16.msra.mxu0 %v10503_v20 }
 0x4ee   : > { %v9816_v50 = vpop.f32.mrf.mxu1  ;;  %9901 = vmatprep.subr.bf16.mxu0 %v10505_v48 }
 0x4ef   : > { %v2221_v54 = vpack.c.bf16 %v9816_v50, %v9815_v47  ;;  %v10524_v50 = vld [vmem:[%s12352_s25 + $0xa8] sm:$0xff]  }
 0x4f0   : > { %v1950_v52 = vpop.f32.mrf.mxu1 }
 0x4f1   : > { %v2220_v53 = vpack.c.bf16 %v1950_v52, %v1947_v49  ;;  %9902 = vmatpush3.bf16.msra.mxu0 %v10505_v48 }
 0x4f2   : > { %v9819_v55 = vpop.f32.mrf.mxu1  ;;  %9903 = vmatprep.subr.bf16.mxu0 %v10506_v51 }
 0x4f3   : > { %9895 = vmatprep.mubr.msk.bf16.mxu0 %vm2295_vm2, %v2220_v53  ;;  %v10525_v53 = vld [vmem:[%s12352_s25 + $0xa0] sm:$0xff]  }
 0x4f4   : > { %v1963_v57 = vpop.f32.mrf.mxu1  ;;  %9896 = vmatmul.mubr.msk.bf16.gmra.mxu0 %vm2295_vm2, %v2221_v54 }
 0x4f5   : > { %9904 = vmatpush3.bf16.msra.mxu0 %v10506_v51 }
 0x4f6   : > { %v9820_v58 = vpop.f32.mrf.mxu1  ;;  %9905 = vmatprep.subr.bf16.mxu0 %v10507_v56 }
 0x4f7   : > { %v2223_v1 = vpack.c.bf16 %v9820_v58, %v9819_v55 }
 0x4f8   : > { %v1966_v60 = vpop.f32.mrf.mxu1 }
 0x4f9   : > { %v2222_v61 = vpack.c.bf16 %v1966_v60, %v1963_v57  ;;  %9906 = vmatpush3.bf16.msra.mxu0 %v10507_v56  ;;  %v10526_v56 = vld [vmem:[%s12352_s25 + $0xe8] sm:$0xff]   ;;  %v10527_v60 = vld [vmem:[%s12352_s25 + $0xe0] sm:$0xff]  }
 0x4fa   : > { %v9823_v62 = vpop.f32.mrf.mxu1  ;;  %9907 = vmatprep.subr.bf16.mxu0 %v10508_v59 }
 0x4fb   : > { %9909 = vmatprep.mubr.msk.bf16.mxu0 %vm2295_vm2, %v2222_v61 }
 0x4fc   : > { %v1979_v0 = vpop.f32.mrf.mxu1 }
 0x4fd   : > { %9908 = vmatpush3.bf16.msra.mxu0 %v10508_v59 }
 0x4fe   : > { %v9824_v2 = vpop.f32.mrf.mxu1  ;;  %9917 = vmatprep.subr.bf16.mxu0 %v10509_v63 }
 0x4ff   : > { %v2225_v9 = vpack.c.bf16 %v9824_v2, %v9823_v62 }
 0x500   : > { %9910 = vmatmul.mubr.msk.bf16.vlgmr.msra.gmra.mxu0 %vm2295_vm2, %v2223_v1  ;;  %v1982_v4 = vpop.f32.mrf.mxu1 }
 0x501   : > { %v2224_v5 = vpack.c.bf16 %v1982_v4, %v1979_v0  ;;  %9918 = vmatpush3.bf16.msra.mxu0 %v10509_v63  ;;  %v10528_v0 = vld [vmem:[%s12352_s25 + $0xd8] sm:$0xff]   ;;  %v10530_v4 = vld [vmem:[%s12352_s25 + $0xd0] sm:$0xff]  }
 0x502   : > { %v9827_v6 = vpop.f32.mrf.mxu1  ;;  %9919 = vmatprep.subr.bf16.mxu0 %v10510_v3 }
 0x503   : > { %9913 = vmatprep.mubr.msk.bf16.mxu0 %vm2295_vm2, %v2224_v5 }
 0x504   : > { %v1995_v8 = vpop.f32.mrf.mxu1 }
 0x505   : > { %9920 = vmatpush3.bf16.msra.mxu0 %v10510_v3 }
 0x506   : > { %v9828_v10 = vpop.f32.mrf.mxu1  ;;  %9921 = vmatprep.subr.bf16.mxu0 %v10511_v7 }
 0x507   : > { %v2227_v21 = vpack.c.bf16 %v9828_v10, %v9827_v6 }
 0x508   : > { %9914 = vmatmul.mubr.msk.bf16.gmra.mxu0 %vm2295_vm2, %v2225_v9  ;;  %v1998_v12 = vpop.f32.mrf.mxu1 }
 0x509   : > { %v2226_v13 = vpack.c.bf16 %v1998_v12, %v1995_v8  ;;  %9922 = vmatpush3.bf16.msra.mxu0 %v10511_v7  ;;  %v10531_v8 = vld [vmem:[%s12352_s25 + $0xc8] sm:$0xff]  }
 0x50a   : > { %v9831_v14 = vpop.f32.mrf.mxu1  ;;  %9923 = vmatprep.subr.bf16.mxu0 %v10513_v11 }
 0x50b   : > { %9927 = vmatprep.mubr.msk.bf16.mxu0 %vm2295_vm2, %v2226_v13 }
 0x50c   : > { %v2011_v16 = vpop.f32.mrf.mxu1 }
 0x50d   : > { %9924 = vmatpush3.bf16.msra.mxu0 %v10513_v11  ;;  %v10532_v11 = vld [vmem:[%s12352_s25 + $0x110] sm:$0xff]  }
 0x50e   : > { %v9832_v17 = vpop.f32.mrf.mxu1  ;;  %9925 = vmatprep.subr.bf16.mxu0 %v10514_v15 }
 0x50f   : > { %v2229_v29 = vpack.c.bf16 %v9832_v17, %v9831_v14 }
 0x510   : > { %v2014_v19 = vpop.f32.mrf.mxu1 }
 0x511   : > { %v2228_v20 = vpack.c.bf16 %v2014_v19, %v2011_v16  ;;  %9926 = vmatpush3.bf16.msra.mxu0 %v10514_v15  ;;  %v10533_v15 = vld [vmem:[%s12352_s25 + $0x108] sm:$0xff]   ;;  %v10534_v19 = vld [vmem:[%s12352_s25 + $0x100] sm:$0xff]  }
 0x512   : > { %v9835_v22 = vpop.f32.mrf.mxu1  ;;  %9935 = vmatprep.subr.bf16.mxu0 %v10515_v18 }
 0x514   : > { %9928 = vmatmul.mubr.msk.bf16.vlgmr.msra.gmra.mxu0 %vm2295_vm2, %v2227_v21  ;;  %v2027_v24 = vpop.f32.mrf.mxu1 }
 0x515   : > { %9936 = vmatpush3.bf16.msra.mxu0 %v10515_v18  ;;  %9931 = vmatprep.mubr.msk.bf16.mxu0 %vm2295_vm2, %v2228_v20 }
 0x516   : > { %v9836_v25 = vpop.f32.mrf.mxu1  ;;  %9937 = vmatprep.subr.bf16.mxu0 %v10516_v23 }
 0x517   : > { %v2231_v40 = vpack.c.bf16 %v9836_v25, %v9835_v22 }
 0x518   : > { %v2030_v27 = vpop.f32.mrf.mxu1 }
 0x519   : > { %v2230_v28 = vpack.c.bf16 %v2030_v27, %v2027_v24  ;;  %9938 = vmatpush3.bf16.msra.mxu0 %v10516_v23  ;;  %v10536_v23 = vld [vmem:[%s12352_s25 + $0xf8] sm:$0xff]  }
 0x51a   : > { %v9839_v30 = vpop.f32.mrf.mxu1  ;;  %9939 = vmatprep.subr.bf16.mxu0 %v10517_v26 }
 0x51c   : > { %9932 = vmatmul.mubr.msk.bf16.gmra.mxu0 %vm2295_vm2, %v2229_v29  ;;  %v2043_v32 = vpop.f32.mrf.mxu1  ;;  %v10537_v29 = vld [vmem:[%s12352_s25 + $0xf0] sm:$0xff]  }
 0x51d   : > { %9940 = vmatpush3.bf16.msra.mxu0 %v10517_v26  ;;  %9945 = vmatprep.mubr.msk.bf16.mxu0 %vm2295_vm2, %v2230_v28 }
 0x51e   : > { %v9840_v33 = vpop.f32.mrf.mxu1  ;;  %9941 = vmatprep.subr.bf16.mxu0 %v10518_v31 }
 0x51f   : > { %v2233_v48 = vpack.c.bf16 %v9840_v33, %v9839_v30 }
 0x520   : > { %v2046_v35 = vpop.f32.mrf.mxu1 }
 0x521   : > { %9942 = vmatpush3.bf16.msra.mxu0 %v10518_v31  ;;  %v2232_v39 = vpack.c.bf16 %v2046_v35, %v2043_v32  ;;  %v10538_v32 = vld [vmem:[%s12352_s25 + $0x160] sm:$0xff]  }
 0x522   : > { %v9843_v36 = vpop.f32.mrf.mxu1  ;;  %9943 = vmatprep.subr.bf16.mxu0 %v10519_v34 }
 0x524   : > { %v2059_v38 = vpop.f32.mrf.mxu1 }
 0x525   : > { %9944 = vmatpush3.bf16.msra.mxu0 %v10519_v34 }
 0x526   : > { %v9844_v41 = vpop.f32.mrf.mxu1  ;;  %9953 = vmatprep.subr.bf16.mxu0 %v10520_v37 }
 0x527   : > { %v2235_v58 = vpack.c.bf16 %v9844_v41, %v9843_v36 }
 0x528   : > { %9946 = vmatmul.mubr.msk.bf16.vlgmr.msra.gmra.mxu0 %vm2295_vm2, %v2231_v40  ;;  %v2062_v43 = vpop.f32.mrf.mxu1 }
 0x529   : > { %9949 = vmatprep.mubr.msk.bf16.mxu0 %vm2295_vm2, %v2232_v39  ;;  %9954 = vmatpush3.bf16.msra.mxu0 %v10520_v37  ;;  %v2234_v47 = vpack.c.bf16 %v2062_v43, %v2059_v38  ;;  %v10539_v38 = vld [vmem:[%s12352_s25 + $0x158] sm:$0xff]  }
 0x52a   : > { %v9847_v44 = vpop.f32.mrf.mxu1  ;;  %9955 = vmatprep.subr.bf16.mxu0 %v10522_v42 }
 0x52c   : > { %v2075_v46 = vpop.f32.mrf.mxu1 }
 0x52d   : > { %9956 = vmatpush3.bf16.msra.mxu0 %v10522_v42  ;;  %v10540_v42 = vld [vmem:[%s12352_s25 + $0x150] sm:$0xff]  }
 0x52e   : > { %v9848_v49 = vpop.f32.mrf.mxu1  ;;  %9957 = vmatprep.subr.bf16.mxu0 %v10523_v45 }
 0x52f   : > { %v2237_v2 = vpack.c.bf16 %v9848_v49, %v9847_v44 }
 0x530   : > { %9950 = vmatmul.mubr.msk.bf16.gmra.mxu0 %vm2295_vm2, %v2233_v48  ;;  %v2078_v51 = vpop.f32.mrf.mxu1 }
 0x531   : > { %9958 = vmatpush3.bf16.msra.mxu0 %v10523_v45  ;;  %9963 = vmatprep.mubr.msk.bf16.mxu0 %vm2295_vm2, %v2234_v47  ;;  %v2236_v61 = vpack.c.bf16 %v2078_v51, %v2075_v46  ;;  %v10541_v47 = vld [vmem:[%s12352_s25 + $0x148] sm:$0xff]  }
 0x532   : > { %v9851_v52 = vpop.f32.mrf.mxu1  ;;  %9959 = vmatprep.subr.bf16.mxu0 %v10524_v50 }
 0x534   : > { %v2091_v54 = vpop.f32.mrf.mxu1 }
 0x535   : > { %9960 = vmatpush3.bf16.msra.mxu0 %v10524_v50  ;;  %v10542_v50 = vld [vmem:[%s12352_s25 + $0x140] sm:$0xff]   ;;  %s13481_s25 = scalar_lea.vmem [#allocation12], %s12320_s22 }
 0x536   : > { %v9852_v55 = vpop.f32.mrf.mxu1  ;;  %9961 = vmatprep.subr.bf16.mxu0 %v10525_v53 }
 0x537   : > { %v2239_v13 = vpack.c.bf16 %v9852_v55, %v9851_v52 }
 0x538   : > { %v2094_v57 = vpop.f32.mrf.mxu1 }
 0x539   : > { %9962 = vmatpush3.bf16.msra.mxu0 %v10525_v53  ;;  %v2238_v5 = vpack.c.bf16 %v2094_v57, %v2091_v54 }
 0x53a   : > { %v9855_v59 = vpop.f32.mrf.mxu1  ;;  %9971 = vmatprep.subr.bf16.mxu0 %v10526_v56 }
 0x53c   : > { %9964 = vmatmul.mubr.msk.bf16.vlgmr.msra.gmra.mxu0 %vm2295_vm2, %v2235_v58  ;;  %v2107_v62 = vpop.f32.mrf.mxu1  ;;  %v10543_v58 = vld [vmem:[%s12368_s3 + $0x20] sm:$0xff]  }
 0x53d   : > { %9967 = vmatprep.mubr.msk.bf16.mxu0 %vm2295_vm2, %v2236_v61  ;;  %9972 = vmatpush3.bf16.msra.mxu0 %v10526_v56 }
 0x53e   : > { %v9856_v63 = vpop.f32.mrf.mxu1  ;;  %9973 = vmatprep.subr.bf16.mxu0 %v10527_v60  ;;  %10043 = vmatprep.subr.bf16.mxu1 %v10543_v58 }
 0x53f   : > { %v2241_v21 = vpack.c.bf16 %v9856_v63, %v9855_v59  ;;  %v10545_v63 = vld [vmem:[%s12368_s3 + $0x10] sm:$0xff]  }
 0x540   : > { %v2110_v1 = vpop.f32.mrf.mxu1 }
 0x541   : > { %9974 = vmatpush3.bf16.msra.mxu0 %v10527_v60  ;;  %v2240_v16 = vpack.c.bf16 %v2110_v1, %v2107_v62  ;;  %v10544_v60 = vld [vmem:[%s12368_s3 + $0x18] sm:$0xff]  }
 0x542   : > { %v12577_v3 = vpop.f32.mrf.mxu1  ;;  %9975 = vmatprep.subr.bf16.mxu0 %v10528_v0  ;;  %v12619_v1 = vld [vmem:[%s13478_s29] ss:$0 sm:$0xff] }
 0x544   : > { %9968 = vmatmul.mubr.msk.bf16.gmra.mxu0 %vm2295_vm2, %v2237_v2  ;;  %v2123_v6 = vpop.f32.mrf.mxu1  ;;  %v10546_v2 = vld [vmem:[%s12368_s3 + $0x8] sm:$0xff]  }
 0x545   : > { %9976 = vmatpush3.bf16.msra.mxu0 %v10528_v0  ;;  %9981 = vmatprep.mubr.msk.bf16.mxu0 %vm2295_vm2, %v2238_v5 }
 0x546   : > { %v9860_v7 = vpop.f32.mrf.mxu1  ;;  %9977 = vmatprep.subr.bf16.mxu0 %v10530_v4 }
 0x547   : > { %v2243_v36 = vpack.c.bf16 %v9860_v7, %v12577_v3 }
 0x548   : > { %v2126_v9 = vpop.f32.mrf.mxu1 }
 0x549   : > { %9978 = vmatpush3.bf16.msra.mxu0 %v10530_v4  ;;  %v2242_v24 = vpack.c.bf16 %v2126_v9, %v2123_v6  ;;  %v10547_v6 = vld [vmem:[%s12368_s3] sm:$0xff]   ;;  %s13482_s3 = scalar_lea.vmem [#allocation16], %s12320_s22  ;;  %s13494_s22 = scalar_lea.vmem [#allocation19], %s12404_s19 }
 0x54a   : > { %v12583_v10 = vpop.f32.mrf.mxu1  ;;  %9979 = vmatprep.subr.bf16.mxu0 %v10531_v8 }
 0x54c   : > { %v2139_v12 = vpop.f32.mrf.mxu1 }
 0x54d   : > { %9980 = vmatpush3.bf16.msra.mxu0 %v10531_v8 }
 0x54e   : > { %v9864_v14 = vpop.f32.mrf.mxu1  ;;  %9989 = vmatprep.subr.bf16.mxu0 %v10532_v11 }
 0x54f   : > { %v2245_v45 = vpack.c.bf16 %v9864_v14, %v12583_v10 }
 0x550   : > { %9982 = vmatmul.mubr.msk.bf16.vlgmr.msra.gmra.mxu0 %vm2295_vm2, %v2239_v13  ;;  %v2142_v17 = vpop.f32.mrf.mxu1 }
 0x551   : > { %9985 = vmatprep.mubr.msk.bf16.mxu0 %vm2295_vm2, %v2240_v16  ;;  %9990 = vmatpush3.bf16.msra.mxu0 %v10532_v11  ;;  %v2244_v39 = vpack.c.bf16 %v2142_v17, %v2139_v12 }
 0x552   : > { %v9867_v18 = vpop.f32.mrf.mxu1  ;;  %9991 = vmatprep.subr.bf16.mxu0 %v10533_v15 }
 0x554   : > { %v2155_v20 = vpop.f32.mrf.mxu1 }
 0x555   : > { %9992 = vmatpush3.bf16.msra.mxu0 %v10533_v15 }
 0x556   : > { %v9868_v22 = vpop.f32.mrf.mxu1  ;;  %9993 = vmatprep.subr.bf16.mxu0 %v10534_v19 }
 0x557   : > { %v2247_v25 = vpack.c.bf16 %v9868_v22, %v9867_v18 }
 0x558   : > { %9986 = vmatmul.mubr.msk.bf16.gmra.mxu0 %vm2295_vm2, %v2241_v21  ;;  %v2158_v26 = vpop.f32.mrf.mxu1 }
 0x559   : > { %v2246_v27 = vpack.c.bf16 %v2158_v26, %v2155_v20  ;;  %9994 = vmatpush3.bf16.msra.mxu0 %v10534_v19  ;;  %9999 = vmatprep.mubr.msk.bf16.mxu0 %vm2295_vm2, %v2242_v24 }
 0x55a   : > { %v9871_v28 = vpop.f32.mrf.mxu1  ;;  %9995 = vmatprep.subr.bf16.mxu0 %v10536_v23 }
 0x55b   : > { %10017 = vmatprep.mubr.msk.bf16.mxu1 %vm2295_vm2, %v2246_v27 }
 0x55c   : > { %v2171_v30 = vpop.f32.mrf.mxu1  ;;  %10018 = vmatmul.mubr.msk.bf16.vlgmr.msra.gmra.mxu1 %vm2295_vm2, %v2247_v25 }
 0x55d   : > { %9996 = vmatpush3.bf16.msra.mxu0 %v10536_v23  ;;  %10044 = vmatpush3.bf16.msra.mxu1 %v10543_v58 }
 0x55e   : > { %v9872_v31 = vpop.f32.mrf.mxu1  ;;  %9997 = vmatprep.subr.bf16.mxu0 %v10537_v29  ;;  %10045 = vmatprep.subr.bf16.mxu1 %v10544_v60 }
 0x55f   : > { %v2249_v33 = vpack.c.bf16 %v9872_v31, %v9871_v28 }
 0x560   : > { %v2174_v34 = vpop.f32.mrf.mxu1 }
 0x561   : > { %v2248_v35 = vpack.c.bf16 %v2174_v34, %v2171_v30  ;;  %9998 = vmatpush3.bf16.msra.mxu0 %v10537_v29  ;;  %10046 = vmatpush3.bf16.msra.mxu1 %v10544_v60 }
 0x562   : > { %10025 = vmatprep.subr.bf16.mxu0 %v10538_v32  ;;  %v9875_v37 = vpop.f32.mrf.mxu1  ;;  %10047 = vmatprep.subr.bf16.mxu1 %v10545_v63 }
 0x563   : > { %10021 = vmatprep.mubr.msk.bf16.mxu1 %vm2295_vm2, %v2248_v35 }
 0x564   : > { %10000 = vmatmul.mubr.msk.bf16.vlgmr.msra.gmra.mxu0 %vm2295_vm2, %v2243_v36  ;;  %10022 = vmatmul.mubr.msk.bf16.gmra.mxu1 %vm2295_vm2, %v2249_v33  ;;  %v2187_v40 = vpop.f32.mrf.mxu1 }
 0x565   : > { %10003 = vmatprep.mubr.msk.bf16.mxu0 %vm2295_vm2, %v2244_v39  ;;  %10026 = vmatpush3.bf16.msra.mxu0 %v10538_v32 }
 0x566   : > { %10027 = vmatprep.subr.bf16.mxu0 %v10539_v38  ;;  %v9876_v41 = vpop.f32.mrf.mxu1  ;;  %10048 = vmatpush3.bf16.msra.mxu1 %v10545_v63 }
 0x567   : > { %v2251_v53 = vpack.c.bf16 %v9876_v41, %v9875_v37  ;;  %10049 = vmatprep.subr.bf16.mxu1 %v10546_v2 }
 0x568   : > { %v2190_v43 = vpop.f32.mrf.mxu1 }
 0x569   : > { %10028 = vmatpush3.bf16.msra.mxu0 %v10539_v38  ;;  %v2250_v44 = vpack.c.bf16 %v2190_v43, %v2187_v40 }
 0x56a   : > { %10029 = vmatprep.subr.bf16.mxu0 %v10540_v42  ;;  %v9879_v46 = vpop.f32.mrf.mxu1  ;;  %10050 = vmatpush3.bf16.msra.mxu1 %v10546_v2 }
 0x56b   : > { %10051 = vmatprep.subr.bf16.mxu1 %v10547_v6 }
 0x56c   : > { %10004 = vmatmul.mubr.msk.bf16.gmra.mxu0 %vm2295_vm2, %v2245_v45  ;;  %v2203_v48 = vpop.f32.mrf.mxu1 }
 0x56d   : > { %10030 = vmatpush3.bf16.msra.mxu0 %v10540_v42  ;;  %10035 = vmatprep.mubr.msk.bf16.mxu0 %vm2295_vm2, %v2250_v44 }
 0x56e   : > { %10031 = vmatprep.subr.bf16.mxu0 %v10541_v47  ;;  %v9880_v49 = vpop.f32.mrf.mxu1  ;;  %10052 = vmatpush3.bf16.msra.mxu1 %v10547_v6 }
 0x56f   : > { %v2253_v54 = vpack.c.bf16 %v9880_v49, %v9879_v46 }
 0x570   : > { %v2206_v51 = vpop.f32.mrf.mxu1 }
 0x571   : > { %10032 = vmatpush3.bf16.msra.mxu0 %v10541_v47  ;;  %v2252_v52 = vpack.c.bf16 %v2206_v51, %v2203_v48 }
 0x572   : > { %10033 = vmatprep.subr.bf16.mxu0 %v10542_v50 }
 0x575   : > { %10034 = vmatpush3.bf16.msra.mxu0 %v10542_v50 }
 0x578   : > { %10036 = vmatmul.mubr.msk.bf16.vlgmr.msra.gmra.mxu0 %vm2295_vm2, %v2251_v53 }
 0x579   : > { %10039 = vmatprep.mubr.msk.bf16.mxu0 %vm2295_vm2, %v2252_v52 }
 0x580   : > { %10040 = vmatmul.mubr.msk.bf16.gmra.mxu0 %vm2295_vm2, %v2253_v54 }
 0x5ac   : > { %v9893_v55 = vpop.f32.mrf.mxu0 }
 0x5ad   : > { %v2381_v4 = vadd.f32 %v9893_v55, %v12619_v1 }
 0x5ae   : > { %v2342_v56 = vpop.f32.mrf.mxu0 }
 0x5af   : > { %v2379_v7 = vadd.f32 %v12619_v1, %v2342_v56 }
 0x5b0   : > { %v9894_v57 = vpop.f32.mrf.mxu0 }
 0x5b1   : > { %v2382_v10 = vadd.f32 %v9894_v57, %v12619_v1 }
 0x5b2   : > { %v12613_v59 = vpop.f32.mrf.mxu0 }
 0x5b4   : > { %v9897_v61 = vpop.f32.mrf.mxu0 }
 0x5b5   : > { %v2385_v15 = vadd.f32 %v9897_v61, %v12619_v1 }
 0x5b6   : > { %v2358_v62 = vpop.f32.mrf.mxu0 }
 0x5b7   : > { %v2383_v17 = vadd.f32 %v12619_v1, %v2358_v62 }
 0x5b8   : > { %v9898_v0 = vpop.f32.mrf.mxu0 }
 0x5b9   : > { %v2386_v20 = vadd.f32 %v9898_v0, %v12619_v1 }
 0x5ba   : > { %v12622_v3 = vpop.f32.mrf.mxu0 }
 0x5c0   : > { %v9911_v5 = vpop.f32.mrf.mxu0 }
 0x5c1   : > { %v2507_v8 = vadd.f32 %v9911_v5, %v2381_v4 }
 0x5c2   : > { %v2474_v9 = vpop.f32.mrf.mxu0 }
 0x5c3   : > { %v2505_v11 = vadd.f32 %v2474_v9, %v2379_v7  ;;  %v2380_v9 = vadd.f32 %v12619_v1, %v12613_v59 }
 0x5c4   : > { %v9912_v12 = vpop.f32.mrf.mxu0 }
 0x5c5   : > { %v2508_v13 = vadd.f32 %v9912_v12, %v2382_v10 }
 0x5c6   : > { %v2477_v14 = vpop.f32.mrf.mxu0 }
 0x5c8   : > { %v9915_v16 = vpop.f32.mrf.mxu0 }
 0x5c9   : > { %v2511_v18 = vadd.f32 %v9915_v16, %v2385_v15 }
 0x5ca   : > { %v2490_v19 = vpop.f32.mrf.mxu0 }
 0x5cb   : > { %v2509_v21 = vadd.f32 %v2490_v19, %v2383_v17 }
 0x5cc   : > { %v9916_v22 = vpop.f32.mrf.mxu0 }
 0x5cd   : > { %v2512_v23 = vadd.f32 %v9916_v22, %v2386_v20  ;;  %v2384_v22 = vadd.f32 %v12619_v1, %v12622_v3 }
 0x5ce   : > { %v12631_v24 = vpop.f32.mrf.mxu0 }
 0x5cf   : > { %v2510_v59 = vadd.f32 %v12631_v24, %v2384_v22 }
 0x5d4   : > { %v9929_v25 = vpop.f32.mrf.mxu0 }
 0x5d5   : > { %v2633_v26 = vadd.f32 %v9929_v25, %v2507_v8 }
 0x5d6   : > { %v2600_v27 = vpop.f32.mrf.mxu0 }
 0x5d7   : > { %v2631_v28 = vadd.f32 %v2600_v27, %v2505_v11  ;;  %v2506_v11 = vadd.f32 %v2477_v14, %v2380_v9 }
 0x5d8   : > { %v9930_v29 = vpop.f32.mrf.mxu0 }
 0x5d9   : > { %v2634_v30 = vadd.f32 %v9930_v29, %v2508_v13 }
 0x5da   : > { %v2603_v31 = vpop.f32.mrf.mxu0 }
 0x5db   : > { %v2632_v13 = vadd.f32 %v2603_v31, %v2506_v11 }
 0x5dc   : > { %v9933_v32 = vpop.f32.mrf.mxu0 }
 0x5dd   : > { %v12633_v33 = vadd.f32 %v9933_v32, %v2511_v18 }
 0x5de   : > { %v2616_v34 = vpop.f32.mrf.mxu0 }
 0x5df   : > { %v2635_v35 = vadd.f32 %v2616_v34, %v2509_v21 }
 0x5e0   : > { %v9934_v36 = vpop.f32.mrf.mxu0 }
 0x5e1   : > { %v2638_v37 = vadd.f32 %v9934_v36, %v2512_v23 }
 0x5e2   : > { %v2619_v38 = vpop.f32.mrf.mxu0 }
 0x5e8   : > { %v9947_v39 = vpop.f32.mrf.mxu0 }
 0x5e9   : > { %v2759_v17 = vadd.f32 %v9947_v39, %v2633_v26  ;;  %v2636_v26 = vadd.f32 %v2619_v38, %v2510_v59 }
 0x5ea   : > { %v2726_v40 = vpop.f32.mrf.mxu0 }
 0x5eb   : > { %v2757_v15 = vadd.f32 %v2726_v40, %v2631_v28 }
 0x5ec   : > { %v9948_v41 = vpop.f32.mrf.mxu0 }
 0x5ed   : > { %v2760_v16 = vadd.f32 %v9948_v41, %v2634_v30 }
 0x5ee   : > { %v2729_v42 = vpop.f32.mrf.mxu0 }
 0x5ef   : > { %v2758_v19 = vadd.f32 %v2729_v42, %v2632_v13 }
 0x5f0   : > { %v9951_v43 = vpop.f32.mrf.mxu0 }
 0x5f1   : > { %v2763_v1 = vadd.f32 %v9951_v43, %v12633_v33 }
 0x5f2   : > { %v2742_v44 = vpop.f32.mrf.mxu0 }
 0x5f3   : > { %v2761_v36 = vadd.f32 %v2742_v44, %v2635_v35 }
 0x5f4   : > { %v9952_v45 = vpop.f32.mrf.mxu0 }
 0x5f5   : > { %v2764_v42 = vadd.f32 %v9952_v45, %v2638_v37 }
 0x5f6   : > { %v2745_v46 = vpop.f32.mrf.mxu0 }
 0x5f7   : > { %v2762_v3 = vadd.f32 %v2745_v46, %v2636_v26 }
 0x5fc   : > { %v9965_v47 = vpop.f32.mrf.mxu0 }
 0x5fd   : > { %v2885_v23 = vadd.f32 %v9965_v47, %v2759_v17 }
 0x5fe   : > { %v2852_v48 = vpop.f32.mrf.mxu0 }
 0x5ff   : > { %v2883_v20 = vadd.f32 %v2852_v48, %v2757_v15 }
 0x600   : > { %v9966_v49 = vpop.f32.mrf.mxu0 }
 0x601   : > { %v2886_v21 = vadd.f32 %v9966_v49, %v2760_v16 }
 0x602   : > { %v2855_v50 = vpop.f32.mrf.mxu0 }
 0x603   : > { %v2884_v27 = vadd.f32 %v2855_v50, %v2758_v19 }
 0x604   : > { %v9969_v51 = vpop.f32.mrf.mxu0 }
 0x606   : > { %v2868_v52 = vpop.f32.mrf.mxu0 }
 0x607   : > { %v2887_v47 = vadd.f32 %v2868_v52, %v2761_v36  ;;  %v8828_v36 = vld [vmem:[%s13481_s25] ss:$0 sm:$0xff] }
 0x608   : > { %v9970_v53 = vpop.f32.mrf.mxu0 }
 0x609   : > { %v2890_v50 = vadd.f32 %v9970_v53, %v2764_v42 }
 0x60a   : > { %v2871_v54 = vpop.f32.mrf.mxu0 }
 0x610   : > { %v9983_v55 = vpop.f32.mrf.mxu0 }
 0x611   : > { %v3011_v14 = vadd.f32 %v9983_v55, %v2885_v23  ;;  %v2889_v55 = vadd.f32 %v9969_v51, %v2763_v1 }
 0x612   : > { %v2978_v56 = vpop.f32.mrf.mxu0 }
 0x613   : > { %v3009_v29 = vadd.f32 %v2978_v56, %v2883_v20 }
 0x614   : > { %v9984_v57 = vpop.f32.mrf.mxu0 }
 0x615   : > { %v3012_v32 = vadd.f32 %v9984_v57, %v2886_v21  ;;  %v2888_v57 = vadd.f32 %v2871_v54, %v2762_v3 }
 0x616   : > { %v2981_v58 = vpop.f32.mrf.mxu0 }
 0x617   : > { %v3010_v31 = vadd.f32 %v2981_v58, %v2884_v27 }
 0x618   : > { %v9987_v60 = vpop.f32.mrf.mxu0 }
 0x619   : > { %v3015_v45 = vadd.f32 %v9987_v60, %v2889_v55 }
 0x61a   : > { %v2994_v61 = vpop.f32.mrf.mxu0 }
 0x61b   : > { %v3013_v58 = vadd.f32 %v2994_v61, %v2887_v47 }
 0x61c   : > { %v9988_v62 = vpop.f32.mrf.mxu0  ;;  %v10019_v4 = vpop.f32.mrf.mxu1 }
 0x61d   : > { %v3016_v35 = vadd.f32 %v9988_v62, %v2890_v50 }
 0x61e   : > { %v2997_v63 = vpop.f32.mrf.mxu0  ;;  %v3230_v7 = vpop.f32.mrf.mxu1 }
 0x61f   : > { %v3014_v46 = vadd.f32 %v2997_v63, %v2888_v57 }
 0x620   : > { %v10020_v12 = vpop.f32.mrf.mxu1 }
 0x622   : > { %v3233_v25 = vpop.f32.mrf.mxu1 }
 0x624   : > { %v10001_v0 = vpop.f32.mrf.mxu0  ;;  %v10023_v40 = vpop.f32.mrf.mxu1 }
 0x625   : > { %v3137_v39 = vadd.f32 %v10001_v0, %v3011_v14  ;;  %v10548_v14 = vld [vmem:[#allocation13] sm:$0xff]  }
 0x626   : > { %v3104_v2 = vpop.f32.mrf.mxu0  ;;  %10069 = vmatprep.mubr.msk.bf16.mxu0 %vm1350_vm0, %v10548_v14  ;;  %v10564_v14 = vld [vmem:[#allocation13 + $0x80] sm:$0xff]  }
 0x627   : > { %v3135_v28 = vadd.f32 %v3104_v2, %v3009_v29  ;;  %v3246_v2 = vpop.f32.mrf.mxu1 }
 0x628   : > { %v10002_v5 = vpop.f32.mrf.mxu0 }
 0x629   : > { %v3138_v30 = vadd.f32 %v10002_v5, %v3012_v32  ;;  %v3261_v56 = vadd.f32 %v3230_v7, %v3135_v28  ;;  %v3263_v5 = vadd.f32 %v10019_v4, %v3137_v39  ;;  %v10024_v51 = vpop.f32.mrf.mxu1 }
 0x62a   : > { %v3107_v6 = vpop.f32.mrf.mxu0 }
 0x62b   : > { %v3136_v48 = vadd.f32 %v3107_v6, %v3010_v31  ;;  %v3264_v24 = vadd.f32 %v10020_v12, %v3138_v30  ;;  %v3249_v13 = vpop.f32.mrf.mxu1 }
 0x62c   : > { %v10005_v8 = vpop.f32.mrf.mxu0 }
 0x62d   : > { %v3262_v37 = vadd.f32 %v3233_v25, %v3136_v48  ;;  %v3141_v54 = vadd.f32 %v10005_v8, %v3015_v45 }
 0x62e   : > { %v3120_v10 = vpop.f32.mrf.mxu0 }
 0x62f   : > { %v3139_v52 = vadd.f32 %v3120_v10, %v3013_v58  ;;  %v3267_v15 = vadd.f32 %v10023_v40, %v3141_v54  ;;  %v10552_v54 = vld [vmem:[#allocation13 + $0x20] sm:$0xff]  }
 0x630   : > { %v10006_v18 = vpop.f32.mrf.mxu0 }
 0x631   : > { %v3142_v53 = vadd.f32 %v10006_v18, %v3016_v35  ;;  %v3265_v10 = vadd.f32 %v3246_v2, %v3139_v52  ;;  %v10549_v52 = vld [vmem:[#allocation13 + $0x8] sm:$0xff]  }
 0x632   : > { %v3123_v34 = vpop.f32.mrf.mxu0 }
 0x633   : > { %v3140_v62 = vadd.f32 %v3123_v34, %v3014_v46  ;;  %v3268_v12 = vadd.f32 %v10024_v51, %v3142_v53  ;;  %v10550_v53 = vld [vmem:[#allocation13 + $0x10] sm:$0xff]   ;;  %v10551_v51 = vld [vmem:[#allocation13 + $0x18] sm:$0xff]  }
 0x635   : > { %v3266_v19 = vadd.f32 %v3249_v13, %v3140_v62  ;;  %v10585_v62 = vld [vmem:[%s12388_s10 + $0x18] sm:$0xff]  }
 0x636   : > { %v10556_v13 = vld [vmem:[#allocation13 + $0x40] sm:$0xff]  }
 0x638   : > { %v10037_v41 = vpop.f32.mrf.mxu0 }
 0x639   : > { %v12645_v33 = vadd.f32 %v10037_v41, %v3263_v5 }
 0x63a   : > { %v3356_v49 = vpop.f32.mrf.mxu0 }
 0x63b   : > { %v12641_v44 = vadd.f32 %v3356_v49, %v3261_v56  ;;  %v13404_v60 = vmax.f32 %v12645_v33, 0.0 }
 0x63c   : > { %v10038_v38 = vpop.f32.mrf.mxu0 }
 0x63d   : > { %v12643_v0 = vadd.f32 %v10038_v38, %v3264_v24  ;;  %v13403_v7 = vmax.f32 %v12641_v44, 0.0 }
 0x63e   : > { %v3359_v43 = vpop.f32.mrf.mxu0 }
 0x63f   : > { %v12647_v6 = vadd.f32 %v3359_v43, %v3262_v37  ;;  %v13402_v61 = vmax.f32 %v12643_v0, 0.0 }
 0x640   : > { %v10041_v4 = vpop.f32.mrf.mxu0 }
 0x641   : > { %v13401_v9 = vmax.f32 %v12647_v6, 0.0  ;;  %v3404_v8 = vpack.c.bf16 %v13402_v61, %v13404_v60  ;;  %v12666_v20 = vadd.f32 %v10041_v4, %v3267_v15  ;;  %v10584_v4 = vld [vmem:[%s12388_s10 + $0x20] sm:$0xff]   ;;  %v10558_v15 = vld [vmem:[#allocation13 + $0x50] sm:$0xff]  }
 0x642   : > { %v3372_v11 = vpop.f32.mrf.mxu0  ;;  %10141 = vmatprep.subr.bf16.mxu1 %v10584_v4 }
 0x643   : > { %v3403_v63 = vpack.c.bf16 %v13401_v9, %v13403_v7  ;;  %v12661_v17 = vadd.f32 %v3372_v11, %v3265_v10  ;;  %v13400_v29 = vmax.f32 %v12666_v20, 0.0  ;;  %v10553_v11 = vld [vmem:[#allocation13 + $0x28] sm:$0xff]   ;;  %v10554_v10 = vld [vmem:[#allocation13 + $0x30] sm:$0xff]  }
 0x644   : > { %v10042_v16 = vpop.f32.mrf.mxu0 }
 0x645   : > { %13479 = vst [vmem:[#allocation55_spill] sm:$0xff] %v12661_v17  ;;  %v12663_v18 = vadd.f32 %v10042_v16, %v3268_v12  ;;  %10053 = vmatprep.mubr.msk.bf16.mxu1 %vm2295_vm2, %v3403_v63  ;;  %v13395_v25 = vmax.f32 %v12661_v17, 0.0  ;;  %v10586_v63 = vld [vmem:[%s12388_s10 + $0x10] sm:$0xff]  }
 0x646   : > { %v3375_v21 = vpop.f32.mrf.mxu0  ;;  %10054 = vmatmul.mubr.msk.bf16.vlgmr.msra.gmra.mxu1 %vm2295_vm2, %v3404_v8  ;;  %v10555_v12 = vld [vmem:[#allocation13 + $0x38] sm:$0xff]   ;;  %v10557_v8 = vld [vmem:[#allocation13 + $0x48] sm:$0xff]  }
 0x647   : > { %v12669_v22 = vadd.f32 %v3375_v21, %v3266_v19  ;;  %v13399_v23 = vmax.f32 %v12663_v18, 0.0  ;;  %10142 = vmatpush3.bf16.msra.mxu1 %v10584_v4  ;;  %v10559_v16 = vld [vmem:[#allocation13 + $0x58] sm:$0xff]   ;;  %v10560_v19 = vld [vmem:[#allocation13 + $0x60] sm:$0xff]   ;;  %v10561_v21 = vld [vmem:[#allocation13 + $0x68] sm:$0xff]  }
 0x648   : > { %10143 = vmatprep.subr.bf16.mxu1 %v10585_v62 }
 0x649   : > { %13480 = vst [vmem:[#allocation56_spill] sm:$0xff] %v12669_v22  ;;  %v13396_v27 = vmax.f32 %v12669_v22, 0.0  ;;  %v3406_v59 = vpack.c.bf16 %v13399_v23, %v13400_v29 }
 0x64b   : > { %v3405_v32 = vpack.c.bf16 %v13396_v27, %v13395_v25  ;;  %10144 = vmatpush3.bf16.msra.mxu1 %v10585_v62  ;;  %v10591_v62 = vld [vmem:[%s12388_s10 + $0x40] sm:$0xff]  }
 0x64c   : > { %10145 = vmatprep.subr.bf16.mxu1 %v10586_v63 }
 0x64d   : > { %10057 = vmatprep.mubr.msk.bf16.mxu1 %vm2295_vm2, %v3405_v32  ;;  %v10562_v32 = vld [vmem:[#allocation13 + $0x70] sm:$0xff]  }
 0x64e   : > { %10058 = vmatmul.mubr.msk.bf16.gmra.mxu1 %vm2295_vm2, %v3406_v59  ;;  %v10563_v59 = vld [vmem:[#allocation13 + $0x78] sm:$0xff]  }
 0x64f   : > { %10146 = vmatpush3.bf16.msra.mxu1 %v10586_v63 }
 0x706   : > { %v10055_v34 = vpop.f32.mrf.mxu1 }
 0x707   : > { %v3509_v56 = vadd.f32 %v10055_v34, %v8828_v36  ;;  %v10565_v34 = vld [vmem:[#allocation13 + $0x88] sm:$0xff]  }
 0x708   : > { %v3500_v31 = vpop.f32.mrf.mxu1 }
 0x709   : > { %v3533_v38 = vmax.f32 %v3509_v56, 0.0  ;;  %v3501_v35 = vadd.f32 %v8828_v36, %v3500_v31  ;;  %v10566_v31 = vld [vmem:[#allocation13 + $0x90] sm:$0xff]  }
 0x70a   : > { %v10056_v28 = vpop.f32.mrf.mxu1  ;;  %v10598_v56 = vld [vmem:[%s12388_s10 + $0x130] sm:$0xff]  }
 0x70b   : > { %v3512_v3 = vadd.f32 %v10056_v28, %v8828_v36  ;;  %v3531_v43 = vmax.f32 %v3501_v35, 0.0  ;;  %v10587_v28 = vld [vmem:[%s12388_s10 + $0x8] sm:$0xff]  }
 0x70c   : > { %v3503_v30 = vpop.f32.mrf.mxu1  ;;  %10147 = vmatprep.subr.bf16.mxu1 %v10587_v28  ;;  %v10607_v35 = vld [vmem:[%s12388_s10 + $0x128] sm:$0xff]  }
 0x70d   : > { %v3534_v58 = vmax.f32 %v3512_v3, 0.0  ;;  %v3504_v2 = vadd.f32 %v8828_v36, %v3503_v30  ;;  %10148 = vmatpush3.bf16.msra.mxu1 %v10587_v28  ;;  %v10588_v30 = vld [vmem:[%s12388_s10] sm:$0xff]  }
 0x70e   : > { %v10059_v26 = vpop.f32.mrf.mxu1  ;;  %10149 = vmatprep.subr.bf16.mxu1 %v10588_v30  ;;  %v10573_v3 = vld [vmem:[#allocation13 + $0xc8] sm:$0xff]  }
 0x70f   : > { %v3525_v40 = vadd.f32 %v10059_v26, %v8828_v36  ;;  %v3612_v37 = vpack.c.bf16 %v3534_v58, %v3533_v38  ;;  %v3532_v45 = vmax.f32 %v3504_v2, 0.0  ;;  %v10567_v26 = vld [vmem:[#allocation13 + $0x98] sm:$0xff]   ;;  %v10580_v58 = vld [vmem:[#allocation13 + $0x100] sm:$0xff]   ;;  %v10581_v2 = vld [vmem:[#allocation13 + $0x108] sm:$0xff]  }
 0x710   : > { %v3516_v39 = vpop.f32.mrf.mxu1  ;;  %v10583_v38 = vld [vmem:[#allocation13 + $0x118] sm:$0xff]  }
 0x711   : > { %v3517_v42 = vadd.f32 %v8828_v36, %v3516_v39  ;;  %v3537_v47 = vmax.f32 %v3525_v40, 0.0  ;;  %v3611_v46 = vpack.c.bf16 %v3532_v45, %v3531_v43  ;;  %10150 = vmatpush3.bf16.msra.mxu1 %v10588_v30  ;;  %v10589_v39 = vld [vmem:[%s12388_s10 + $0x48] sm:$0xff]   ;;  %v10590_v40 = vld [vmem:[%s12388_s10 + $0x138] sm:$0xff]  }
 0x712   : > { %v10060_v41 = vpop.f32.mrf.mxu1  ;;  %10159 = vmatprep.subr.bf16.mxu1 %v10589_v39  ;;  %v10621_v45 = vld [vmem:[%s12388_s10 + $0x118] sm:$0xff]  }
 0x713   : > { %v3528_v48 = vadd.f32 %v10060_v41, %v8828_v36  ;;  %v3535_v24 = vmax.f32 %v3517_v42, 0.0  ;;  %v10569_v41 = vld [vmem:[#allocation13 + $0xa8] sm:$0xff]   ;;  %v10570_v42 = vld [vmem:[#allocation13 + $0xb0] sm:$0xff]  }
 0x714   : > { %v3519_v1 = vpop.f32.mrf.mxu1 }
 0x715   : > { %v3538_v49 = vmax.f32 %v3528_v48, 0.0  ;;  %v3520_v50 = vadd.f32 %v8828_v36, %v3519_v1  ;;  %v10568_v36 = vld [vmem:[#allocation13 + $0xa0] sm:$0xff]   ;;  %v10571_v48 = vld [vmem:[#allocation13 + $0xb8] sm:$0xff]  }
 0x716   : > { %v10572_v1 = vld [vmem:[#allocation13 + $0xc0] sm:$0xff]  }
 0x717   : > { %v3614_v55 = vpack.c.bf16 %v3538_v49, %v3537_v47  ;;  %v3536_v57 = vmax.f32 %v3520_v50, 0.0  ;;  %v10574_v47 = vld [vmem:[#allocation13 + $0xd0] sm:$0xff]   ;;  %v10575_v49 = vld [vmem:[#allocation13 + $0xd8] sm:$0xff]   ;;  %v10576_v50 = vld [vmem:[#allocation13 + $0xe0] sm:$0xff]  }
 0x719   : > { %10061 = vmatprep.subr.bf16.mxu0 %v3614_v55  ;;  %v3613_v5 = vpack.c.bf16 %v3536_v57, %v3535_v24  ;;  %v10577_v24 = vld [vmem:[#allocation13 + $0xe8] sm:$0xff]   ;;  %v10579_v57 = vld [vmem:[#allocation13 + $0xf8] sm:$0xff]  }
 0x71a   : > { %10062 = vmatpush3.bf16.msra.mxu0 %v3614_v55  ;;  %v10578_v55 = vld [vmem:[#allocation13 + $0xf0] sm:$0xff]  }
 0x71b   : > { %10063 = vmatprep.subr.bf16.mxu0 %v3613_v5 }
 0x71e   : > { %10064 = vmatpush3.bf16.msra.mxu0 %v3613_v5  ;;  %v10582_v5 = vld [vmem:[#allocation13 + $0x110] sm:$0xff]  }
 0x71f   : > { %10065 = vmatprep.subr.bf16.mxu0 %v3612_v37 }
 0x722   : > { %10066 = vmatpush3.bf16.msra.mxu0 %v3612_v37  ;;  %v10615_v37 = vld [vmem:[%s12388_s10 + $0x120] sm:$0xff]  }
 0x723   : > { %10067 = vmatprep.subr.bf16.mxu0 %v3611_v46 }
 0x726   : > { %10068 = vmatpush3.bf16.msra.mxu0 %v3611_v46 }
 0x727   : > { %10267 = vmatprep.subr.bf16.mxu0 %v10590_v40 }
 0x729   : > { %10070 = vmatmul.mubr.msk.bf16.vlgmr.msra.gmra.mxu0 %vm1350_vm0, %v10549_v52 }
 0x72a   : > { %10073 = vmatprep.mubr.msk.bf16.mxu0 %vm1350_vm0, %v10550_v53  ;;  %10268 = vmatpush3.bf16.msra.mxu0 %v10590_v40 }
 0x72b   : > { %10269 = vmatprep.subr.bf16.mxu0 %v10598_v56 }
 0x72e   : > { %10270 = vmatpush3.bf16.msra.mxu0 %v10598_v56 }
 0x72f   : > { %10271 = vmatprep.subr.bf16.mxu0 %v10607_v35 }
 0x731   : > { %10074 = vmatmul.mubr.msk.bf16.gmra.mxu0 %vm1350_vm0, %v10551_v51 }
 0x732   : > { %10077 = vmatprep.mubr.msk.bf16.mxu0 %vm1350_vm0, %v10552_v54  ;;  %10272 = vmatpush3.bf16.msra.mxu0 %v10607_v35 }
 0x733   : > { %10273 = vmatprep.subr.bf16.mxu0 %v10615_v37 }
 0x736   : > { %10274 = vmatpush3.bf16.msra.mxu0 %v10615_v37  ;;  %v10602_v37 = vld [vmem:[%s12388_s10 + $0x90] sm:$0xff]  }
 0x737   : > { %10275 = vmatprep.subr.bf16.mxu0 %v10621_v45 }
 0x739   : > { %10078 = vmatmul.mubr.msk.bf16.gmra.mxu0 %vm1350_vm0, %v10553_v11 }
 0x73a   : > { %10081 = vmatprep.mubr.msk.bf16.mxu0 %vm1350_vm0, %v10554_v10  ;;  %10276 = vmatpush3.bf16.msra.mxu0 %v10621_v45  ;;  %v10592_v10 = vld [vmem:[%s12388_s10 + $0x38] sm:$0xff]  }
 0x741   : > { %10082 = vmatmul.mubr.msk.bf16.gmra.mxu0 %vm1350_vm0, %v10555_v12 }
 0x742   : > { %10085 = vmatprep.mubr.msk.bf16.mxu0 %vm1350_vm0, %v10556_v13 }
 0x749   : > { %10086 = vmatmul.mubr.msk.bf16.gmra.mxu0 %vm1350_vm0, %v10557_v8 }
 0x74a   : > { %10089 = vmatprep.mubr.msk.bf16.mxu0 %vm1350_vm0, %v10558_v15 }
 0x751   : > { %10090 = vmatmul.mubr.msk.bf16.gmra.mxu0 %vm1350_vm0, %v10559_v16  ;;  %v10593_v16 = vld [vmem:[%s12388_s10 + $0x30] sm:$0xff]  }
 0x752   : > { %10093 = vmatprep.mubr.msk.bf16.mxu0 %vm1350_vm0, %v10560_v19 }
 0x759   : > { %10094 = vmatmul.mubr.msk.bf16.gmra.mxu0 %vm1350_vm0, %v10561_v21 }
 0x75a   : > { %10097 = vmatprep.mubr.msk.bf16.mxu0 %vm1350_vm0, %v10562_v32  ;;  %v10594_v32 = vld [vmem:[%s12388_s10 + $0x28] sm:$0xff]  }
 0x761   : > { %10098 = vmatmul.mubr.msk.bf16.gmra.mxu0 %vm1350_vm0, %v10563_v59 }
 0x762   : > { %10101 = vmatprep.mubr.msk.bf16.mxu0 %vm1350_vm0, %v10564_v14 }
 0x769   : > { %10102 = vmatmul.mubr.msk.bf16.gmra.mxu0 %vm1350_vm0, %v10565_v34 }
 0x76a   : > { %10105 = vmatprep.mubr.msk.bf16.mxu0 %vm1350_vm0, %v10566_v31  ;;  %v10595_v31 = vld [vmem:[%s12388_s10 + $0x70] sm:$0xff]  }
 0x771   : > { %10106 = vmatmul.mubr.msk.bf16.gmra.mxu0 %vm1350_vm0, %v10567_v26 }
 0x772   : > { %10109 = vmatprep.mubr.msk.bf16.mxu0 %vm1350_vm0, %v10568_v36  ;;  %v10596_v36 = vld [vmem:[%s12388_s10 + $0x68] sm:$0xff]  }
 0x779   : > { %10110 = vmatmul.mubr.msk.bf16.gmra.mxu0 %vm1350_vm0, %v10569_v41 }
 0x77a   : > { %10113 = vmatprep.mubr.msk.bf16.mxu0 %vm1350_vm0, %v10570_v42  ;;  %v10597_v42 = vld [vmem:[%s12388_s10 + $0x60] sm:$0xff]  }
 0x781   : > { %10114 = vmatmul.mubr.msk.bf16.gmra.mxu0 %vm1350_vm0, %v10571_v48 }
 0x782   : > { %10117 = vmatprep.mubr.msk.bf16.mxu0 %vm1350_vm0, %v10572_v1 }
 0x789   : > { %10118 = vmatmul.mubr.msk.bf16.gmra.mxu0 %vm1350_vm0, %v10573_v3 }
 0x78a   : > { %10121 = vmatprep.mubr.msk.bf16.mxu0 %vm1350_vm0, %v10574_v47  ;;  %v10599_v47 = vld [vmem:[%s12388_s10 + $0x58] sm:$0xff]  }
 0x791   : > { %10122 = vmatmul.mubr.msk.bf16.gmra.mxu0 %vm1350_vm0, %v10575_v49 }
 0x792   : > { %10125 = vmatprep.mubr.msk.bf16.mxu0 %vm1350_vm0, %v10576_v50 }
 0x799   : > { %10126 = vmatmul.mubr.msk.bf16.gmra.mxu0 %vm1350_vm0, %v10577_v24  ;;  %v10600_v24 = vld [vmem:[%s12388_s10 + $0x50] sm:$0xff]  }
 0x79a   : > { %10129 = vmatprep.mubr.msk.bf16.mxu0 %vm1350_vm0, %v10578_v55 }
 0x7a1   : > { %10130 = vmatmul.mubr.msk.bf16.gmra.mxu0 %vm1350_vm0, %v10579_v57 }
 0x7a2   : > { %10133 = vmatprep.mubr.msk.bf16.mxu0 %vm1350_vm0, %v10580_v58  ;;  %v10601_v58 = vld [vmem:[%s12388_s10 + $0x98] sm:$0xff]  }
 0x7a9   : > { %10134 = vmatmul.mubr.msk.bf16.gmra.mxu0 %vm1350_vm0, %v10581_v2 }
 0x7aa   : > { %10137 = vmatprep.mubr.msk.bf16.mxu0 %vm1350_vm0, %v10582_v5 }
 0x7b1   : > { %10138 = vmatmul.mubr.msk.bf16.gmra.mxu0 %vm1350_vm0, %v10583_v38 }
 0x7e9   : > { %v10071_v43 = vpop.f32.mrf.mxu0 }
 0x7eb   : > { %v3937_v46 = vpop.f32.mrf.mxu0 }
 0x7ed   : > { %v10072_v52 = vpop.f32.mrf.mxu0 }
 0x7ee   : > { %v4225_v54 = vpack.c.bf16 %v10072_v52, %v10071_v43 }
 0x7ef   : > { %v3940_v53 = vpop.f32.mrf.mxu0 }
 0x7f0   : > { %v4224_v51 = vpack.c.bf16 %v3940_v53, %v3937_v46  ;;  %v10603_v46 = vld [vmem:[%s12388_s10 + $0x88] sm:$0xff]  }
 0x7f1   : > { %v10075_v4 = vpop.f32.mrf.mxu0 }
 0x7f2   : > { %10151 = vmatprep.mubr.msk.bf16.mxu1 %vm2295_vm2, %v4224_v51 }
 0x7f3   : > { %v3953_v11 = vpop.f32.mrf.mxu0  ;;  %10152 = vmatmul.mubr.msk.bf16.vlgmr.msra.gmra.mxu1 %vm2295_vm2, %v4225_v54 }
 0x7f4   : > { %10160 = vmatpush3.bf16.msra.mxu1 %v10589_v39 }
 0x7f5   : > { %v10076_v63 = vpop.f32.mrf.mxu0  ;;  %10161 = vmatprep.subr.bf16.mxu1 %v10591_v62 }
 0x7f6   : > { %v4227_v8 = vpack.c.bf16 %v10076_v63, %v10075_v4  ;;  %v10604_v4 = vld [vmem:[%s12388_s10 + $0x80] sm:$0xff]   ;;  %v10605_v63 = vld [vmem:[%s12388_s10 + $0x78] sm:$0xff]  }
 0x7f7   : > { %v3956_v12 = vpop.f32.mrf.mxu0 }
 0x7f8   : > { %v4226_v13 = vpack.c.bf16 %v3956_v12, %v3953_v11  ;;  %10162 = vmatpush3.bf16.msra.mxu1 %v10591_v62 }
 0x7f9   : > { %v10079_v15 = vpop.f32.mrf.mxu0  ;;  %10163 = vmatprep.subr.bf16.mxu1 %v10592_v10 }
 0x7fa   : > { %10155 = vmatprep.mubr.msk.bf16.mxu1 %vm2295_vm2, %v4226_v13  ;;  %v10606_v13 = vld [vmem:[%s12388_s10 + $0xc0] sm:$0xff]  }
 0x7fb   : > { %v3969_v19 = vpop.f32.mrf.mxu0  ;;  %10156 = vmatmul.mubr.msk.bf16.gmra.mxu1 %vm2295_vm2, %v4227_v8 }
 0x7fc   : > { %10164 = vmatpush3.bf16.msra.mxu1 %v10592_v10 }
 0x7fd   : > { %v10080_v21 = vpop.f32.mrf.mxu0  ;;  %10165 = vmatprep.subr.bf16.mxu1 %v10593_v16 }
 0x7fe   : > { %v4229_v30 = vpack.c.bf16 %v10080_v21, %v10079_v15  ;;  %v10608_v21 = vld [vmem:[%s12388_s10 + $0xb8] sm:$0xff]  }
 0x7ff   : > { %v3972_v59 = vpop.f32.mrf.mxu0 }
 0x800   : > { %v4228_v14 = vpack.c.bf16 %v3972_v59, %v3969_v19  ;;  %10166 = vmatpush3.bf16.msra.mxu1 %v10593_v16 }
 0x801   : > { %v10083_v34 = vpop.f32.mrf.mxu0  ;;  %10167 = vmatprep.subr.bf16.mxu1 %v10594_v32 }
 0x802   : > { %10169 = vmatprep.mubr.msk.bf16.mxu1 %vm2295_vm2, %v4228_v14  ;;  %v10609_v14 = vld [vmem:[%s12388_s10 + $0xb0] sm:$0xff]  }
 0x803   : > { %v3985_v28 = vpop.f32.mrf.mxu0 }
 0x804   : > { %10168 = vmatpush3.bf16.msra.mxu1 %v10594_v32 }
 0x805   : > { %v10084_v26 = vpop.f32.mrf.mxu0  ;;  %10177 = vmatprep.subr.bf16.mxu1 %v10595_v31 }
 0x806   : > { %v4231_v1 = vpack.c.bf16 %v10084_v26, %v10083_v34  ;;  %v10610_v26 = vld [vmem:[%s12388_s10 + $0xa8] sm:$0xff]  }
 0x807   : > { %10170 = vmatmul.mubr.msk.bf16.vlgmr.msra.gmra.mxu1 %vm2295_vm2, %v4229_v30  ;;  %v3988_v39 = vpop.f32.mrf.mxu0 }
 0x808   : > { %v4230_v40 = vpack.c.bf16 %v3988_v39, %v3985_v28  ;;  %10178 = vmatpush3.bf16.msra.mxu1 %v10595_v31 }
 0x809   : > { %v10087_v41 = vpop.f32.mrf.mxu0  ;;  %10179 = vmatprep.subr.bf16.mxu1 %v10596_v36 }
 0x80a   : > { %10173 = vmatprep.mubr.msk.bf16.mxu1 %vm2295_vm2, %v4230_v40  ;;  %v10611_v40 = vld [vmem:[%s12388_s10 + $0xa0] sm:$0xff]  }
 0x80b   : > { %v4001_v48 = vpop.f32.mrf.mxu0 }
 0x80c   : > { %10180 = vmatpush3.bf16.msra.mxu1 %v10596_v36 }
 0x80d   : > { %v10088_v3 = vpop.f32.mrf.mxu0  ;;  %10181 = vmatprep.subr.bf16.mxu1 %v10597_v42 }
 0x80e   : > { %v4233_v38 = vpack.c.bf16 %v10088_v3, %v10087_v41 }
 0x80f   : > { %10174 = vmatmul.mubr.msk.bf16.gmra.mxu1 %vm2295_vm2, %v4231_v1  ;;  %v4004_v49 = vpop.f32.mrf.mxu0 }
 0x810   : > { %v4232_v50 = vpack.c.bf16 %v4004_v49, %v4001_v48  ;;  %10182 = vmatpush3.bf16.msra.mxu1 %v10597_v42  ;;  %v10612_v48 = vld [vmem:[%s12388_s10 + $0xe8] sm:$0xff]   ;;  %v10613_v49 = vld [vmem:[%s12388_s10 + $0xe0] sm:$0xff]  }
 0x811   : > { %v10091_v56 = vpop.f32.mrf.mxu0  ;;  %10183 = vmatprep.subr.bf16.mxu1 %v10599_v47 }
 0x812   : > { %10187 = vmatprep.mubr.msk.bf16.mxu1 %vm2295_vm2, %v4232_v50 }
 0x813   : > { %v4017_v55 = vpop.f32.mrf.mxu0 }
 0x814   : > { %10184 = vmatpush3.bf16.msra.mxu1 %v10599_v47 }
 0x815   : > { %v10092_v57 = vpop.f32.mrf.mxu0  ;;  %10185 = vmatprep.subr.bf16.mxu1 %v10600_v24 }
 0x816   : > { %v4235_v51 = vpack.c.bf16 %v10092_v57, %v10091_v56 }
 0x817   : > { %v4020_v2 = vpop.f32.mrf.mxu0 }
 0x818   : > { %v4234_v5 = vpack.c.bf16 %v4020_v2, %v4017_v55  ;;  %10186 = vmatpush3.bf16.msra.mxu1 %v10600_v24  ;;  %v10614_v55 = vld [vmem:[%s12388_s10 + $0xd8] sm:$0xff]  }
 0x819   : > { %v10095_v35 = vpop.f32.mrf.mxu0  ;;  %10195 = vmatprep.subr.bf16.mxu1 %v10601_v58 }
 0x81b   : > { %10188 = vmatmul.mubr.msk.bf16.vlgmr.msra.gmra.mxu1 %vm2295_vm2, %v4233_v38  ;;  %v4033_v45 = vpop.f32.mrf.mxu0 }
 0x81c   : > { %10196 = vmatpush3.bf16.msra.mxu1 %v10601_v58  ;;  %10191 = vmatprep.mubr.msk.bf16.mxu1 %vm2295_vm2, %v4234_v5  ;;  %v10616_v5 = vld [vmem:[%s12388_s10 + $0xd0] sm:$0xff]  }
 0x81d   : > { %v10096_v43 = vpop.f32.mrf.mxu0  ;;  %10197 = vmatprep.subr.bf16.mxu1 %v10602_v37 }
 0x81e   : > { %v4237_v16 = vpack.c.bf16 %v10096_v43, %v10095_v35 }
 0x81f   : > { %v4036_v52 = vpop.f32.mrf.mxu0 }
 0x820   : > { %v4236_v53 = vpack.c.bf16 %v4036_v52, %v4033_v45  ;;  %10198 = vmatpush3.bf16.msra.mxu1 %v10602_v37  ;;  %v10617_v45 = vld [vmem:[%s12388_s10 + $0xc8] sm:$0xff]   ;;  %v10618_v52 = vld [vmem:[%s12388_s10 + $0x110] sm:$0xff]  }
 0x821   : > { %v10099_v54 = vpop.f32.mrf.mxu0  ;;  %10199 = vmatprep.subr.bf16.mxu1 %v10603_v46 }
 0x823   : > { %10192 = vmatmul.mubr.msk.bf16.gmra.mxu1 %vm2295_vm2, %v4235_v51  ;;  %v4049_v62 = vpop.f32.mrf.mxu0 }
 0x824   : > { %10200 = vmatpush3.bf16.msra.mxu1 %v10603_v46  ;;  %10205 = vmatprep.mubr.msk.bf16.mxu1 %vm2295_vm2, %v4236_v53 }
 0x825   : > { %v10100_v11 = vpop.f32.mrf.mxu0  ;;  %10201 = vmatprep.subr.bf16.mxu1 %v10604_v4 }
 0x826   : > { %v4239_v28 = vpack.c.bf16 %v10100_v11, %v10099_v54 }
 0x827   : > { %v4052_v10 = vpop.f32.mrf.mxu0 }
 0x828   : > { %10202 = vmatpush3.bf16.msra.mxu1 %v10604_v4  ;;  %v4238_v15 = vpack.c.bf16 %v4052_v10, %v4049_v62  ;;  %v10619_v4 = vld [vmem:[%s12388_s10 + $0x108] sm:$0xff]   ;;  %v10620_v10 = vld [vmem:[%s12388_s10 + $0x100] sm:$0xff]  }
 0x829   : > { %v10103_v12 = vpop.f32.mrf.mxu0  ;;  %10203 = vmatprep.subr.bf16.mxu1 %v10605_v63 }
 0x82b   : > { %v4065_v8 = vpop.f32.mrf.mxu0 }
 0x82c   : > { %10204 = vmatpush3.bf16.msra.mxu1 %v10605_v63 }
 0x82d   : > { %v10104_v19 = vpop.f32.mrf.mxu0  ;;  %10213 = vmatprep.subr.bf16.mxu1 %v10606_v13 }
 0x82e   : > { %v4241_v3 = vpack.c.bf16 %v10104_v19, %v10103_v12 }
 0x82f   : > { %10206 = vmatmul.mubr.msk.bf16.vlgmr.msra.gmra.mxu1 %vm2295_vm2, %v4237_v16  ;;  %v4068_v32 = vpop.f32.mrf.mxu0 }
 0x830   : > { %10209 = vmatprep.mubr.msk.bf16.mxu1 %vm2295_vm2, %v4238_v15  ;;  %10214 = vmatpush3.bf16.msra.mxu1 %v10606_v13  ;;  %v4240_v31 = vpack.c.bf16 %v4068_v32, %v4065_v8  ;;  %v10622_v15 = vld [vmem:[%s12388_s10 + $0xf8] sm:$0xff]  }
 0x831   : > { %v10107_v59 = vpop.f32.mrf.mxu0  ;;  %10215 = vmatprep.subr.bf16.mxu1 %v10608_v21 }
 0x833   : > { %v4081_v34 = vpop.f32.mrf.mxu0 }
 0x834   : > { %10216 = vmatpush3.bf16.msra.mxu1 %v10608_v21 }
 0x835   : > { %v10108_v30 = vpop.f32.mrf.mxu0  ;;  %10217 = vmatprep.subr.bf16.mxu1 %v10609_v14 }
 0x836   : > { %v4243_v58 = vpack.c.bf16 %v10108_v30, %v10107_v59 }
 0x837   : > { %10210 = vmatmul.mubr.msk.bf16.gmra.mxu1 %vm2295_vm2, %v4239_v28  ;;  %v4084_v36 = vpop.f32.mrf.mxu0  ;;  %v10624_v28 = vld [vmem:[%s12388_s10 + $0x160] sm:$0xff]  }
 0x838   : > { %10218 = vmatpush3.bf16.msra.mxu1 %v10609_v14  ;;  %10223 = vmatprep.mubr.msk.bf16.mxu1 %vm2295_vm2, %v4240_v31  ;;  %v4242_v50 = vpack.c.bf16 %v4084_v36, %v4081_v34  ;;  %v10623_v14 = vld [vmem:[%s12388_s10 + $0xf0] sm:$0xff]  }
 0x839   : > { %v10111_v39 = vpop.f32.mrf.mxu0  ;;  %10219 = vmatprep.subr.bf16.mxu1 %v10610_v26 }
 0x83b   : > { %v4097_v41 = vpop.f32.mrf.mxu0 }
 0x83c   : > { %10220 = vmatpush3.bf16.msra.mxu1 %v10610_v26 }
 0x83d   : > { %v10112_v42 = vpop.f32.mrf.mxu0  ;;  %10221 = vmatprep.subr.bf16.mxu1 %v10611_v40 }
 0x83e   : > { %v4245_v51 = vpack.c.bf16 %v10112_v42, %v10111_v39 }
 0x83f   : > { %v4100_v1 = vpop.f32.mrf.mxu0 }
 0x840   : > { %10222 = vmatpush3.bf16.msra.mxu1 %v10611_v40  ;;  %v4244_v38 = vpack.c.bf16 %v4100_v1, %v4097_v41  ;;  %v10625_v41 = vld [vmem:[%s12388_s10 + $0x158] sm:$0xff]  }
 0x841   : > { %v10115_v47 = vpop.f32.mrf.mxu0  ;;  %10231 = vmatprep.subr.bf16.mxu1 %v10612_v48 }
 0x843   : > { %10224 = vmatmul.mubr.msk.bf16.vlgmr.msra.gmra.mxu1 %vm2295_vm2, %v4241_v3  ;;  %v4113_v56 = vpop.f32.mrf.mxu0  ;;  %v10626_v3 = vld [vmem:[%s12388_s10 + $0x150] sm:$0xff]  }
 0x844   : > { %10227 = vmatprep.mubr.msk.bf16.mxu1 %vm2295_vm2, %v4242_v50  ;;  %10232 = vmatpush3.bf16.msra.mxu1 %v10612_v48 }
 0x845   : > { %v10116_v24 = vpop.f32.mrf.mxu0  ;;  %10233 = vmatprep.subr.bf16.mxu1 %v10613_v49 }
 0x846   : > { %v4247_v13 = vpack.c.bf16 %v10116_v24, %v10115_v47 }
 0x847   : > { %v4116_v57 = vpop.f32.mrf.mxu0 }
 0x848   : > { %10234 = vmatpush3.bf16.msra.mxu1 %v10613_v49  ;;  %v4246_v62 = vpack.c.bf16 %v4116_v57, %v4113_v56  ;;  %v10627_v56 = vld [vmem:[%s12388_s10 + $0x148] sm:$0xff]   ;;  %v10628_v57 = vld [vmem:[%s12388_s10 + $0x140] sm:$0xff]   ;;  %s13496_s10 = scalar_lea.vmem [#allocation26], %s12404_s19 }
 0x849   : > { %v12775_v2 = vpop.f32.mrf.mxu0  ;;  %10235 = vmatprep.subr.bf16.mxu1 %v10614_v55 }
 0x84b   : > { %10228 = vmatmul.mubr.msk.bf16.gmra.mxu1 %vm2295_vm2, %v4243_v58  ;;  %v4129_v35 = vpop.f32.mrf.mxu0 }
 0x84c   : > { %10236 = vmatpush3.bf16.msra.mxu1 %v10614_v55  ;;  %10241 = vmatprep.mubr.msk.bf16.mxu1 %vm2295_vm2, %v4244_v38 }
 0x84d   : > { %v10120_v37 = vpop.f32.mrf.mxu0  ;;  %10237 = vmatprep.subr.bf16.mxu1 %v10616_v5 }
 0x84e   : > { %v4249_v39 = vpack.c.bf16 %v10120_v37, %v12775_v2 }
 0x84f   : > { %v4132_v43 = vpop.f32.mrf.mxu0 }
 0x850   : > { %10238 = vmatpush3.bf16.msra.mxu1 %v10616_v5  ;;  %v4248_v16 = vpack.c.bf16 %v4132_v43, %v4129_v35 }
 0x851   : > { %v12781_v46 = vpop.f32.mrf.mxu0  ;;  %10239 = vmatprep.subr.bf16.mxu1 %v10617_v45 }
 0x853   : > { %v4145_v53 = vpop.f32.mrf.mxu0 }
 0x854   : > { %10240 = vmatpush3.bf16.msra.mxu1 %v10617_v45 }
 0x855   : > { %v10124_v54 = vpop.f32.mrf.mxu0  ;;  %10249 = vmatprep.subr.bf16.mxu1 %v10618_v52 }
 0x856   : > { %v4251_v50 = vpack.c.bf16 %v10124_v54, %v12781_v46  ;;  %v10631_v46 = vld [vmem:[%s12397_s5 + $0x44] ss:$8 sps:$4 sm:$0xff]  }
 0x857   : > { %10242 = vmatmul.mubr.msk.bf16.vlgmr.msra.gmra.mxu1 %vm2295_vm2, %v4245_v51  ;;  %v4148_v11 = vpop.f32.mrf.mxu0  ;;  %5510 = vmatprep.subr.bf16.mxu0 %v10631_v46  ;;  %v10634_v51 = vld [vmem:[%s12397_s5 + $0x34] ss:$8 sps:$4 sm:$0xff]  }
 0x858   : > { %10245 = vmatprep.mubr.msk.bf16.mxu1 %vm2295_vm2, %v4246_v62  ;;  %10250 = vmatpush3.bf16.msra.mxu1 %v10618_v52  ;;  %v4250_v42 = vpack.c.bf16 %v4148_v11, %v4145_v53  ;;  %v10629_v53 = vld [vmem:[%s12397_s5 + $0x40] ss:$8 sps:$4 sm:$0xff]   ;;  %v10637_v11 = vld [vmem:[%s12397_s5 + $0x24] ss:$8 sps:$4 sm:$0xff]  }
 0x859   : > { %v10127_v63 = vpop.f32.mrf.mxu0  ;;  %10251 = vmatprep.subr.bf16.mxu1 %v10619_v4 }
 0x85b   : > { %v4161_v12 = vpop.f32.mrf.mxu0 }
 0x85c   : > { %10252 = vmatpush3.bf16.msra.mxu1 %v10619_v4  ;;  %v10632_v4 = vld [vmem:[%s12397_s5 + $0x30] ss:$8 sps:$4 sm:$0xff]  }
 0x85d   : > { %v10128_v8 = vpop.f32.mrf.mxu0  ;;  %10253 = vmatprep.subr.bf16.mxu1 %v10620_v10 }
 0x85e   : > { %v4253_v19 = vpack.c.bf16 %v10128_v8, %v10127_v63 }
 0x85f   : > { %10246 = vmatmul.mubr.msk.bf16.gmra.mxu1 %vm2295_vm2, %v4247_v13  ;;  %v4164_v21 = vpop.f32.mrf.mxu0  ;;  %v10640_v13 = vld [vmem:[%s12397_s5 + $0x14] ss:$8 sps:$4 sm:$0xff]  }
 0x860   : > { %v4252_v32 = vpack.c.bf16 %v4164_v21, %v4161_v12  ;;  %10254 = vmatpush3.bf16.msra.mxu1 %v10620_v10  ;;  %10259 = vmatprep.mubr.msk.bf16.mxu1 %vm2295_vm2, %v4248_v16  ;;  %v10635_v10 = vld [vmem:[%s12397_s5 + $0x20] ss:$8 sps:$4 sm:$0xff]  }
 0x861   : > { %v10131_v59 = vpop.f32.mrf.mxu0  ;;  %10255 = vmatprep.subr.bf16.mxu1 %v10622_v15  ;;  %v12820_v12 = vld [vmem:[%s13482_s3] ss:$0 sm:$0xff] }
 0x862   : > { %10277 = vmatprep.mubr.msk.bf16.mxu0 %vm2295_vm2, %v4252_v32 }
 0x863   : > { %v4177_v34 = vpop.f32.mrf.mxu0  ;;  %10278 = vmatmul.mubr.msk.bf16.vlgmr.msra.gmra.mxu0 %vm2295_vm2, %v4253_v19 }
 0x864   : > { %10256 = vmatpush3.bf16.msra.mxu1 %v10622_v15  ;;  %5511 = vmatpush1.bf16.msra.mxu0 %v10629_v53  ;;  %v10638_v15 = vld [vmem:[%s12397_s5 + $0x10] ss:$8 sps:$4 sm:$0xff]  }
 0x865   : > { %v10132_v31 = vpop.f32.mrf.mxu0  ;;  %10257 = vmatprep.subr.bf16.mxu1 %v10623_v14  ;;  %5512 = vmatprep.subr.bf16.mxu0 %v10634_v51 }
 0x866   : > { %v4255_v30 = vpack.c.bf16 %v10132_v31, %v10131_v59  ;;  %v10643_v59 = vld [vmem:[%s12397_s5 + $0x4] ss:$8 sps:$4 sm:$0xff]  }
 0x867   : > { %v4180_v26 = vpop.f32.mrf.mxu0 }
 0x868   : > { %v4254_v36 = vpack.c.bf16 %v4180_v26, %v4177_v34  ;;  %10258 = vmatpush3.bf16.msra.mxu1 %v10623_v14  ;;  %5513 = vmatpush1.bf16.msra.mxu0 %v10632_v4  ;;  %v10641_v34 = vld [vmem:[%s12397_s5] ss:$8 sps:$4 sm:$0xff]  }
 0x869   : > { %10285 = vmatprep.subr.bf16.mxu1 %v10624_v28  ;;  %v10135_v40 = vpop.f32.mrf.mxu0  ;;  %5514 = vmatprep.subr.bf16.mxu0 %v10637_v11 }
 0x86a   : > { %10281 = vmatprep.mubr.msk.bf16.mxu0 %vm2295_vm2, %v4254_v36 }
 0x86b   : > { %10260 = vmatmul.mubr.msk.bf16.vlgmr.msra.gmra.mxu1 %vm2295_vm2, %v4249_v39  ;;  %10282 = vmatmul.mubr.msk.bf16.gmra.mxu0 %vm2295_vm2, %v4255_v30  ;;  %v4193_v48 = vpop.f32.mrf.mxu0  ;;  %v13397_v39 = vmov 0  }
 0x86c   : > { %10263 = vmatprep.mubr.msk.bf16.mxu1 %vm2295_vm2, %v4250_v42  ;;  %10286 = vmatpush3.bf16.msra.mxu1 %v10624_v28 }
 0x86d   : > { %10287 = vmatprep.subr.bf16.mxu1 %v10625_v41  ;;  %v10136_v1 = vpop.f32.mrf.mxu0  ;;  %5515 = vmatpush1.bf16.msra.mxu0 %v10635_v10 }
 0x86e   : > { %v4257_v38 = vpack.c.bf16 %v10136_v1, %v10135_v40  ;;  %5516 = vmatprep.subr.bf16.mxu0 %v10640_v13  ;;  %5536 = vmatprep.mubr.bf16.mxu0 %v13397_v39 }
 0x86f   : > { %v4196_v47 = vpop.f32.mrf.mxu0 }
 0x870   : > { %10288 = vmatpush3.bf16.msra.mxu1 %v10625_v41  ;;  %v4256_v49 = vpack.c.bf16 %v4196_v47, %v4193_v48 }
 0x871   : > { %10289 = vmatprep.subr.bf16.mxu1 %v10626_v3  ;;  %v10139_v24 = vpop.f32.mrf.mxu0  ;;  %5517 = vmatpush1.bf16.msra.mxu0 %v10638_v15 }
 0x872   : > { %5518 = vmatprep.subr.bf16.mxu0 %v10643_v59 }
 0x873   : > { %10264 = vmatmul.mubr.msk.bf16.gmra.mxu1 %vm2295_vm2, %v4251_v50  ;;  %v4209_v55 = vpop.f32.mrf.mxu0 }
 0x874   : > { %10290 = vmatpush3.bf16.msra.mxu1 %v10626_v3  ;;  %10295 = vmatprep.mubr.msk.bf16.mxu1 %vm2295_vm2, %v4256_v49 }
 0x875   : > { %10291 = vmatprep.subr.bf16.mxu1 %v10627_v56  ;;  %v10140_v58 = vpop.f32.mrf.mxu0  ;;  %5519 = vmatpush1.bf16.msra.mxu0 %v10641_v34 }
 0x876   : > { %v4259_v35 = vpack.c.bf16 %v10140_v58, %v10139_v24 }
 0x877   : > { %v4212_v2 = vpop.f32.mrf.mxu0 }
 0x878   : > { %10292 = vmatpush3.bf16.msra.mxu1 %v10627_v56  ;;  %v4258_v5 = vpack.c.bf16 %v4212_v2, %v4209_v55 }
 0x879   : > { %10293 = vmatprep.subr.bf16.mxu1 %v10628_v57 }
 0x87c   : > { %10294 = vmatpush3.bf16.msra.mxu1 %v10628_v57 }
 0x87f   : > { %10296 = vmatmul.mubr.msk.bf16.vlgmr.msra.gmra.mxu1 %vm2295_vm2, %v4257_v38 }
 0x880   : > { %10299 = vmatprep.mubr.msk.bf16.mxu1 %vm2295_vm2, %v4258_v5 }
 0x887   : > { %10300 = vmatmul.mubr.msk.bf16.gmra.mxu1 %vm2295_vm2, %v4259_v35 }
 0x888   : > { %5813 = vmatprep.mubr.bf16.mxu1 %v13397_v39 }
 0x8b3   : > { %v10153_v37 = vpop.f32.mrf.mxu1 }
 0x8b4   : > { %v4386_v16 = vadd.f32 %v10153_v37, %v12820_v12 }
 0x8b5   : > { %v4347_v45 = vpop.f32.mrf.mxu1 }
 0x8b6   : > { %v4384_v21 = vadd.f32 %v12820_v12, %v4347_v45 }
 0x8b7   : > { %v10154_v43 = vpop.f32.mrf.mxu1 }
 0x8b8   : > { %v4387_v31 = vadd.f32 %v10154_v43, %v12820_v12 }
 0x8b9   : > { %v12811_v52 = vpop.f32.mrf.mxu1 }
 0x8bb   : > { %v10157_v54 = vpop.f32.mrf.mxu1 }
 0x8bc   : > { %v4390_v40 = vadd.f32 %v10157_v54, %v12820_v12 }
 0x8bd   : > { %v4363_v62 = vpop.f32.mrf.mxu1 }
 0x8be   : > { %v4388_v42 = vadd.f32 %v12820_v12, %v4363_v62 }
 0x8bf   : > { %v10158_v63 = vpop.f32.mrf.mxu1 }
 0x8c0   : > { %v4391_v3 = vadd.f32 %v10158_v63, %v12820_v12 }
 0x8c1   : > { %v12823_v8 = vpop.f32.mrf.mxu1 }
 0x8c7   : > { %v10171_v19 = vpop.f32.mrf.mxu1 }
 0x8c8   : > { %v4512_v32 = vadd.f32 %v10171_v19, %v4386_v16 }
 0x8c9   : > { %v4479_v14 = vpop.f32.mrf.mxu1 }
 0x8ca   : > { %v4510_v28 = vadd.f32 %v4479_v14, %v4384_v21 }
 0x8cb   : > { %v10172_v30 = vpop.f32.mrf.mxu1 }
 0x8cc   : > { %v4513_v26 = vadd.f32 %v10172_v30, %v4387_v31 }
 0x8cd   : > { %v12831_v36 = vpop.f32.mrf.mxu1 }
 0x8cf   : > { %v10175_v41 = vpop.f32.mrf.mxu1 }
 0x8d0   : > { %v4516_v48 = vadd.f32 %v10175_v41, %v4390_v40 }
 0x8d1   : > { %v4495_v1 = vpop.f32.mrf.mxu1 }
 0x8d2   : > { %v4514_v47 = vadd.f32 %v4495_v1, %v4388_v42 }
 0x8d3   : > { %v10176_v49 = vpop.f32.mrf.mxu1 }
 0x8d4   : > { %v4517_v50 = vadd.f32 %v10176_v49, %v4391_v3 }
 0x8d5   : > { %v12838_v56 = vpop.f32.mrf.mxu1 }
 0x8db   : > { %v10189_v24 = vpop.f32.mrf.mxu1 }
 0x8dc   : > { %v4638_v55 = vadd.f32 %v10189_v24, %v4512_v32 }
 0x8dd   : > { %v4605_v57 = vpop.f32.mrf.mxu1 }
 0x8de   : > { %v4636_v58 = vadd.f32 %v4605_v57, %v4510_v28 }
 0x8df   : > { %v10190_v2 = vpop.f32.mrf.mxu1 }
 0x8e0   : > { %v4639_v5 = vadd.f32 %v10190_v2, %v4513_v26 }
 0x8e1   : > { %v4608_v38 = vpop.f32.mrf.mxu1 }
 0x8e3   : > { %v10193_v35 = vpop.f32.mrf.mxu1 }
 0x8e4   : > { %v4642_v37 = vadd.f32 %v10193_v35, %v4516_v48 }
 0x8e5   : > { %v4621_v45 = vpop.f32.mrf.mxu1 }
 0x8e6   : > { %v4640_v43 = vadd.f32 %v4621_v45, %v4514_v47  ;;  %v4385_v45 = vadd.f32 %v12820_v12, %v12811_v52  ;;  %v4389_v52 = vadd.f32 %v12820_v12, %v12823_v8 }
 0x8e7   : > { %v10194_v46 = vpop.f32.mrf.mxu1 }
 0x8e8   : > { %v4643_v53 = vadd.f32 %v10194_v46, %v4517_v50 }
 0x8e9   : > { %v12840_v51 = vpop.f32.mrf.mxu1 }
 0x8ef   : > { %v10207_v54 = vpop.f32.mrf.mxu1 }
 0x8f0   : > { %v4764_v4 = vadd.f32 %v10207_v54, %v4638_v55 }
 0x8f1   : > { %v4731_v62 = vpop.f32.mrf.mxu1 }
 0x8f2   : > { %v4762_v54 = vadd.f32 %v4731_v62, %v4636_v58  ;;  %v4515_v62 = vadd.f32 %v12838_v56, %v4389_v52 }
 0x8f3   : > { %v10208_v11 = vpop.f32.mrf.mxu1 }
 0x8f4   : > { %v4765_v63 = vadd.f32 %v10208_v11, %v4639_v5 }
 0x8f5   : > { %v4734_v10 = vpop.f32.mrf.mxu1 }
 0x8f7   : > { %v10211_v13 = vpop.f32.mrf.mxu1 }
 0x8f8   : > { %v4768_v15 = vadd.f32 %v10211_v13, %v4642_v37 }
 0x8f9   : > { %v4747_v16 = vpop.f32.mrf.mxu1 }
 0x8fa   : > { %v12842_v19 = vadd.f32 %v4747_v16, %v4640_v43 }
 0x8fb   : > { %v10212_v21 = vpop.f32.mrf.mxu1 }
 0x8fc   : > { %v4769_v32 = vadd.f32 %v10212_v21, %v4643_v53  ;;  %v4511_v53 = vadd.f32 %v12831_v36, %v4385_v45 }
 0x8fd   : > { %v4750_v59 = vpop.f32.mrf.mxu1 }
 0x8fe   : > { %v4637_v13 = vadd.f32 %v4608_v38, %v4511_v53 }
 0x900   : > { %v4763_v39 = vadd.f32 %v4734_v10, %v4637_v13 }
 0x903   : > { %v10225_v14 = vpop.f32.mrf.mxu1 }
 0x904   : > { %v4890_v11 = vadd.f32 %v10225_v14, %v4764_v4 }
 0x905   : > { %v4857_v34 = vpop.f32.mrf.mxu1 }
 0x906   : > { %v4888_v16 = vadd.f32 %v4857_v34, %v4762_v54 }
 0x907   : > { %v10226_v31 = vpop.f32.mrf.mxu1 }
 0x908   : > { %v4891_v23 = vadd.f32 %v10226_v31, %v4765_v63 }
 0x909   : > { %v4860_v28 = vpop.f32.mrf.mxu1 }
 0x90a   : > { %v4889_v61 = vadd.f32 %v4860_v28, %v4763_v39  ;;  %v4641_v39 = vadd.f32 %v12840_v51, %v4515_v62  ;;  %v13484_v51 = vmax.f32 %v12641_v44, 0.0 }
 0x90b   : > { %v10229_v30 = vpop.f32.mrf.mxu1 }
 0x90c   : > { %v4894_v17 = vadd.f32 %v10229_v30, %v4768_v15  ;;  %v4767_v15 = vadd.f32 %v4750_v59, %v4641_v39 }
 0x90d   : > { %v12844_v26 = vpop.f32.mrf.mxu1 }
 0x90e   : > { %v4892_v59 = vadd.f32 %v12844_v26, %v12842_v19 }
 0x90f   : > { %v10230_v40 = vpop.f32.mrf.mxu1 }
 0x911   : > { %v4876_v41 = vpop.f32.mrf.mxu1 }
 0x917   : > { %v10243_v42 = vpop.f32.mrf.mxu1 }
 0x918   : > { %v5016_v21 = vadd.f32 %v10243_v42, %v4890_v11  ;;  %v4895_v42 = vadd.f32 %v10230_v40, %v4769_v32  ;;  %v13485_v32 = vmax.f32 %v12643_v0, 0.0 }
 0x919   : > { %v4983_v48 = vpop.f32.mrf.mxu1 }
 0x91a   : > { %v5014_v29 = vadd.f32 %v4983_v48, %v4888_v16  ;;  %v4893_v48 = vadd.f32 %v4876_v41, %v4767_v15 }
 0x91b   : > { %v10244_v1 = vpop.f32.mrf.mxu1 }
 0x91c   : > { %v5017_v7 = vadd.f32 %v10244_v1, %v4891_v23 }
 0x91d   : > { %v4986_v3 = vpop.f32.mrf.mxu1 }
 0x91e   : > { %v5015_v58 = vadd.f32 %v4986_v3, %v4889_v61 }
 0x91f   : > { %v10247_v47 = vpop.f32.mrf.mxu1 }
 0x920   : > { %v5020_v14 = vadd.f32 %v10247_v47, %v4894_v17 }
 0x921   : > { %v12846_v49 = vpop.f32.mrf.mxu1 }
 0x923   : > { %v10248_v50 = vpop.f32.mrf.mxu1  ;;  %v10279_v5 = vpop.f32.mrf.mxu0 }
 0x924   : > { %v5021_v61 = vadd.f32 %v10248_v50, %v4895_v42 }
 0x925   : > { %v5002_v24 = vpop.f32.mrf.mxu1  ;;  %v5235_v43 = vpop.f32.mrf.mxu0 }
 0x926   : > { %v5019_v50 = vadd.f32 %v5002_v24, %v4893_v48  ;;  %v13487_v24 = vmax.f32 %v12666_v20, 0.0  ;;  %v13490_v20 = vld [vmem:[#allocation56_spill] sm:$0xff] }
 0x927   : > { %v10280_v25 = vpop.f32.mrf.mxu0 }
 0x929   : > { %v5238_v22 = vpop.f32.mrf.mxu0 }
 0x92b   : > { %v10261_v55 = vpop.f32.mrf.mxu1  ;;  %v10283_v23 = vpop.f32.mrf.mxu0 }
 0x92c   : > { %v5142_v9 = vadd.f32 %v10261_v55, %v5016_v21 }
 0x92d   : > { %v5109_v57 = vpop.f32.mrf.mxu1  ;;  %v5251_v1 = vpop.f32.mrf.mxu0 }
 0x92e   : > { %v5140_v60 = vadd.f32 %v5109_v57, %v5014_v29  ;;  %v5268_v38 = vadd.f32 %v10279_v5, %v5142_v9 }
 0x92f   : > { %v10262_v2 = vpop.f32.mrf.mxu1 }
 0x930   : > { %v5143_v4 = vadd.f32 %v10262_v2, %v5017_v7  ;;  %v5266_v31 = vadd.f32 %v5235_v43, %v5140_v60  ;;  %v13483_v7 = vmax.f32 %v12645_v33, 0.0 }
 0x931   : > { %v5112_v35 = vpop.f32.mrf.mxu1 }
 0x932   : > { %v5141_v10 = vadd.f32 %v5112_v35, %v5015_v58  ;;  %v5269_v8 = vadd.f32 %v10280_v25, %v5143_v4  ;;  %v10284_v35 = vpop.f32.mrf.mxu0 }
 0x933   : > { %v10265_v37 = vpop.f32.mrf.mxu1 }
 0x934   : > { %v5146_v29 = vadd.f32 %v10265_v37, %v5020_v14  ;;  %v5267_v17 = vadd.f32 %v5238_v22, %v5141_v10  ;;  %v13486_v22 = vmax.f32 %v12647_v6, 0.0  ;;  %v5254_v13 = vpop.f32.mrf.mxu0 }
 0x935   : > { %v12850_v46 = vpop.f32.mrf.mxu1 }
 0x936   : > { %v5272_v60 = vadd.f32 %v10283_v23, %v5146_v29 }
 0x937   : > { %v10266_v27 = vpop.f32.mrf.mxu1 }
 0x938   : > { %v5147_v47 = vadd.f32 %v10266_v27, %v5021_v61  ;;  %v5018_v27 = vadd.f32 %v12846_v49, %v4892_v59  ;;  %v13488_v49 = vmax.f32 %v12663_v18, 0.0 }
 0x939   : > { %v5128_v36 = vpop.f32.mrf.mxu1 }
 0x93a   : > { %v5145_v44 = vadd.f32 %v5128_v36, %v5019_v50  ;;  %v5273_v53 = vadd.f32 %v10284_v35, %v5147_v47  ;;  %v5144_v19 = vadd.f32 %v12850_v46, %v5018_v27  ;;  %v13489_v36 = vmov 0  }
 0x93c   : > { %v5271_v52 = vadd.f32 %v5254_v13, %v5145_v44  ;;  %v5270_v4 = vadd.f32 %v5251_v1, %v5144_v19 }
 0x93f   : > { %v10297_v34 = vpop.f32.mrf.mxu1 }
 0x940   : > { %v5394_v63 = vadd.f32 %v10297_v34, %v5268_v38  ;;  %v13491_v34 = vmax.f32 %v13490_v20, 0.0 }
 0x941   : > { %v5361_v28 = vpop.f32.mrf.mxu1 }
 0x942   : > { %v5392_v12 = vadd.f32 %v5361_v28, %v5266_v31  ;;  %v5402_v9 = vadd.f32 %v5394_v63, %v13483_v7  ;;  %v13492_v63 = vld [vmem:[#allocation55_spill] sm:$0xff] }
 0x943   : > { %v10298_v30 = vpop.f32.mrf.mxu1  ;;  %v13493_v31 = vmax.f32 %v13492_v63, 0.0 }
 0x944   : > { %v5395_v56 = vadd.f32 %v10298_v30, %v5269_v8  ;;  %v5400_v55 = vadd.f32 %v5392_v12, %v13484_v51  ;;  %v5410_v57 = vmax.f32 %v5402_v9, 0.0  ;;  %v5432_v9 = vlaneseq  ;;  %v5430_v51 = vld [vmem:[%s13494_s22] sm:$0x3] }
 0x945   : > { %v5364_v3 = vpop.f32.mrf.mxu1 }
 0x946   : > { %v5403_v40 = vadd.f32 %v5395_v56, %v13485_v32  ;;  %v5393_v25 = vadd.f32 %v5364_v3, %v5267_v17  ;;  %v5408_v45 = vmax.f32 %v5400_v55, 0.0  ;;  %v5433_v48 = vshrl.u32 %v5432_v9, 7  ;;  %v10644_v9 = vld [vmem:[#allocation20] sm:$0xff]  }
 0x947   : > { %v10301_v33 = vpop.f32.mrf.mxu1 }
 0x948   : > { %v5411_v2 = vmax.f32 %v5403_v40, 0.0  ;;  %v5401_v41 = vadd.f32 %v5393_v25, %v13486_v22  ;;  %v5398_v5 = vadd.f32 %v10301_v33, %v5272_v60  ;;  %v12896_v60 = vsub.s32 0, %v5433_v48 }
 0x949   : > { %v5377_v37 = vpop.f32.mrf.mxu1  ;;  %v12898_v47 = vsub.s32 1, %v5433_v48  ;;  %v10675_v48 = vld [vmem:[%s12412_s0 + $0x60] ss:$8 sps:$4 sm:$0xff]  }
 0x94a   : > { %v12868_v0 = vpack.c.bf16 %v5411_v2, %v5410_v57  ;;  %v5409_v43 = vmax.f32 %v5401_v41, 0.0  ;;  %v5406_v6 = vadd.f32 %v5398_v5, %v13487_v24  ;;  %v5396_v62 = vadd.f32 %v5377_v37, %v5270_v4 }
 0x94b   : > { %v10302_v54 = vpop.f32.mrf.mxu1  ;;  %v5435_v40 = vrot.slane %v5430_v51, %v12896_v60  ;;  %v5439_v25 = vrot.slane %v5430_v51, %v12898_v47  ;;  %v10668_v51 = vld [vmem:[%s12412_s0 + $0x234] ss:$8 sps:$4 sm:$0xff]  }
 0x94c   : > { %v12871_v26 = vpack.c.bf16 %v5409_v43, %v5408_v45  ;;  %v5399_v11 = vadd.f32 %v10302_v54, %v5273_v53  ;;  %v5414_v58 = vmax.f32 %v5406_v6, 0.0  ;;  %v5404_v18 = vadd.f32 %v5396_v62, %v13493_v31 }
 0x94d   : > { %v5380_v16 = vpop.f32.mrf.mxu1 }
 0x94e   : > { %v5407_v21 = vadd.f32 %v5399_v11, %v13488_v49  ;;  %9082 = vmatmul.mubr.msk.bf16.vlgmr.msra.gmra.mxu0 %vm2295_vm2, %v12871_v26  ;;  %v5397_v38 = vadd.f32 %v5380_v16, %v5271_v52  ;;  %v5412_v23 = vmax.f32 %v5404_v18, 0.0 }
 0x94f   : > { %5546 = vmatprep.mubr.bf16.mxu0 %v13489_v36 }
 0x950   : > { %v5415_v46 = vmax.f32 %v5407_v21, 0.0  ;;  %v5405_v10 = vadd.f32 %v5397_v38, %v13491_v34 }
 0x952   : > { %v12880_v14 = vpack.c.bf16 %v5415_v46, %v5414_v58  ;;  %v5413_v39 = vmax.f32 %v5405_v10, 0.0 }
 0x954   : > { %v12889_v29 = vpack.c.bf16 %v5413_v39, %v5412_v23 }
 0x956   : > { %9083 = vmatmul.mubr.msk.bf16.gmra.mxu0 %vm2295_vm2, %v12868_v0 }
 0x957   : > { %5556 = vmatprep.mubr.bf16.mxu0 %v13489_v36 }
 0x95e   : > { %9084 = vmatmul.mubr.msk.bf16.gmra.mxu0 %vm2295_vm2, %v12889_v29 }
 0x95f   : > { %5566 = vmatprep.mubr.bf16.mxu0 %v13489_v36 }
 0x966   : > { %9085 = vmatmul.mubr.msk.bf16.gmra.mxu0 %vm2295_vm2, %v12880_v14 }
 0xa0e   : > { %v5538_v28 = vpop.f32.mrf.mxu0 }
 0xa0f   : > { %v5539_v31 = vadd.f32 %v5538_v28, %v5435_v40  ;;  %v10677_v28 = vld [vmem:[%s12412_s0 + $0x64] ss:$8 sps:$4 sm:$0xff]  }
 0xa10   : > { %v5540_v42 = vpop.f32.mrf.mxu0 }
 0xa11   : > { %v5541_v46 = vadd.f32 %v5540_v42, %v5439_v25 }
 0xa12   : > { %v5542_v12 = vpop.f32.mrf.mxu0 }
 0xa13   : > { %v5543_v62 = vadd.f32 %v5542_v12, %v5435_v40  ;;  %v5578_v39 = vmax.f32 %v5541_v46, 0.0  ;;  %v5577_v12 = vmax.f32 %v5539_v31, 0.0  ;;  %v10711_v46 = vld [vmem:[%s12412_s0 + $0x114] ss:$8 sps:$4 sm:$0xff]  }
 0xa14   : > { %v5544_v8 = vpop.f32.mrf.mxu0  ;;  %v10656_v31 = vld [vmem:[#allocation20 + $0x60] sm:$0xff]  }
 0xa15   : > { %v5545_v49 = vadd.f32 %v5544_v8, %v5439_v25  ;;  %v5579_v23 = vmax.f32 %v5543_v62, 0.0  ;;  %v10714_v62 = vld [vmem:[%s12412_s0 + $0x1f4] ss:$8 sps:$4 sm:$0xff]  }
 0xa16   : > { %v5548_v15 = vpop.f32.mrf.mxu0 }
 0xa17   : > { %v5549_v58 = vadd.f32 %v5548_v15, %v5435_v40  ;;  %v5580_v10 = vmax.f32 %v5545_v49, 0.0  ;;  %v10660_v15 = vld [vmem:[%s12412_s0 + $0x254] ss:$8 sps:$4 sm:$0xff]  }
 0xa18   : > { %v5550_v30 = vpop.f32.mrf.mxu0  ;;  %v10704_v49 = vld [vmem:[%s12412_s0 + $0x94] ss:$8 sps:$4 sm:$0xff]  }
 0xa19   : > { %v5551_v19 = vadd.f32 %v5550_v30, %v5439_v25  ;;  %v5581_v18 = vmax.f32 %v5549_v58, 0.0  ;;  %v5630_v42 = vpack.c.bf16 %v5580_v10, %v5578_v39  ;;  %v10672_v30 = vld [vmem:[%s12412_s0 + $0x70] ss:$8 sps:$4 sm:$0xff]   ;;  %v10725_v10 = vld [vmem:[%s12412_s0 + $0x1e0] ss:$8 sps:$4 sm:$0xff]  }
 0xa1a   : > { %v5552_v61 = vpop.f32.mrf.mxu0  ;;  %v10653_v58 = vld [vmem:[#allocation20 + $0x48] sm:$0xff]  }
 0xa1b   : > { %v5553_v11 = vadd.f32 %v5552_v61, %v5435_v40  ;;  %v5582_v38 = vmax.f32 %v5551_v19, 0.0  ;;  %v10674_v61 = vld [vmem:[%s12412_s0 + $0x74] ss:$8 sps:$4 sm:$0xff]   ;;  %v10699_v19 = vld [vmem:[%s12412_s0] ss:$8 sps:$4 sm:$0xff]  }
 0xa1c   : > { %v5554_v7 = vpop.f32.mrf.mxu0  ;;  %6158 = vmatprep.subr.bf16.mxu0 %v10674_v61  ;;  %v10740_v39 = vld [vmem:[%s12412_s0 + $0x270] ss:$8 sps:$4 sm:$0xff]  }
 0xa1d   : > { %v5555_v44 = vadd.f32 %v5554_v7, %v5439_v25  ;;  %v5583_v20 = vmax.f32 %v5553_v11, 0.0  ;;  %v5629_v7 = vpack.c.bf16 %v5579_v23, %v5577_v12  ;;  %6159 = vmatpush1.bf16.msra.mxu0 %v10672_v30  ;;  %v10650_v11 = vld [vmem:[#allocation20 + $0x30] sm:$0xff]   ;;  %v10742_v23 = vld [vmem:[%s12412_s0 + $0x274] ss:$8 sps:$4 sm:$0xff]  }
 0xa1e   : > { %v5558_v56 = vpop.f32.mrf.mxu0  ;;  %6160 = vmatprep.subr.bf16.mxu0 %v10677_v28  ;;  %v10754_v12 = vld [vmem:[%s12412_s0 + $0x264] ss:$8 sps:$4 sm:$0xff]   ;;  %v10763_v30 = vld [vmem:[%s12412_s0 + $0x394] ss:$8 sps:$4 sm:$0xff]  }
 0xa1f   : > { %v5559_v53 = vadd.f32 %v5558_v56, %v5435_v40  ;;  %v5584_v21 = vmax.f32 %v5555_v44, 0.0  ;;  %v5631_v8 = vpack.c.bf16 %v5583_v20, %v5581_v18  ;;  %v10658_v56 = vld [vmem:[%s12412_s0 + $0x250] ss:$8 sps:$4 sm:$0xff]   ;;  %v10698_v44 = vld [vmem:[%s12412_s0 + $0x204] ss:$8 sps:$4 sm:$0xff]  }
 0xa20   : > { %v5560_v17 = vpop.f32.mrf.mxu0  ;;  %v10654_v20 = vld [vmem:[#allocation20 + $0x50] sm:$0xff]   ;;  %v10657_v18 = vld [vmem:[#allocation20 + $0x68] sm:$0xff]   ;;  %v10708_v61 = vld [vmem:[#allocation20 + $0x80] sm:$0xff]  }
 0xa21   : > { %v5561_v41 = vadd.f32 %v5560_v17, %v5439_v25  ;;  %v5585_v4 = vmax.f32 %v5559_v53, 0.0  ;;  %v5632_v63 = vpack.c.bf16 %v5584_v21, %v5582_v38  ;;  %v10665_v17 = vld [vmem:[%s12412_s0 + $0x244] ss:$8 sps:$4 sm:$0xff]   ;;  %6161 = vmatpush1.bf16.msra.mxu0 %v10675_v48  ;;  %v10702_v21 = vld [vmem:[%s12412_s0 + $0x90] ss:$8 sps:$4 sm:$0xff]  }
 0xa22   : > { %v5562_v1 = vpop.f32.mrf.mxu0  ;;  %v10701_v53 = vld [vmem:[%s12412_s0 + $0x4] ss:$8 sps:$4 sm:$0xff]   ;;  %v10712_v38 = vld [vmem:[%s12412_s0 + $0x1f0] ss:$8 sps:$4 sm:$0xff]  }
 0xa23   : > { %v5563_v27 = vadd.f32 %v5562_v1, %v5435_v40  ;;  %v5586_v24 = vmax.f32 %v5561_v41, 0.0  ;;  %v10680_v1 = vld [vmem:[%s12412_s0 + $0x54] ss:$8 sps:$4 sm:$0xff]   ;;  %v10692_v41 = vld [vmem:[%s12412_s0 + $0x24] ss:$8 sps:$4 sm:$0xff]  }
 0xa24   : > { %v5564_v3 = vpop.f32.mrf.mxu0  ;;  %6162 = vmatprep.subr.bf16.mxu0 %v10680_v1  ;;  %v10709_v1 = vld [vmem:[%s12412_s0 + $0x110] ss:$8 sps:$4 sm:$0xff]  }
 0xa25   : > { %v5565_v50 = vadd.f32 %v5564_v3, %v5439_v25  ;;  %v5587_v13 = vmax.f32 %v5563_v27, 0.0  ;;  %v10663_v3 = vld [vmem:[%s12412_s0 + $0x240] ss:$8 sps:$4 sm:$0xff]   ;;  %v10681_v27 = vld [vmem:[%s12412_s0 + $0x210] ss:$8 sps:$4 sm:$0xff]  }
 0xa26   : > { %v5568_v55 = vpop.f32.mrf.mxu0 }
 0xa27   : > { %v5569_v2 = vadd.f32 %v5568_v55, %v5435_v40  ;;  %v5588_v37 = vmax.f32 %v5565_v50, 0.0  ;;  %v5633_v34 = vpack.c.bf16 %v5587_v13, %v5585_v4  ;;  %v10678_v55 = vld [vmem:[%s12412_s0 + $0x50] ss:$8 sps:$4 sm:$0xff]   ;;  %v10684_v50 = vld [vmem:[%s12412_s0 + $0x40] ss:$8 sps:$4 sm:$0xff]  }
 0xa28   : > { %v5570_v32 = vpop.f32.mrf.mxu0  ;;  %6163 = vmatpush1.bf16.msra.mxu0 %v10678_v55  ;;  %v10651_v13 = vld [vmem:[#allocation20 + $0x38] sm:$0xff]  }
 0xa29   : > { %v5571_v33 = vadd.f32 %v5570_v32, %v5439_v25  ;;  %v5589_v54 = vmax.f32 %v5569_v2, 0.0  ;;  %v5634_v52 = vpack.c.bf16 %v5588_v37, %v5586_v24  ;;  %v10686_v32 = vld [vmem:[%s12412_s0 + $0x44] ss:$8 sps:$4 sm:$0xff]   ;;  %v10683_v2 = vld [vmem:[%s12412_s0 + $0x214] ss:$8 sps:$4 sm:$0xff]  }
 0xa2a   : > { %v5572_v59 = vpop.f32.mrf.mxu0  ;;  %6164 = vmatprep.subr.bf16.mxu0 %v10686_v32  ;;  %v10695_v37 = vld [vmem:[%s12412_s0 + $0x14] ss:$8 sps:$4 sm:$0xff]   ;;  %v10705_v4 = vld [vmem:[%s12412_s0 + $0x80] ss:$8 sps:$4 sm:$0xff]   ;;  %v10717_v55 = vld [vmem:[%s12412_s0 + $0x104] ss:$8 sps:$4 sm:$0xff]  }
 0xa2b   : > { %v5573_v57 = vadd.f32 %v5572_v59, %v5435_v40  ;;  %v5590_v45 = vmax.f32 %v5571_v33, 0.0  ;;  %v10645_v40 = vld [vmem:[#allocation20 + $0x8] sm:$0xff]   ;;  %v10671_v59 = vld [vmem:[%s12412_s0 + $0x224] ss:$8 sps:$4 sm:$0xff]   ;;  %v10648_v24 = vld [vmem:[#allocation20 + $0x20] sm:$0xff]  }
 0xa2c   : > { %v5574_v22 = vpop.f32.mrf.mxu0  ;;  %v10689_v33 = vld [vmem:[%s12412_s0 + $0x34] ss:$8 sps:$4 sm:$0xff]   ;;  %6165 = vmatpush1.bf16.msra.mxu0 %v10684_v50 }
 0xa2d   : > { %v5575_v5 = vadd.f32 %v5574_v22, %v5439_v25  ;;  %v5591_v35 = vmax.f32 %v5573_v57, 0.0  ;;  %v10666_v25 = vld [vmem:[%s12412_s0 + $0x230] ss:$8 sps:$4 sm:$0xff]   ;;  %v10669_v57 = vld [vmem:[%s12412_s0 + $0x220] ss:$8 sps:$4 sm:$0xff]   ;;  %6166 = vmatprep.subr.bf16.mxu0 %v10689_v33 }
 0xa2e   : > { %v10687_v22 = vld [vmem:[%s12412_s0 + $0x30] ss:$8 sps:$4 sm:$0xff]  }
 0xa2f   : > { %v5592_v43 = vmax.f32 %v5575_v5, 0.0  ;;  %v5635_v16 = vpack.c.bf16 %v5591_v35, %v5589_v54  ;;  %v10646_v5 = vld [vmem:[#allocation20 + $0x10] sm:$0xff]   ;;  %v10647_v54 = vld [vmem:[#allocation20 + $0x18] sm:$0xff]  }
 0xa30   : > { %6167 = vmatpush1.bf16.msra.mxu0 %v10687_v22  ;;  %v10690_v35 = vld [vmem:[%s12412_s0 + $0x20] ss:$8 sps:$4 sm:$0xff]  }
 0xa31   : > { %v5636_v6 = vpack.c.bf16 %v5592_v43, %v5590_v45  ;;  %6168 = vmatprep.subr.bf16.mxu0 %v10692_v41  ;;  %v10696_v45 = vld [vmem:[%s12412_s0 + $0x200] ss:$8 sps:$4 sm:$0xff]   ;;  %v10693_v43 = vld [vmem:[%s12412_s0 + $0x10] ss:$8 sps:$4 sm:$0xff]   ;;  %v10724_v41 = vld [vmem:[%s12412_s0 + $0xe4] ss:$8 sps:$4 sm:$0xff]  }
 0xa33   : > { %5789 = vmatprep.subr.bf16.mxu1 %v5636_v6  ;;  %v10649_v6 = vld [vmem:[#allocation20 + $0x28] sm:$0xff]  }
 0xa34   : > { %5790 = vmatpush1.bf16.msra.mxu1 %v5635_v16  ;;  %6169 = vmatpush1.bf16.msra.mxu0 %v10690_v35  ;;  %v10652_v16 = vld [vmem:[#allocation20 + $0x40] sm:$0xff]  }
 0xa35   : > { %5791 = vmatprep.subr.bf16.mxu1 %v5634_v52  ;;  %6170 = vmatprep.subr.bf16.mxu0 %v10695_v37  ;;  %v10707_v52 = vld [vmem:[%s12412_s0 + $0x84] ss:$8 sps:$4 sm:$0xff]  }
 0xa38   : > { %5792 = vmatpush1.bf16.msra.mxu1 %v5633_v34  ;;  %6171 = vmatpush1.bf16.msra.mxu0 %v10693_v43  ;;  %v10655_v34 = vld [vmem:[#allocation20 + $0x58] sm:$0xff]   ;;  %v10728_v43 = vld [vmem:[%s12412_s0 + $0xd0] ss:$8 sps:$4 sm:$0xff]  }
 0xa39   : > { %5793 = vmatprep.subr.bf16.mxu1 %v5632_v63  ;;  %6172 = vmatprep.subr.bf16.mxu0 %v10701_v53  ;;  %v10727_v63 = vld [vmem:[%s12412_s0 + $0x1e4] ss:$8 sps:$4 sm:$0xff]  }
 0xa3c   : > { %5794 = vmatpush1.bf16.msra.mxu1 %v5631_v8  ;;  %6173 = vmatpush1.bf16.msra.mxu0 %v10699_v19  ;;  %v10661_v8 = vld [vmem:[#allocation20 + $0x70] sm:$0xff]  }
 0xa3d   : > { %5795 = vmatprep.subr.bf16.mxu1 %v5630_v42  ;;  %6186 = vmatprep.subr.bf16.mxu0 %v10704_v49  ;;  %v10662_v42 = vld [vmem:[#allocation20 + $0x78] sm:$0xff]  }
 0xa40   : > { %5796 = vmatpush1.bf16.msra.mxu1 %v5629_v7  ;;  %6187 = vmatpush2.bf16.msra.mxu0 %v10702_v21  ;;  %v10718_v7 = vld [vmem:[#allocation20 + $0x88] sm:$0xff]   ;;  %v10739_v21 = vld [vmem:[%s12412_s0 + $0xa4] ss:$8 sps:$4 sm:$0xff]  }
 0xa41   : > { %6733 = vmatprep.subr.bf16.mxu1 %v10660_v15  ;;  %6188 = vmatprep.subr.bf16.mxu0 %v10707_v52  ;;  %v10752_v15 = vld [vmem:[%s12412_s0 + $0x260] ss:$8 sps:$4 sm:$0xff]  }
 0xa43   : > { %9104 = vmatmul.mubr.msk.bf16.vlgmr.msra.gmra.mxu1 %vm1350_vm0, %v10644_v9 }
 0xa44   : > { %5823 = vmatprep.mubr.bf16.mxu1 %v13489_v36  ;;  %6734 = vmatpush1.bf16.msra.mxu1 %v10658_v56 }
 0xa45   : > { %6735 = vmatprep.subr.bf16.mxu1 %v10665_v17  ;;  %6189 = vmatpush2.bf16.msra.mxu0 %v10705_v4 }
 0xa46   : > { %6357 = vmatprep.subr.bf16.mxu0 %v10711_v46  ;;  %v10745_v46 = vld [vmem:[%s12412_s0 + $0x134] ss:$8 sps:$4 sm:$0xff]  }
 0xa48   : > { %6736 = vmatpush1.bf16.msra.mxu1 %v10663_v3 }
 0xa49   : > { %6737 = vmatprep.subr.bf16.mxu1 %v10668_v51 }
 0xa4b   : > { %9105 = vmatmul.mubr.msk.bf16.gmra.mxu1 %vm1350_vm0, %v10645_v40  ;;  %v10715_v40 = vld [vmem:[%s12412_s0 + $0x100] ss:$8 sps:$4 sm:$0xff]  }
 0xa4c   : > { %5833 = vmatprep.mubr.bf16.mxu1 %v13489_v36  ;;  %6738 = vmatpush1.bf16.msra.mxu1 %v10666_v25 }
 0xa4d   : > { %6739 = vmatprep.subr.bf16.mxu1 %v10671_v59  ;;  %v10721_v59 = vld [vmem:[%s12412_s0 + $0xf4] ss:$8 sps:$4 sm:$0xff]  }
 0xa50   : > { %6740 = vmatpush1.bf16.msra.mxu1 %v10669_v57  ;;  %v10719_v57 = vld [vmem:[%s12412_s0 + $0xf0] ss:$8 sps:$4 sm:$0xff]  }
 0xa51   : > { %6741 = vmatprep.subr.bf16.mxu1 %v10683_v2 }
 0xa53   : > { %9106 = vmatmul.mubr.msk.bf16.gmra.mxu1 %vm1350_vm0, %v10646_v5 }
 0xa54   : > { %5843 = vmatprep.mubr.bf16.mxu1 %v13489_v36  ;;  %6742 = vmatpush1.bf16.msra.mxu1 %v10681_v27  ;;  %v10722_v27 = vld [vmem:[%s12412_s0 + $0xe0] ss:$8 sps:$4 sm:$0xff]  }
 0xa55   : > { %6743 = vmatprep.subr.bf16.mxu1 %v10698_v44  ;;  %v10730_v44 = vld [vmem:[%s12412_s0 + $0xd4] ss:$8 sps:$4 sm:$0xff]  }
 0xa58   : > { %6744 = vmatpush1.bf16.msra.mxu1 %v10696_v45 }
 0xa59   : > { %6745 = vmatprep.subr.bf16.mxu1 %v10714_v62  ;;  %v10743_v62 = vld [vmem:[%s12412_s0 + $0x130] ss:$8 sps:$4 sm:$0xff]  }
 0xa5b   : > { %9107 = vmatmul.mubr.msk.bf16.gmra.mxu1 %vm1350_vm0, %v10647_v54  ;;  %v10733_v54 = vld [vmem:[%s12412_s0 + $0xc4] ss:$8 sps:$4 sm:$0xff]  }
 0xa5c   : > { %5853 = vmatprep.mubr.bf16.mxu1 %v13489_v36  ;;  %6746 = vmatpush1.bf16.msra.mxu1 %v10712_v38 }
 0xa5d   : > { %6747 = vmatprep.subr.bf16.mxu1 %v10727_v63  ;;  %v10746_v63 = vld [vmem:[%s12412_s0 + $0x120] ss:$8 sps:$4 sm:$0xff]  }
 0xa60   : > { %6748 = vmatpush1.bf16.msra.mxu1 %v10725_v10 }
 0xa61   : > { %6761 = vmatprep.subr.bf16.mxu1 %v10742_v23  ;;  %v10749_v23 = vld [vmem:[%s12412_s0 + $0x1b0] ss:$8 sps:$4 sm:$0xff]  }
 0xa63   : > { %9108 = vmatmul.mubr.msk.bf16.gmra.mxu1 %vm1350_vm0, %v10648_v24  ;;  %v10731_v24 = vld [vmem:[%s12412_s0 + $0xc0] ss:$8 sps:$4 sm:$0xff]  }
 0xa64   : > { %5863 = vmatprep.mubr.bf16.mxu1 %v13489_v36  ;;  %6762 = vmatpush2.bf16.msra.mxu1 %v10740_v39 }
 0xa65   : > { %6763 = vmatprep.subr.bf16.mxu1 %v10754_v12  ;;  %v10757_v12 = vld [vmem:[%s12412_s0 + $0x1a4] ss:$8 sps:$4 sm:$0xff]  }
 0xa68   : > { %6764 = vmatpush2.bf16.msra.mxu1 %v10752_v15 }
 0xa69   : > { %7109 = vmatprep.subr.bf16.mxu1 %v10763_v30 }
 0xa6b   : > { %9109 = vmatmul.mubr.msk.bf16.gmra.mxu1 %vm1350_vm0, %v10649_v6 }
 0xa6c   : > { %5873 = vmatprep.mubr.bf16.mxu1 %v13489_v36 }
 0xa73   : > { %9110 = vmatmul.mubr.msk.bf16.gmra.mxu1 %vm1350_vm0, %v10650_v11  ;;  %v10736_v11 = vld [vmem:[%s12412_s0 + $0xb4] ss:$8 sps:$4 sm:$0xff]  }
 0xa74   : > { %5883 = vmatprep.mubr.bf16.mxu1 %v13489_v36 }
 0xa7b   : > { %9111 = vmatmul.mubr.msk.bf16.gmra.mxu1 %vm1350_vm0, %v10651_v13 }
 0xa7c   : > { %5893 = vmatprep.mubr.bf16.mxu1 %v13489_v36 }
 0xa83   : > { %9112 = vmatmul.mubr.msk.bf16.gmra.mxu1 %vm1350_vm0, %v10652_v16  ;;  %v10734_v16 = vld [vmem:[%s12412_s0 + $0xb0] ss:$8 sps:$4 sm:$0xff]  }
 0xa84   : > { %5903 = vmatprep.mubr.bf16.mxu1 %v13489_v36 }
 0xa8b   : > { %9113 = vmatmul.mubr.msk.bf16.gmra.mxu1 %vm1350_vm0, %v10653_v58  ;;  %v10737_v58 = vld [vmem:[%s12412_s0 + $0xa0] ss:$8 sps:$4 sm:$0xff]  }
 0xa8c   : > { %5913 = vmatprep.mubr.bf16.mxu1 %v13489_v36 }
 0xa93   : > { %9114 = vmatmul.mubr.msk.bf16.gmra.mxu1 %vm1350_vm0, %v10654_v20 }
 0xa94   : > { %5923 = vmatprep.mubr.bf16.mxu1 %v13489_v36 }
 0xa9b   : > { %9115 = vmatmul.mubr.msk.bf16.gmra.mxu1 %vm1350_vm0, %v10655_v34  ;;  %v10748_v34 = vld [vmem:[%s12412_s0 + $0x124] ss:$8 sps:$4 sm:$0xff]  }
 0xa9c   : > { %5933 = vmatprep.mubr.bf16.mxu1 %v13489_v36 }
 0xaa3   : > { %9116 = vmatmul.mubr.msk.bf16.gmra.mxu1 %vm1350_vm0, %v10656_v31 }
 0xaa4   : > { %5943 = vmatprep.mubr.bf16.mxu1 %v13489_v36 }
 0xaab   : > { %9117 = vmatmul.mubr.msk.bf16.gmra.mxu1 %vm1350_vm0, %v10657_v18  ;;  %v10751_v18 = vld [vmem:[%s12412_s0 + $0x1b4] ss:$8 sps:$4 sm:$0xff]  }
 0xaac   : > { %5953 = vmatprep.mubr.bf16.mxu1 %v13489_v36 }
 0xab3   : > { %9118 = vmatmul.mubr.msk.bf16.gmra.mxu1 %vm1350_vm0, %v10661_v8 }
 0xab4   : > { %5963 = vmatprep.mubr.bf16.mxu1 %v13489_v36 }
 0xabb   : > { %9119 = vmatmul.mubr.msk.bf16.gmra.mxu1 %vm1350_vm0, %v10662_v42 }
 0xabc   : > { %5973 = vmatprep.mubr.bf16.mxu1 %v13489_v36 }
 0xac3   : > { %9120 = vmatmul.mubr.msk.bf16.gmra.mxu1 %vm1350_vm0, %v10708_v61  ;;  %v10755_v61 = vld [vmem:[%s12412_s0 + $0x1a0] ss:$8 sps:$4 sm:$0xff]  }
 0xac4   : > { %5983 = vmatprep.mubr.bf16.mxu1 %v13489_v36 }
 0xacb   : > { %9121 = vmatmul.mubr.msk.bf16.gmra.mxu1 %vm1350_vm0, %v10718_v7 }
 0xb03   : > { %v5815_v28 = vpop.f32.mrf.mxu1 }
 0xb05   : > { %v5817_v9 = vpop.f32.mrf.mxu1 }
 0xb07   : > { %v5819_v56 = vpop.f32.mrf.mxu1 }
 0xb08   : > { %v5994_v3 = vpack.c.bf16 %v5819_v56, %v5815_v28  ;;  %v10760_v28 = vld [vmem:[%s12412_s0 + $0x194] ss:$8 sps:$4 sm:$0xff]  }
 0xb09   : > { %v5821_v17 = vpop.f32.mrf.mxu1 }
 0xb0a   : > { %v5995_v48 = vpack.c.bf16 %v5821_v17, %v5817_v9  ;;  %v10758_v17 = vld [vmem:[%s12412_s0 + $0x190] ss:$8 sps:$4 sm:$0xff]  }
 0xb0b   : > { %v5825_v51 = vpop.f32.mrf.mxu1 }
 0xb0c   : > { %9142 = vmatprep.mubr.msk.bf16.mxu0 %vm6151_vm3, %v5995_v48 }
 0xb0d   : > { %v5827_v32 = vpop.f32.mrf.mxu1  ;;  %6191 = vmatmul.mubr.bf16.vlgmr.msra.gmra.mxu0 %v5994_v3 }
 0xb0e   : > { %6358 = vmatpush1.bf16.msra.mxu0 %v10709_v1 }
 0xb0f   : > { %v5829_v25 = vpop.f32.mrf.mxu1  ;;  %6359 = vmatprep.subr.bf16.mxu0 %v10717_v55  ;;  %v10766_v55 = vld [vmem:[%s12412_s0 + $0x184] ss:$8 sps:$4 sm:$0xff]  }
 0xb10   : > { %v5996_v2 = vpack.c.bf16 %v5829_v25, %v5825_v51  ;;  %v10761_v51 = vld [vmem:[%s12412_s0 + $0x390] ss:$8 sps:$4 sm:$0xff]  }
 0xb11   : > { %v5831_v50 = vpop.f32.mrf.mxu1 }
 0xb12   : > { %v5997_v33 = vpack.c.bf16 %v5831_v50, %v5827_v32  ;;  %6360 = vmatpush1.bf16.msra.mxu0 %v10715_v40  ;;  %v10769_v40 = vld [vmem:[%s12412_s0 + $0x384] ss:$8 sps:$4 sm:$0xff]  }
 0xb13   : > { %v5835_v22 = vpop.f32.mrf.mxu1  ;;  %6361 = vmatprep.subr.bf16.mxu0 %v10721_v59  ;;  %v10764_v59 = vld [vmem:[%s12412_s0 + $0x180] ss:$8 sps:$4 sm:$0xff]  }
 0xb14   : > { %9143 = vmatprep.mubr.msk.bf16.mxu0 %vm6151_vm3, %v5997_v33  ;;  %v10767_v33 = vld [vmem:[%s12412_s0 + $0x380] ss:$8 sps:$4 sm:$0xff]  }
 0xb15   : > { %v5837_v5 = vpop.f32.mrf.mxu1  ;;  %6201 = vmatmul.mubr.bf16.gmra.mxu0 %v5996_v2  ;;  %v10775_v2 = vld [vmem:[%s12412_s0 + $0x374] ss:$8 sps:$4 sm:$0xff]  }
 0xb16   : > { %6362 = vmatpush1.bf16.msra.mxu0 %v10719_v57  ;;  %v10772_v57 = vld [vmem:[%s12412_s0 + $0x174] ss:$8 sps:$4 sm:$0xff]  }
 0xb17   : > { %v5839_v35 = vpop.f32.mrf.mxu1  ;;  %6363 = vmatprep.subr.bf16.mxu0 %v10724_v41 }
 0xb18   : > { %v5998_v8 = vpack.c.bf16 %v5839_v35, %v5835_v22  ;;  %v10773_v35 = vld [vmem:[%s12412_s0 + $0x370] ss:$8 sps:$4 sm:$0xff]  }
 0xb19   : > { %v5841_v37 = vpop.f32.mrf.mxu1 }
 0xb1a   : > { %v5999_v45 = vpack.c.bf16 %v5841_v37, %v5837_v5  ;;  %6364 = vmatpush1.bf16.msra.mxu0 %v10722_v27  ;;  %v10770_v27 = vld [vmem:[%s12412_s0 + $0x170] ss:$8 sps:$4 sm:$0xff]   ;;  %v10778_v37 = vld [vmem:[%s12412_s0 + $0x164] ss:$8 sps:$4 sm:$0xff]  }
 0xb1b   : > { %v12992_v53 = vpop.f32.mrf.mxu1  ;;  %6365 = vmatprep.subr.bf16.mxu0 %v10730_v44 }
 0xb1c   : > { %9184 = vmatprep.mubr.msk.bf16.mxu0 %vm6151_vm3, %v5999_v45  ;;  %v10781_v45 = vld [vmem:[%s12412_s0 + $0x364] ss:$8 sps:$4 sm:$0xff]  }
 0xb1d   : > { %v5847_v19 = vpop.f32.mrf.mxu1 }
 0xb1e   : > { %6366 = vmatpush1.bf16.msra.mxu0 %v10728_v43 }
 0xb1f   : > { %v5849_v6 = vpop.f32.mrf.mxu1  ;;  %6367 = vmatprep.subr.bf16.mxu0 %v10733_v54  ;;  %v10779_v54 = vld [vmem:[%s12412_s0 + $0x360] ss:$8 sps:$4 sm:$0xff]  }
 0xb20   : > { %v6000_v48 = vpack.c.bf16 %v5849_v6, %v12992_v53  ;;  %v10776_v53 = vld [vmem:[%s12412_s0 + $0x160] ss:$8 sps:$4 sm:$0xff]   ;;  %v10787_v6 = vld [vmem:[%s12412_s0 + $0x354] ss:$8 sps:$4 sm:$0xff]  }
 0xb21   : > { %v5851_v13 = vpop.f32.mrf.mxu1 }
 0xb22   : > { %6368 = vmatpush1.bf16.msra.mxu0 %v10731_v24  ;;  %v6001_v15 = vpack.c.bf16 %v5851_v13, %v5847_v19  ;;  %v10784_v24 = vld [vmem:[%s12412_s0 + $0x154] ss:$8 sps:$4 sm:$0xff]   ;;  %v10782_v13 = vld [vmem:[%s12412_s0 + $0x150] ss:$8 sps:$4 sm:$0xff]  }
 0xb23   : > { %v12999_v49 = vpop.f32.mrf.mxu1  ;;  %6369 = vmatprep.subr.bf16.mxu0 %v10736_v11 }
 0xb25   : > { %v5857_v52 = vpop.f32.mrf.mxu1 }
 0xb26   : > { %6370 = vmatpush1.bf16.msra.mxu0 %v10734_v16  ;;  %v10785_v16 = vld [vmem:[%s12412_s0 + $0x350] ss:$8 sps:$4 sm:$0xff]  }
 0xb27   : > { %v13003_v4 = vpop.f32.mrf.mxu1  ;;  %6371 = vmatprep.subr.bf16.mxu0 %v10739_v21 }
 0xb29   : > { %v5861_v38 = vpop.f32.mrf.mxu1 }
 0xb2a   : > { %6372 = vmatpush1.bf16.msra.mxu0 %v10737_v58  ;;  %v6003_v32 = vpack.c.bf16 %v5861_v38, %v5857_v52  ;;  %v10790_v52 = vld [vmem:[%s12412_s0 + $0x144] ss:$8 sps:$4 sm:$0xff]   ;;  %v10788_v38 = vld [vmem:[%s12412_s0 + $0x140] ss:$8 sps:$4 sm:$0xff]  }
 0xb2b   : > { %v13007_v20 = vpop.f32.mrf.mxu1  ;;  %6385 = vmatprep.subr.bf16.mxu0 %v10745_v46  ;;  %v10793_v58 = vld [vmem:[%s12412_s0 + $0x344] ss:$8 sps:$4 sm:$0xff]  }
 0xb2d   : > { %v13010_v10 = vpop.f32.mrf.mxu1 }
 0xb2e   : > { %6386 = vmatpush2.bf16.msra.mxu0 %v10743_v62  ;;  %v10791_v62 = vld [vmem:[%s12412_s0 + $0x340] ss:$8 sps:$4 sm:$0xff]  }
 0xb2f   : > { %v13013_v31 = vpop.f32.mrf.mxu1  ;;  %6387 = vmatprep.subr.bf16.mxu0 %v10748_v34 }
 0xb31   : > { %v13016_v39 = vpop.f32.mrf.mxu1 }
 0xb32   : > { %6388 = vmatpush2.bf16.msra.mxu0 %v10746_v63  ;;  %v10796_v63 = vld [vmem:[%s12412_s0 + $0x1d4] ss:$8 sps:$4 sm:$0xff]  }
 0xb33   : > { %v5875_v42 = vpop.f32.mrf.mxu1  ;;  %6545 = vmatprep.subr.bf16.mxu0 %v10751_v18  ;;  %v10799_v18 = vld [vmem:[%s12412_s0 + $0x334] ss:$8 sps:$4 sm:$0xff]  }
 0xb35   : > { %6390 = vmatmul.mubr.bf16.vlgmr.msra.gmra.mxu0 %v5998_v8  ;;  %v5877_v30 = vpop.f32.mrf.mxu1  ;;  %v10794_v8 = vld [vmem:[%s12412_s0 + $0x1d0] ss:$8 sps:$4 sm:$0xff]  }
 0xb36   : > { %9185 = vmatprep.mubr.msk.bf16.mxu0 %vm6151_vm3, %v6001_v15  ;;  %6546 = vmatpush1.bf16.msra.mxu0 %v10749_v23  ;;  %v10802_v15 = vld [vmem:[%s12412_s0 + $0x1c4] ss:$8 sps:$4 sm:$0xff]  }
 0xb37   : > { %v5879_v7 = vpop.f32.mrf.mxu1  ;;  %6547 = vmatprep.subr.bf16.mxu0 %v10757_v12 }
 0xb38   : > { %v6006_v1 = vpack.c.bf16 %v5879_v7, %v5875_v42  ;;  %v10797_v42 = vld [vmem:[%s12412_s0 + $0x330] ss:$8 sps:$4 sm:$0xff]   ;;  %v10800_v7 = vld [vmem:[%s12412_s0 + $0x1c0] ss:$8 sps:$4 sm:$0xff]  }
 0xb39   : > { %v5881_v9 = vpop.f32.mrf.mxu1 }
 0xb3a   : > { %v6007_v56 = vpack.c.bf16 %v5881_v9, %v5877_v30  ;;  %6548 = vmatpush1.bf16.msra.mxu0 %v10755_v61  ;;  %v10805_v30 = vld [vmem:[%s12412_s0 + $0x324] ss:$8 sps:$4 sm:$0xff]  }
 0xb3b   : > { %v5885_v3 = vpop.f32.mrf.mxu1  ;;  %6549 = vmatprep.subr.bf16.mxu0 %v10760_v28  ;;  %v10803_v28 = vld [vmem:[%s12412_s0 + $0x320] ss:$8 sps:$4 sm:$0xff]  }
 0xb3c   : > { %9268 = vmatprep.mubr.msk.bf16.mxu1 %vm6151_vm3, %v6007_v56  ;;  %v10808_v56 = vld [vmem:[%s12412_s0 + $0x2f4] ss:$8 sps:$4 sm:$0xff]  }
 0xb3d   : > { %6400 = vmatmul.mubr.bf16.gmra.mxu0 %v6000_v48  ;;  %v5887_v25 = vpop.f32.mrf.mxu1  ;;  %6766 = vmatmul.mubr.bf16.vlgmr.msra.gmra.mxu1 %v6006_v1 }
 0xb3e   : > { %6550 = vmatpush1.bf16.msra.mxu0 %v10758_v17  ;;  %9226 = vmatprep.mubr.msk.bf16.mxu0 %vm6151_vm3, %v6003_v32  ;;  %v10811_v17 = vld [vmem:[%s12412_s0 + $0x3b4] ss:$8 sps:$4 sm:$0xff]   ;;  %v10814_v32 = vld [vmem:[%s12412_s0 + $0x2e4] ss:$8 sps:$4 sm:$0xff]  }
 0xb3f   : > { %7110 = vmatpush1.bf16.msra.mxu1 %v10761_v51  ;;  %v5889_v50 = vpop.f32.mrf.mxu1  ;;  %6551 = vmatprep.subr.bf16.mxu0 %v10766_v55  ;;  %v6002_v51 = vpack.c.bf16 %v13003_v4, %v12999_v49  ;;  %v10809_v55 = vld [vmem:[%s12412_s0 + $0x3b0] ss:$8 sps:$4 sm:$0xff]   ;;  %v10812_v49 = vld [vmem:[%s12412_s0 + $0x2e0] ss:$8 sps:$4 sm:$0xff]  }
 0xb40   : > { %7111 = vmatprep.subr.bf16.mxu1 %v10769_v40  ;;  %v6008_v22 = vpack.c.bf16 %v5889_v50, %v5885_v3  ;;  %v10806_v3 = vld [vmem:[%s12412_s0 + $0x2f0] ss:$8 sps:$4 sm:$0xff]   ;;  %v10815_v4 = vld [vmem:[%s12412_s0 + $0x3a0] ss:$8 sps:$4 sm:$0xff]  }
 0xb41   : > { %v5891_v41 = vpop.f32.mrf.mxu1 }
 0xb42   : > { %v6009_v5 = vpack.c.bf16 %v5891_v41, %v5887_v25  ;;  %6552 = vmatpush1.bf16.msra.mxu0 %v10764_v59  ;;  %v6005_v25 = vpack.c.bf16 %v13016_v39, %v13010_v10  ;;  %v10817_v59 = vld [vmem:[%s12412_s0 + $0x3a4] ss:$8 sps:$4 sm:$0xff]   ;;  %v10823_v10 = vld [vmem:[%s12412_s0 + $0x4d4] ss:$8 sps:$4 sm:$0xff]   ;;  %v10821_v41 = vld [vmem:[%s12412_s0 + $0x4d0] ss:$8 sps:$4 sm:$0xff]  }
 0xb43   : > { %7112 = vmatpush1.bf16.msra.mxu1 %v10767_v33  ;;  %6553 = vmatprep.subr.bf16.mxu0 %v10772_v57  ;;  %v13036_v44 = vpop.f32.mrf.mxu1  ;;  %v10820_v33 = vld [vmem:[%s12412_s0 + $0x2d4] ss:$8 sps:$4 sm:$0xff]  }
 0xb44   : > { %9269 = vmatprep.mubr.msk.bf16.mxu1 %vm6151_vm3, %v6009_v5  ;;  %7113 = vmatprep.subr.bf16.mxu1 %v10775_v2  ;;  %v10818_v2 = vld [vmem:[%s12412_s0 + $0x2d0] ss:$8 sps:$4 sm:$0xff]  }
 0xb45   : > { %6776 = vmatmul.mubr.bf16.gmra.mxu1 %v6008_v22  ;;  %v13041_v43 = vpop.f32.mrf.mxu1  ;;  %v6004_v22 = vpack.c.bf16 %v13013_v31, %v13007_v20  ;;  %v10824_v20 = vld [vmem:[%s12412_s0 + $0x2c0] ss:$8 sps:$4 sm:$0xff]  }
 0xb46   : > { %6554 = vmatpush1.bf16.msra.mxu0 %v10770_v27  ;;  %v10827_v31 = vld [vmem:[%s12412_s0 + $0x4c0] ss:$8 sps:$4 sm:$0xff]  }
 0xb47   : > { %7114 = vmatpush1.bf16.msra.mxu1 %v10773_v35  ;;  %6555 = vmatprep.subr.bf16.mxu0 %v10778_v37  ;;  %v13045_v19 = vpop.f32.mrf.mxu1  ;;  %v10826_v35 = vld [vmem:[%s12412_s0 + $0x2c4] ss:$8 sps:$4 sm:$0xff]  }
 0xb48   : > { %7115 = vmatprep.subr.bf16.mxu1 %v10781_v45  ;;  %v10829_v37 = vld [vmem:[%s12412_s0 + $0x4c4] ss:$8 sps:$4 sm:$0xff]  }
 0xb49   : > { %v13049_v11 = vpop.f32.mrf.mxu1 }
 0xb4a   : > { %6556 = vmatpush1.bf16.msra.mxu0 %v10776_v53  ;;  %v6011_v45 = vpack.c.bf16 %v13049_v11, %v13041_v43  ;;  %v10835_v43 = vld [vmem:[%s12412_s0 + $0x4b4] ss:$8 sps:$4 sm:$0xff]  }
 0xb4b   : > { %7116 = vmatpush1.bf16.msra.mxu1 %v10779_v54  ;;  %6557 = vmatprep.subr.bf16.mxu0 %v10784_v24  ;;  %v13053_v21 = vpop.f32.mrf.mxu1  ;;  %v10832_v24 = vld [vmem:[%s12412_s0 + $0x2b4] ss:$8 sps:$4 sm:$0xff]  }
 0xb4c   : > { %7117 = vmatprep.subr.bf16.mxu1 %v10787_v6 }
 0xb4d   : > { %v13057_v46 = vpop.f32.mrf.mxu1 }
 0xb4e   : > { %6558 = vmatpush1.bf16.msra.mxu0 %v10782_v13 }
 0xb4f   : > { %7118 = vmatpush1.bf16.msra.mxu1 %v10785_v16  ;;  %6559 = vmatprep.subr.bf16.mxu0 %v10790_v52  ;;  %v13061_v34 = vpop.f32.mrf.mxu1  ;;  %v10830_v52 = vld [vmem:[%s12412_s0 + $0x2b0] ss:$8 sps:$4 sm:$0xff]  }
 0xb50   : > { %7119 = vmatprep.subr.bf16.mxu1 %v10793_v58  ;;  %v10833_v58 = vld [vmem:[%s12412_s0 + $0x4b0] ss:$8 sps:$4 sm:$0xff]  }
 0xb51   : > { %v13065_v23 = vpop.f32.mrf.mxu1 }
 0xb52   : > { %6560 = vmatpush1.bf16.msra.mxu0 %v10788_v38  ;;  %v10838_v38 = vld [vmem:[%s12412_s0 + $0x2a4] ss:$8 sps:$4 sm:$0xff]  }
 0xb53   : > { %7120 = vmatpush1.bf16.msra.mxu1 %v10791_v62  ;;  %6573 = vmatprep.subr.bf16.mxu0 %v10796_v63  ;;  %v5915_v12 = vpop.f32.mrf.mxu1  ;;  %v10841_v63 = vld [vmem:[%s12412_s0 + $0x4a4] ss:$8 sps:$4 sm:$0xff]  }
 0xb54   : > { %7121 = vmatprep.subr.bf16.mxu1 %v10799_v18 }
 0xb55   : > { %v5917_v61 = vpop.f32.mrf.mxu1 }
 0xb56   : > { %6574 = vmatpush2.bf16.msra.mxu0 %v10794_v8  ;;  %v10836_v8 = vld [vmem:[%s12412_s0 + $0x2a0] ss:$8 sps:$4 sm:$0xff]  }
 0xb57   : > { %7122 = vmatpush1.bf16.msra.mxu1 %v10797_v42  ;;  %6575 = vmatprep.subr.bf16.mxu0 %v10802_v15  ;;  %v5919_v9 = vpop.f32.mrf.mxu1  ;;  %v10839_v42 = vld [vmem:[%s12412_s0 + $0x4a0] ss:$8 sps:$4 sm:$0xff]  }
 0xb58   : > { %7123 = vmatprep.subr.bf16.mxu1 %v10805_v30  ;;  %v6014_v27 = vpack.c.bf16 %v5919_v9, %v5915_v12  ;;  %v10844_v12 = vld [vmem:[%s12412_s0 + $0x294] ss:$8 sps:$4 sm:$0xff]   ;;  %v10845_v9 = vld [vmem:[%s12412_s0 + $0x490] ss:$8 sps:$4 sm:$0xff]  }
 0xb59   : > { %v5921_v48 = vpop.f32.mrf.mxu1  ;;  %v10847_v30 = vld [vmem:[%s12412_s0 + $0x494] ss:$8 sps:$4 sm:$0xff]  }
 0xb5a   : > { %6576 = vmatpush2.bf16.msra.mxu0 %v10800_v7  ;;  %v6015_v1 = vpack.c.bf16 %v5921_v48, %v5917_v61  ;;  %v10853_v48 = vld [vmem:[%s12412_s0 + $0x484] ss:$8 sps:$4 sm:$0xff]  }
 0xb5b   : > { %7124 = vmatpush1.bf16.msra.mxu1 %v10803_v28  ;;  %6921 = vmatprep.subr.bf16.mxu0 %v10808_v56  ;;  %v5925_v40 = vpop.f32.mrf.mxu1  ;;  %v10842_v28 = vld [vmem:[%s12412_s0 + $0x290] ss:$8 sps:$4 sm:$0xff]   ;;  %v10850_v56 = vld [vmem:[%s12412_s0 + $0x284] ss:$8 sps:$4 sm:$0xff]  }
 0xb5c   : > { %7137 = vmatprep.subr.bf16.mxu1 %v10811_v17  ;;  %9352 = vmatprep.mubr.msk.bf16.mxu1 %vm6151_vm3, %v6015_v1 }
 0xb5d   : > { %6578 = vmatmul.mubr.bf16.vlgmr.msra.gmra.mxu0 %v6002_v51  ;;  %v5927_v50 = vpop.f32.mrf.mxu1  ;;  %v10851_v51 = vld [vmem:[%s12412_s0 + $0x480] ss:$8 sps:$4 sm:$0xff]  }
 0xb5e   : > { %9227 = vmatprep.mubr.msk.bf16.mxu0 %vm6151_vm3, %v6005_v25  ;;  %6922 = vmatpush1.bf16.msra.mxu0 %v10806_v3  ;;  %v10848_v3 = vld [vmem:[%s12412_s0 + $0x280] ss:$8 sps:$4 sm:$0xff]  }
 0xb5f   : > { %7138 = vmatpush2.bf16.msra.mxu1 %v10809_v55  ;;  %6923 = vmatprep.subr.bf16.mxu0 %v10814_v32  ;;  %v5929_v57 = vpop.f32.mrf.mxu1  ;;  %v10856_v55 = vld [vmem:[%s12412_s0 + $0x314] ss:$8 sps:$4 sm:$0xff]  }
 0xb60   : > { %7139 = vmatprep.subr.bf16.mxu1 %v10817_v59  ;;  %v6016_v16 = vpack.c.bf16 %v5929_v57, %v5925_v40  ;;  %v10859_v40 = vld [vmem:[%s12412_s0 + $0x474] ss:$8 sps:$4 sm:$0xff]   ;;  %v10854_v59 = vld [vmem:[%s12412_s0 + $0x310] ss:$8 sps:$4 sm:$0xff]  }
 0xb61   : > { %v5931_v39 = vpop.f32.mrf.mxu1 }
 0xb62   : > { %6924 = vmatpush1.bf16.msra.mxu0 %v10812_v49  ;;  %v6017_v53 = vpack.c.bf16 %v5931_v39, %v5927_v50  ;;  %v10857_v49 = vld [vmem:[%s12412_s0 + $0x470] ss:$8 sps:$4 sm:$0xff]   ;;  %v10863_v39 = vld [vmem:[%s12412_s0 + $0x460] ss:$8 sps:$4 sm:$0xff]  }
 0xb63   : > { %7140 = vmatpush2.bf16.msra.mxu1 %v10815_v4  ;;  %6925 = vmatprep.subr.bf16.mxu0 %v10820_v33  ;;  %v13093_v5 = vpop.f32.mrf.mxu1  ;;  %v10862_v4 = vld [vmem:[%s12412_s0 + $0x304] ss:$8 sps:$4 sm:$0xff]  }
 0xb64   : > { %7485 = vmatprep.subr.bf16.mxu1 %v10823_v10  ;;  %v10865_v33 = vld [vmem:[%s12412_s0 + $0x464] ss:$8 sps:$4 sm:$0xff]   ;;  %v10860_v10 = vld [vmem:[%s12412_s0 + $0x300] ss:$8 sps:$4 sm:$0xff]  }
 0xb65   : > { %6588 = vmatmul.mubr.bf16.gmra.mxu0 %v6004_v22  ;;  %v13099_v54 = vpop.f32.mrf.mxu1  ;;  %v10871_v22 = vld [vmem:[%s12412_s0 + $0x4f4] ss:$8 sps:$4 sm:$0xff]  }
 0xb66   : > { %7142 = vmatmul.mubr.bf16.vlgmr.msra.gmra.mxu1 %v6014_v27  ;;  %6926 = vmatpush1.bf16.msra.mxu0 %v10818_v2  ;;  %v10868_v2 = vld [vmem:[%s12412_s0 + $0x434] ss:$8 sps:$4 sm:$0xff]   ;;  %v10866_v27 = vld [vmem:[%s12412_s0 + $0x430] ss:$8 sps:$4 sm:$0xff]  }
 0xb67   : > { %9310 = vmatprep.mubr.msk.bf16.mxu0 %vm6151_vm3, %v6011_v45  ;;  %7486 = vmatpush1.bf16.msra.mxu1 %v10821_v41  ;;  %v13105_v6 = vpop.f32.mrf.mxu1  ;;  %v10874_v45 = vld [vmem:[%s12412_s0 + $0x424] ss:$8 sps:$4 sm:$0xff]  }
 0xb68   : > { %6927 = vmatprep.subr.bf16.mxu0 %v10826_v35  ;;  %7487 = vmatprep.subr.bf16.mxu1 %v10829_v37  ;;  %v6018_v11 = vpack.c.bf16 %v13105_v6, %v13093_v5  ;;  %v6010_v35 = vpack.c.bf16 %v13045_v19, %v13036_v44  ;;  %v10869_v37 = vld [vmem:[%s12412_s0 + $0x4f0] ss:$8 sps:$4 sm:$0xff]   ;;  %v10875_v44 = vld [vmem:[%s12412_s0 + $0x4e0] ss:$8 sps:$4 sm:$0xff]   ;;  %v10880_v19 = vld [vmem:[%s12412_s0 + $0x414] ss:$8 sps:$4 sm:$0xff]  }
 0xb69   : > { %9353 = vmatprep.mubr.msk.bf16.mxu1 %vm6151_vm3, %v6017_v53  ;;  %v13111_v13 = vpop.f32.mrf.mxu1  ;;  %v6013_v53 = vpack.c.bf16 %v13065_v23, %v13057_v46  ;;  %v6012_v46 = vpack.c.bf16 %v13061_v34, %v13053_v21  ;;  %v10886_v21 = vld [vmem:[%s12412_s0 + $0x3f4] ss:$8 sps:$4 sm:$0xff]   ;;  %v10884_v34 = vld [vmem:[%s12412_s0 + $0x3f0] ss:$8 sps:$4 sm:$0xff]   ;;  %v10913_v5 = vld [vmem:[%s12412_s0 + $0x540] ss:$8 sps:$4 sm:$0xff]  }
 0xb6a   : > { %6928 = vmatpush1.bf16.msra.mxu0 %v10824_v20  ;;  %v10918_v6 = vld [vmem:[%s12412_s0 + $0x534] ss:$8 sps:$4 sm:$0xff]  }
 0xb6b   : > { %7488 = vmatpush1.bf16.msra.mxu1 %v10827_v31  ;;  %6929 = vmatprep.subr.bf16.mxu0 %v10832_v24  ;;  %v13116_v62 = vpop.f32.mrf.mxu1  ;;  %v10877_v31 = vld [vmem:[%s12412_s0 + $0x4e4] ss:$8 sps:$4 sm:$0xff]   ;;  %v10872_v24 = vld [vmem:[%s12412_s0 + $0x420] ss:$8 sps:$4 sm:$0xff]  }
 0xb6c   : > { %7489 = vmatprep.subr.bf16.mxu1 %v10835_v43 }
 0xb6d   : > { %v13119_v18 = vpop.f32.mrf.mxu1 }
 0xb6e   : > { %7152 = vmatmul.mubr.bf16.gmra.mxu1 %v6016_v16  ;;  %6930 = vmatpush1.bf16.msra.mxu0 %v10830_v52  ;;  %v10878_v16 = vld [vmem:[%s12412_s0 + $0x410] ss:$8 sps:$4 sm:$0xff]  }
 0xb6f   : > { %7490 = vmatpush1.bf16.msra.mxu1 %v10833_v58  ;;  %6931 = vmatprep.subr.bf16.mxu0 %v10838_v38  ;;  %v13124_v15 = vpop.f32.mrf.mxu1  ;;  %v10883_v58 = vld [vmem:[%s12412_s0 + $0x404] ss:$8 sps:$4 sm:$0xff]   ;;  %v6019_v38 = vpack.c.bf16 %v13111_v13, %v13099_v54 }
 0xb70   : > { %7491 = vmatprep.subr.bf16.mxu1 %v10841_v63  ;;  %v6020_v61 = vpack.c.bf16 %v13124_v15, %v13116_v62  ;;  %v10881_v63 = vld [vmem:[%s12412_s0 + $0x400] ss:$8 sps:$4 sm:$0xff]   ;;  %v10889_v54 = vld [vmem:[%s12412_s0 + $0x3e4] ss:$8 sps:$4 sm:$0xff]   ;;  %v10924_v62 = vld [vmem:[%s12412_s0 + $0x514] ss:$8 sps:$4 sm:$0xff]  }
 0xb71   : > { %v13129_v7 = vpop.f32.mrf.mxu1  ;;  %v10890_v13 = vld [vmem:[#allocation24] sm:$0xff]   ;;  %v10922_v15 = vld [vmem:[%s12412_s0 + $0x510] ss:$8 sps:$4 sm:$0xff]  }
 0xb72   : > { %6932 = vmatpush1.bf16.msra.mxu0 %v10836_v8 }
 0xb73   : > { %7492 = vmatpush1.bf16.msra.mxu1 %v10839_v42  ;;  %6933 = vmatprep.subr.bf16.mxu0 %v10844_v12  ;;  %v13134_v17 = vpop.f32.mrf.mxu1  ;;  %v10893_v42 = vld [vmem:[%s12412_s0 + $0x3d4] ss:$8 sps:$4 sm:$0xff]   ;;  %v10891_v12 = vld [vmem:[%s12412_s0 + $0x3d0] ss:$8 sps:$4 sm:$0xff]  }
 0xb74   : > { %7493 = vmatprep.subr.bf16.mxu1 %v10847_v30  ;;  %v10897_v30 = vld [vmem:[%s12412_s0 + $0x3c4] ss:$8 sps:$4 sm:$0xff]  }
 0xb75   : > { %v5957_v1 = vpop.f32.mrf.mxu1 }
 0xb76   : > { %6934 = vmatpush1.bf16.msra.mxu0 %v10842_v28  ;;  %v10895_v28 = vld [vmem:[%s12412_s0 + $0x3c0] ss:$8 sps:$4 sm:$0xff]  }
 0xb77   : > { %7494 = vmatpush1.bf16.msra.mxu1 %v10845_v9  ;;  %6935 = vmatprep.subr.bf16.mxu0 %v10850_v56  ;;  %v5959_v32 = vpop.f32.mrf.mxu1  ;;  %v10898_v9 = vld [vmem:[%s12412_s0 + $0x450] ss:$8 sps:$4 sm:$0xff]   ;;  %v10903_v56 = vld [vmem:[%s12412_s0 + $0x444] ss:$8 sps:$4 sm:$0xff]  }
 0xb78   : > { %7495 = vmatprep.subr.bf16.mxu1 %v10853_v48  ;;  %v6022_v52 = vpack.c.bf16 %v5959_v32, %v13134_v17  ;;  %v10901_v48 = vld [vmem:[%s12412_s0 + $0x440] ss:$8 sps:$4 sm:$0xff]   ;;  %v6021_v32 = vpack.c.bf16 %v13129_v7, %v13119_v18  ;;  %v10915_v18 = vld [vmem:[%s12412_s0 + $0x544] ss:$8 sps:$4 sm:$0xff]  }
 0xb79   : > { %v5961_v25 = vpop.f32.mrf.mxu1  ;;  %v10921_v7 = vld [vmem:[%s12412_s0 + $0x524] ss:$8 sps:$4 sm:$0xff]  }
 0xb7a   : > { %6936 = vmatpush1.bf16.msra.mxu0 %v10848_v3  ;;  %v6023_v50 = vpack.c.bf16 %v5961_v25, %v5957_v1  ;;  %v10904_v3 = vld [vmem:[%s12412_s0 + $0x570] ss:$8 sps:$4 sm:$0xff]   ;;  %v10912_v25 = vld [vmem:[%s12412_s0 + $0x554] ss:$8 sps:$4 sm:$0xff]  }
 0xb7b   : > { %7496 = vmatpush1.bf16.msra.mxu1 %v10851_v51  ;;  %6949 = vmatprep.subr.bf16.mxu0 %v10856_v55  ;;  %v5965_v57 = vpop.f32.mrf.mxu1  ;;  %v10909_v51 = vld [vmem:[%s12412_s0 + $0x564] ss:$8 sps:$4 sm:$0xff]  }
 0xb7c   : > { %7497 = vmatprep.subr.bf16.mxu1 %v10859_v40  ;;  %9436 = vmatprep.mubr.msk.bf16.mxu1 %vm6151_vm3, %v6023_v50  ;;  %v10907_v40 = vld [vmem:[%s12412_s0 + $0x560] ss:$8 sps:$4 sm:$0xff]   ;;  %v10910_v50 = vld [vmem:[%s12412_s0 + $0x550] ss:$8 sps:$4 sm:$0xff]  }
 0xb7d   : > { %v5967_v41 = vpop.f32.mrf.mxu1 }
 0xb7e   : > { %6950 = vmatpush2.bf16.msra.mxu0 %v10854_v59 }
 0xb7f   : > { %7498 = vmatpush1.bf16.msra.mxu1 %v10857_v49  ;;  %6951 = vmatprep.subr.bf16.mxu0 %v10862_v4  ;;  %v5969_v20 = vpop.f32.mrf.mxu1  ;;  %v10919_v4 = vld [vmem:[%s12412_s0 + $0x520] ss:$8 sps:$4 sm:$0xff]  }
 0xb80   : > { %7499 = vmatprep.subr.bf16.mxu1 %v10865_v33  ;;  %v6024_v8 = vpack.c.bf16 %v5969_v20, %v5965_v57  ;;  %v10925_v57 = vld [vmem:[%s12412_s0 + $0x500] ss:$8 sps:$4 sm:$0xff]  }
 0xb81   : > { %v5971_v43 = vpop.f32.mrf.mxu1  ;;  %v10936_v20 = vld [vmem:[%s12431_s23 + $0x44] ss:$8 sps:$4 sm:$0xff]  }
 0xb82   : > { %6952 = vmatpush2.bf16.msra.mxu0 %v10860_v10  ;;  %v6025_v23 = vpack.c.bf16 %v5971_v43, %v5967_v41  ;;  %v10930_v10 = vld [vmem:[%s12412_s0 + $0x594] ss:$8 sps:$4 sm:$0xff]  }
 0xb83   : > { %7500 = vmatpush1.bf16.msra.mxu1 %v10863_v39  ;;  %7297 = vmatprep.subr.bf16.mxu0 %v10868_v2  ;;  %v13193_v17 = vpop.f32.mrf.mxu1  ;;  %v10928_v2 = vld [vmem:[%s12412_s0 + $0x590] ss:$8 sps:$4 sm:$0xff]   ;;  %v10940_v43 = vld [vmem:[%s12431_s23 + $0x20] ss:$8 sps:$4 sm:$0xff]  }
 0xb84   : > { %7513 = vmatprep.subr.bf16.mxu1 %v10871_v22  ;;  %v10933_v22 = vld [vmem:[%s12412_s0 + $0x584] ss:$8 sps:$4 sm:$0xff]  }
 0xb85   : > { %6954 = vmatmul.mubr.bf16.vlgmr.msra.gmra.mxu0 %v6010_v35  ;;  %v5977_v1 = vpop.f32.mrf.mxu1 }
 0xb86   : > { %9311 = vmatprep.mubr.msk.bf16.mxu0 %vm6151_vm3, %v6013_v53  ;;  %7298 = vmatpush1.bf16.msra.mxu0 %v10866_v27  ;;  %v10931_v27 = vld [vmem:[%s12412_s0 + $0x580] ss:$8 sps:$4 sm:$0xff]   ;;  %v10934_v53 = vld [vmem:[%s12431_s23 + $0x40] ss:$8 sps:$4 sm:$0xff]  }
 0xb87   : > { %7514 = vmatpush2.bf16.msra.mxu1 %v10869_v37  ;;  %7299 = vmatprep.subr.bf16.mxu0 %v10874_v45  ;;  %v5979_v55 = vpop.f32.mrf.mxu1 }
 0xb88   : > { %7515 = vmatprep.subr.bf16.mxu1 %v10877_v31  ;;  %v6026_v37 = vpack.c.bf16 %v5979_v55, %v13193_v17  ;;  %v10937_v31 = vld [vmem:[%s12431_s23 + $0x30] ss:$8 sps:$4 sm:$0xff]  }
 0xb89   : > { %v5981_v59 = vpop.f32.mrf.mxu1 }
 0xb8a   : > { %7300 = vmatpush1.bf16.msra.mxu0 %v10872_v24  ;;  %v6027_v49 = vpack.c.bf16 %v5981_v59, %v5977_v1  ;;  %v10939_v24 = vld [vmem:[%s12431_s23 + $0x34] ss:$8 sps:$4 sm:$0xff]  }
 0xb8b   : > { %7516 = vmatpush2.bf16.msra.mxu1 %v10875_v44  ;;  %7301 = vmatprep.subr.bf16.mxu0 %v10880_v19  ;;  %v5985_v33 = vpop.f32.mrf.mxu1 }
 0xb8c   : > { %10303 = vmatprep.subr.bf16.mxu1 %v12880_v14 }
 0xb8d   : > { %6964 = vmatmul.mubr.bf16.gmra.mxu0 %v6012_v46  ;;  %v5987_v39 = vpop.f32.mrf.mxu1 }
 0xb8e   : > { %7518 = vmatmul.mubr.bf16.vlgmr.msra.gmra.mxu1 %v6022_v52  ;;  %7302 = vmatpush1.bf16.msra.mxu0 %v10878_v16  ;;  %v10942_v16 = vld [vmem:[%s12431_s23 + $0x24] ss:$8 sps:$4 sm:$0xff]  }
 0xb8f   : > { %9394 = vmatprep.mubr.msk.bf16.mxu0 %vm6151_vm3, %v6019_v38  ;;  %9437 = vmatprep.mubr.msk.bf16.mxu1 %vm6151_vm3, %v6025_v23  ;;  %v5989_v41 = vpop.f32.mrf.mxu1  ;;  %v10945_v23 = vld [vmem:[%s12431_s23 + $0x14] ss:$8 sps:$4 sm:$0xff]   ;;  %v10948_v38 = vld [vmem:[%s12431_s23 + $0x4] ss:$8 sps:$4 sm:$0xff]  }
 0xb90   : > { %10304 = vmatpush3.bf16.msra.mxu1 %v12880_v14  ;;  %7303 = vmatprep.subr.bf16.mxu0 %v10883_v58  ;;  %v10887_v14 = vld [vmem:[%s12412_s0 + $0x3e0] ss:$8 sps:$4 sm:$0xff]   ;;  %v6028_v19 = vpack.c.bf16 %v5989_v41, %v5985_v33  ;;  %v10943_v58 = vld [vmem:[%s12431_s23 + $0x10] ss:$8 sps:$4 sm:$0xff]  }
 0xb91   : > { %10305 = vmatprep.subr.bf16.mxu1 %v12889_v29  ;;  %v5991_v35 = vpop.f32.mrf.mxu1 }
 0xb92   : > { %7304 = vmatpush1.bf16.msra.mxu0 %v10881_v63  ;;  %v6029_v45 = vpack.c.bf16 %v5991_v35, %v5987_v39 }
 0xb93   : > { %7305 = vmatprep.subr.bf16.mxu0 %v10886_v21  ;;  %v10946_v21 = vld [vmem:[%s12431_s23] ss:$8 sps:$4 sm:$0xff]   ;;  %s13497_s23 = sld [smem:[#allocation74_spill]] }
 0xb94   : > { %10306 = vmatpush3.bf16.msra.mxu1 %v12889_v29  ;;  %v10894_v29 = vld [vmem:[#allocation24 + $0x8] sm:$0xff]  }
 0xb95   : > { %10307 = vmatprep.subr.bf16.mxu1 %v12868_v0 }
 0xb96   : > { %7528 = vmatmul.mubr.bf16.gmra.mxu1 %v6024_v8  ;;  %7306 = vmatpush1.bf16.msra.mxu0 %v10884_v34 }
 0xb97   : > { %7307 = vmatprep.subr.bf16.mxu0 %v10889_v54  ;;  %10311 = vmatprep.mubr.msk.bf16.mxu1 %vm1350_vm0, %v10890_v13  ;;  %v6030_v13 = vld [vmem:[%s13495_s18] sm:$0x3] }
 0xb98   : > { %10308 = vmatpush3.bf16.msra.mxu1 %v12868_v0  ;;  %v10900_v0 = vld [vmem:[%s12412_s0 + $0x454] ss:$8 sps:$4 sm:$0xff]  }
 0xb99   : > { %10309 = vmatprep.subr.bf16.mxu1 %v12871_v26 }
 0xb9a   : > { %7308 = vmatpush1.bf16.msra.mxu0 %v10887_v14  ;;  %v6215_v14 = vrot.slane %v6030_v13, %v12896_v60 }
 0xb9b   : > { %7309 = vmatprep.subr.bf16.mxu0 %v10893_v42  ;;  %v6219_v42 = vrot.slane %v6030_v13, %v12898_v47 }
 0xb9c   : > { %10310 = vmatpush3.bf16.msra.mxu1 %v12871_v26  ;;  %v10906_v26 = vld [vmem:[%s12412_s0 + $0x574] ss:$8 sps:$4 sm:$0xff]  }
 0xb9e   : > { %7310 = vmatpush1.bf16.msra.mxu0 %v10891_v12 }
 0xb9f   : > { %10312 = vmatmul.mubr.msk.bf16.vlgmr.msra.gmra.mxu1 %vm1350_vm0, %v10894_v29  ;;  %7311 = vmatprep.subr.bf16.mxu0 %v10897_v30 }
 0xba2   : > { %7312 = vmatpush1.bf16.msra.mxu0 %v10895_v28 }
 0xba3   : > { %7325 = vmatprep.subr.bf16.mxu0 %v10900_v0 }
 0xba6   : > { %7326 = vmatpush2.bf16.msra.mxu0 %v10898_v9 }
 0xba7   : > { %7327 = vmatprep.subr.bf16.mxu0 %v10903_v56 }
 0xbaa   : > { %7328 = vmatpush2.bf16.msra.mxu0 %v10901_v48 }
 0xbab   : > { %7673 = vmatprep.subr.bf16.mxu0 %v10906_v26 }
 0xbad   : > { %7330 = vmatmul.mubr.bf16.vlgmr.msra.gmra.mxu0 %v6018_v11  ;;  %v10916_v11 = vld [vmem:[%s12412_s0 + $0x530] ss:$8 sps:$4 sm:$0xff]  }
 0xbae   : > { %9395 = vmatprep.mubr.msk.bf16.mxu0 %vm6151_vm3, %v6021_v32  ;;  %7674 = vmatpush1.bf16.msra.mxu0 %v10904_v3 }
 0xbaf   : > { %7675 = vmatprep.subr.bf16.mxu0 %v10909_v51 }
 0xbb2   : > { %7676 = vmatpush1.bf16.msra.mxu0 %v10907_v40 }
 0xbb3   : > { %7677 = vmatprep.subr.bf16.mxu0 %v10912_v25 }
 0xbb5   : > { %7340 = vmatmul.mubr.bf16.gmra.mxu0 %v6020_v61  ;;  %v10927_v61 = vld [vmem:[%s12412_s0 + $0x504] ss:$8 sps:$4 sm:$0xff]   ;;  %s8579_s0 = sshll.u32 %s13503_s1, 1 }
 0xbb6   : > { %7678 = vmatpush1.bf16.msra.mxu0 %v10910_v50  ;;  %9478 = vmatprep.mubr.msk.bf16.mxu0 %vm6151_vm3, %v6027_v49  ;;  %s1308_s20 = scalar_lea.vmem %s13497_s23, %s8579_s0 }
 0xbb7   : > { %7679 = vmatprep.subr.bf16.mxu0 %v10915_v18 }
 0xbba   : > { %7680 = vmatpush1.bf16.msra.mxu0 %v10913_v5 }
 0xbbb   : > { %7681 = vmatprep.subr.bf16.mxu0 %v10918_v6 }
 0xbbe   : > { %7682 = vmatpush1.bf16.msra.mxu0 %v10916_v11 }
 0xbbf   : > { %7683 = vmatprep.subr.bf16.mxu0 %v10921_v7 }
 0xbc2   : > { %7684 = vmatpush1.bf16.msra.mxu0 %v10919_v4 }
 0xbc3   : > { %7685 = vmatprep.subr.bf16.mxu0 %v10924_v62 }
 0xbc6   : > { %7686 = vmatpush1.bf16.msra.mxu0 %v10922_v15 }
 0xbc7   : > { %7687 = vmatprep.subr.bf16.mxu0 %v10927_v61 }
 0xbca   : > { %7688 = vmatpush1.bf16.msra.mxu0 %v10925_v57 }
 0xbcb   : > { %7701 = vmatprep.subr.bf16.mxu0 %v10930_v10 }
 0xbcd   : > { %v6192_v44 = vpop.f32.mrf.mxu0 }
 0xbce   : > { %7702 = vmatpush2.bf16.msra.mxu0 %v10928_v2  ;;  %v6222_v29 = vadd.f32 %v6215_v14, %v6192_v44 }
 0xbcf   : > { %7703 = vmatprep.subr.bf16.mxu0 %v10933_v22  ;;  %v6194_v46 = vpop.f32.mrf.mxu0 }
 0xbd0   : > { %v6223_v28 = vadd.f32 %v6219_v42, %v6194_v46 }
 0xbd1   : > { %v6196_v52 = vpop.f32.mrf.mxu0 }
 0xbd2   : > { %7704 = vmatpush2.bf16.msra.mxu0 %v10931_v27  ;;  %v6224_v56 = vadd.f32 %v6215_v14, %v6196_v52 }
 0xbd3   : > { %7889 = vmatprep.subr.bf16.mxu0 %v10936_v20  ;;  %v6198_v63 = vpop.f32.mrf.mxu0 }
 0xbd4   : > { %v6225_v26 = vadd.f32 %v6219_v42, %v6198_v63 }
 0xbd5   : > { %7706 = vmatmul.mubr.bf16.vlgmr.msra.gmra.mxu0 %v6026_v37  ;;  %v6202_v34 = vpop.f32.mrf.mxu0 }
 0xbd6   : > { %9479 = vmatprep.mubr.msk.bf16.mxu0 %vm6151_vm3, %v6029_v45  ;;  %7890 = vmatpush1.bf16.msra.mxu0 %v10934_v53  ;;  %v6226_v51 = vadd.f32 %v6215_v14, %v6202_v34 }
 0xbd7   : > { %7891 = vmatprep.subr.bf16.mxu0 %v10939_v24  ;;  %v6204_v54 = vpop.f32.mrf.mxu0 }
 0xbd8   : > { %v6227_v40 = vadd.f32 %v6219_v42, %v6204_v54 }
 0xbd9   : > { %v6206_v8 = vpop.f32.mrf.mxu0 }
 0xbda   : > { %7892 = vmatpush1.bf16.msra.mxu0 %v10937_v31  ;;  %v6228_v50 = vadd.f32 %v6215_v14, %v6206_v8 }
 0xbdb   : > { %7893 = vmatprep.subr.bf16.mxu0 %v10942_v16  ;;  %v6208_v12 = vpop.f32.mrf.mxu0 }
 0xbdc   : > { %v6229_v5 = vadd.f32 %v6219_v42, %v6208_v12 }
 0xbdd   : > { %7716 = vmatmul.mubr.bf16.gmra.mxu0 %v6028_v19 }
 0xbde   : > { %7894 = vmatpush1.bf16.msra.mxu0 %v10940_v43  ;;  %7915 = vmatprep.mubr.bf16.mxu0 %v13489_v36 }
 0xbdf   : > { %7895 = vmatprep.subr.bf16.mxu0 %v10945_v23 }
 0xbe2   : > { %7896 = vmatpush1.bf16.msra.mxu0 %v10943_v58 }
 0xbe3   : > { %7897 = vmatprep.subr.bf16.mxu0 %v10948_v38 }
 0xbe6   : > { %7898 = vmatpush1.bf16.msra.mxu0 %v10946_v21 }
 0xbf5   : > { %v6391_v30 = vpop.f32.mrf.mxu0 }
 0xbf6   : > { %v6410_v0 = vadd.f32 %v6391_v30, %v6222_v29 }
 0xbf7   : > { %v6393_v9 = vpop.f32.mrf.mxu0 }
 0xbf8   : > { %v6411_v17 = vadd.f32 %v6393_v9, %v6223_v28 }
 0xbf9   : > { %v6395_v48 = vpop.f32.mrf.mxu0 }
 0xbfa   : > { %v6412_v1 = vadd.f32 %v6395_v48, %v6224_v56 }
 0xbfb   : > { %v6397_v3 = vpop.f32.mrf.mxu0 }
 0xbfc   : > { %v6413_v55 = vadd.f32 %v6397_v3, %v6225_v26 }
 0xbfd   : > { %v6401_v32 = vpop.f32.mrf.mxu0  ;;  %v6767_v4 = vpop.f32.mrf.mxu1 }
 0xbfe   : > { %v6414_v25 = vadd.f32 %v6401_v32, %v6226_v51 }
 0xbff   : > { %v6403_v59 = vpop.f32.mrf.mxu0  ;;  %v6769_v62 = vpop.f32.mrf.mxu1 }
 0xc00   : > { %v6415_v49 = vadd.f32 %v6403_v59, %v6227_v40 }
 0xc01   : > { %v6405_v18 = vpop.f32.mrf.mxu0  ;;  %v6771_v15 = vpop.f32.mrf.mxu1 }
 0xc02   : > { %v6416_v6 = vadd.f32 %v6405_v18, %v6228_v50 }
 0xc03   : > { %v6407_v11 = vpop.f32.mrf.mxu0  ;;  %v6773_v61 = vpop.f32.mrf.mxu1 }
 0xc04   : > { %v6417_v7 = vadd.f32 %v6407_v11, %v6229_v5 }
 0xc05   : > { %v6777_v22 = vpop.f32.mrf.mxu1 }
 0xc07   : > { %v6779_v20 = vpop.f32.mrf.mxu1 }
 0xc09   : > { %v6781_v46 = vpop.f32.mrf.mxu1 }
 0xc0b   : > { %v6783_v34 = vpop.f32.mrf.mxu1 }
 0xc1d   : > { %v6579_v33 = vpop.f32.mrf.mxu0 }
 0xc1e   : > { %v6598_v57 = vadd.f32 %v6579_v33, %v6410_v0 }
 0xc1f   : > { %v6581_v10 = vpop.f32.mrf.mxu0 }
 0xc20   : > { %v6599_v39 = vadd.f32 %v6581_v10, %v6411_v17  ;;  %v6786_v2 = vadd.f32 %v6767_v4, %v6598_v57 }
 0xc21   : > { %v6583_v41 = vpop.f32.mrf.mxu0 }
 0xc22   : > { %v6600_v27 = vadd.f32 %v6583_v41, %v6412_v1  ;;  %v6787_v35 = vadd.f32 %v6769_v62, %v6599_v39 }
 0xc23   : > { %v6585_v37 = vpop.f32.mrf.mxu0 }
 0xc24   : > { %v6601_v45 = vadd.f32 %v6585_v37, %v6413_v55  ;;  %v6788_v53 = vadd.f32 %v6771_v15, %v6600_v27 }
 0xc25   : > { %v6589_v31 = vpop.f32.mrf.mxu0 }
 0xc26   : > { %v6602_v24 = vadd.f32 %v6589_v31, %v6414_v25  ;;  %v6789_v44 = vadd.f32 %v6773_v61, %v6601_v45  ;;  %v7143_v13 = vpop.f32.mrf.mxu1 }
 0xc27   : > { %v6591_v19 = vpop.f32.mrf.mxu0 }
 0xc28   : > { %v6603_v43 = vadd.f32 %v6591_v19, %v6415_v49  ;;  %v6790_v16 = vadd.f32 %v6777_v22, %v6602_v24  ;;  %v7145_v8 = vpop.f32.mrf.mxu1 }
 0xc29   : > { %v6593_v23 = vpop.f32.mrf.mxu0 }
 0xc2a   : > { %v6604_v52 = vadd.f32 %v6593_v23, %v6416_v6  ;;  %v6791_v58 = vadd.f32 %v6779_v20, %v6603_v43  ;;  %v7147_v14 = vpop.f32.mrf.mxu1 }
 0xc2b   : > { %v6595_v38 = vpop.f32.mrf.mxu0 }
 0xc2c   : > { %v6605_v63 = vadd.f32 %v6595_v38, %v6417_v7  ;;  %v6792_v21 = vadd.f32 %v6781_v46, %v6604_v52  ;;  %v7149_v42 = vpop.f32.mrf.mxu1 }
 0xc2e   : > { %v6793_v54 = vadd.f32 %v6783_v34, %v6605_v63  ;;  %v7153_v12 = vpop.f32.mrf.mxu1 }
 0xc30   : > { %v7155_v29 = vpop.f32.mrf.mxu1 }
 0xc32   : > { %v7157_v9 = vpop.f32.mrf.mxu1 }
 0xc34   : > { %v7159_v51 = vpop.f32.mrf.mxu1 }
 0xc45   : > { %v6955_v30 = vpop.f32.mrf.mxu0 }
 0xc46   : > { %v6974_v28 = vadd.f32 %v6955_v30, %v6786_v2 }
 0xc47   : > { %v6957_v0 = vpop.f32.mrf.mxu0 }
 0xc48   : > { %v6975_v56 = vadd.f32 %v6957_v0, %v6787_v35  ;;  %v7162_v17 = vadd.f32 %v7143_v13, %v6974_v28  ;;  %v11627_v0 = vmov 0.0  }
 0xc49   : > { %v6959_v48 = vpop.f32.mrf.mxu0  ;;  %8050 = vmatprep.subr.mxu1 %v11627_v0 }
 0xc4a   : > { %v6976_v26 = vadd.f32 %v6959_v48, %v6788_v53  ;;  %v7163_v1 = vadd.f32 %v7145_v8, %v6975_v56  ;;  %v7967_v56 = vld [vmem:[%s12448_s21 + $0x70] sm:$0xff]  ;;  %v7965_v48 = vld [vmem:[%s12448_s21 + $0x60] sm:$0xff] }
 0xc4b   : > { %v6961_v3 = vpop.f32.mrf.mxu0 }
 0xc4c   : > { %v6977_v55 = vadd.f32 %v6961_v3, %v6789_v44  ;;  %v7164_v32 = vadd.f32 %v7147_v14, %v6976_v26  ;;  %v7964_v26 = vld [vmem:[%s12448_s21 + $0x58] sm:$0xff]  ;;  %v7962_v3 = vld [vmem:[%s12448_s21 + $0x48] sm:$0xff] }
 0xc4d   : > { %v6965_v40 = vpop.f32.mrf.mxu0 }
 0xc4e   : > { %v6978_v25 = vadd.f32 %v6965_v40, %v6790_v16  ;;  %v7519_v59 = vpop.f32.mrf.mxu1  ;;  %v7165_v50 = vadd.f32 %v7149_v42, %v6977_v55  ;;  %v7960_v55 = vld [vmem:[%s12448_s21 + $0x38] sm:$0xff]  ;;  %v7958_v40 = vld [vmem:[%s12448_s21 + $0x28] sm:$0xff] }
 0xc4f   : > { %v6967_v49 = vpop.f32.mrf.mxu0 }
 0xc50   : > { %v6979_v18 = vadd.f32 %v6967_v49, %v6791_v58  ;;  %v7521_v5 = vpop.f32.mrf.mxu1  ;;  %v7166_v6 = vadd.f32 %v7153_v12, %v6978_v25  ;;  %v7957_v25 = vld [vmem:[%s12448_s21 + $0x20] sm:$0xff]  ;;  %v7954_v49 = vld [vmem:[%s12448_s21 + $0x8] sm:$0xff] }
 0xc51   : > { %v6969_v11 = vpop.f32.mrf.mxu0 }
 0xc52   : > { %v6980_v7 = vadd.f32 %v6969_v11, %v6792_v21  ;;  %v7523_v4 = vpop.f32.mrf.mxu1  ;;  %v7167_v62 = vadd.f32 %v7155_v29, %v6979_v18  ;;  %v7953_v18 = vld [vmem:[%s12448_s21] sm:$0xff] }
 0xc53   : > { %v6971_v15 = vpop.f32.mrf.mxu0 }
 0xc54   : > { %v6981_v61 = vadd.f32 %v6971_v15, %v6793_v54  ;;  %v7525_v33 = vpop.f32.mrf.mxu1  ;;  %v7168_v57 = vadd.f32 %v7157_v9, %v6980_v7  ;;  %v7968_v9 = vld [vmem:[%s12448_s21 + $0x78] sm:$0xff] }
 0xc55   : > { %8051 = vmatpush1.msra.mxu1 %v7968_v9 }
 0xc56   : > { %v7529_v10 = vpop.f32.mrf.mxu1  ;;  %v7169_v39 = vadd.f32 %v7159_v51, %v6981_v61  ;;  %8052 = vmatprep.subr.mxu1 %v11627_v0  ;;  %v7961_v51 = vld [vmem:[%s12448_s21 + $0x40] sm:$0xff] }
 0xc57   : > { %8053 = vmatpush1.msra.mxu1 %v7967_v56 }
 0xc58   : > { %v7531_v2 = vpop.f32.mrf.mxu1  ;;  %8054 = vmatprep.subr.mxu1 %v11627_v0 }
 0xc5a   : > { %v7533_v22 = vpop.f32.mrf.mxu1 }
 0xc5c   : > { %v7535_v41 = vpop.f32.mrf.mxu1 }
 0xc5f   : > { %v10313_v27 = vpop.f32.mrf.mxu1 }
 0xc61   : > { %v7788_v35 = vpop.f32.mrf.mxu1 }
 0xc63   : > { %v10314_v37 = vpop.f32.mrf.mxu1 }
 0xc64   : > { %v7804_v31 = vpack.c.bf16 %v10314_v37, %v10313_v27 }
 0xc65   : > { %v7791_v45 = vpop.f32.mrf.mxu1 }
 0xc66   : > { %v7803_v53 = vpack.c.bf16 %v7791_v45, %v7788_v35 }
 0xc68   : > { %9494 = vmatmul.mubr.msk.bf16.vlgmr.msra.gmra.mxu0 %vm2295_vm2, %v7803_v53 }
 0xc69   : > { %7925 = vmatprep.mubr.bf16.mxu0 %v13489_v36 }
 0xc6d   : > { %v7331_v20 = vpop.f32.mrf.mxu0 }
 0xc6e   : > { %v7350_v24 = vadd.f32 %v7331_v20, %v7162_v17  ;;  %v7966_v17 = vld [vmem:[%s12448_s21 + $0x68] sm:$0xff] }
 0xc6f   : > { %v7333_v44 = vpop.f32.mrf.mxu0  ;;  %8055 = vmatpush1.msra.mxu1 %v7966_v17 }
 0xc70   : > { %9495 = vmatmul.mubr.msk.bf16.gmra.mxu0 %vm2295_vm2, %v7804_v31  ;;  %v7351_v19 = vadd.f32 %v7333_v44, %v7163_v1  ;;  %v13246_v43 = vadd.f32 %v7519_v59, %v7350_v24  ;;  %8056 = vmatprep.subr.mxu1 %v11627_v0  ;;  %v7963_v1 = vld [vmem:[%s12448_s21 + $0x50] sm:$0xff]  ;;  %v7956_v59 = vld [vmem:[%s12448_s21 + $0x18] sm:$0xff] }
 0xc71   : > { %v7335_v16 = vpop.f32.mrf.mxu0  ;;  %8040 = vmatprep.mubr.f32.mxu0 %v11627_v0  ;;  %8057 = vmatpush1.msra.mxu1 %v7965_v48 }
 0xc72   : > { %v7352_v46 = vadd.f32 %v7335_v16, %v7164_v32  ;;  %v13248_v23 = vadd.f32 %v7521_v5, %v7351_v19  ;;  %8058 = vmatprep.subr.mxu1 %v11627_v0  ;;  %v7959_v32 = vld [vmem:[%s12448_s21 + $0x30] sm:$0xff]  ;;  %v7972_v5 = vld [vmem:[%s12448_s21 + $0x98] sm:$0xff] }
 0xc73   : > { %v7337_v52 = vpop.f32.mrf.mxu0  ;;  %8059 = vmatpush1.msra.mxu1 %v7964_v26 }
 0xc74   : > { %v7353_v58 = vadd.f32 %v7337_v52, %v7165_v50  ;;  %v13250_v38 = vadd.f32 %v7523_v4, %v7352_v46  ;;  %8060 = vmatprep.subr.mxu1 %v11627_v0  ;;  %v7955_v50 = vld [vmem:[%s12448_s21 + $0x10] sm:$0xff] }
 0xc75   : > { %v7341_v63 = vpop.f32.mrf.mxu0  ;;  %8061 = vmatpush1.msra.mxu1 %v7963_v1 }
 0xc76   : > { %v7354_v36 = vadd.f32 %v7341_v63, %v7166_v6  ;;  %v13252_v21 = vadd.f32 %v7525_v33, %v7353_v58  ;;  %8062 = vmatprep.subr.mxu1 %v11627_v0  ;;  %v7971_v6 = vld [vmem:[%s12448_s21 + $0x90] sm:$0xff] }
 0xc77   : > { %v7343_v34 = vpop.f32.mrf.mxu0  ;;  %8063 = vmatpush1.msra.mxu1 %v7962_v3 }
 0xc78   : > { %v7355_v54 = vadd.f32 %v7343_v34, %v7167_v62  ;;  %v13254_v13 = vadd.f32 %v7529_v10, %v7354_v36  ;;  %8064 = vmatprep.subr.mxu1 %v11627_v0 }
 0xc79   : > { %v7345_v8 = vpop.f32.mrf.mxu0  ;;  %8065 = vmatpush1.msra.mxu1 %v7961_v51  ;;  %v7970_v51 = vld [vmem:[%s12448_s21 + $0x88] sm:$0xff] }
 0xc7a   : > { %v7356_v14 = vadd.f32 %v7345_v8, %v7168_v57  ;;  %v13256_v42 = vadd.f32 %v7531_v2, %v7355_v54  ;;  %8066 = vmatprep.subr.mxu1 %v11627_v0 }
 0xc7b   : > { %v7347_v12 = vpop.f32.mrf.mxu0  ;;  %8067 = vmatpush1.msra.mxu1 %v7960_v55  ;;  %v7969_v55 = vld [vmem:[%s12448_s21 + $0x80] sm:$0xff] }
 0xc7c   : > { %v7357_v29 = vadd.f32 %v7347_v12, %v7169_v39  ;;  %v13258_v30 = vadd.f32 %v7533_v22, %v7356_v14  ;;  %8068 = vmatprep.subr.mxu1 %v11627_v0 }
 0xc7d   : > { %8069 = vmatpush1.msra.mxu1 %v7959_v32 }
 0xc7e   : > { %v13260_v28 = vadd.f32 %v7535_v41, %v7357_v29  ;;  %8070 = vmatprep.subr.mxu1 %v11627_v0  ;;  %v7815_v41 = vld [vmem:[%s13496_s10] sm:$0x3] }
 0xc7f   : > { %8071 = vmatpush1.msra.mxu1 %v7958_v40  ;;  %v7820_v37 = vrot.slane %v7815_v41, %v12896_v60  ;;  %v7824_v45 = vrot.slane %v7815_v41, %v12898_v47 }
 0xc80   : > { %8072 = vmatprep.subr.mxu1 %v11627_v0 }
 0xc81   : > { %8073 = vmatpush1.msra.mxu1 %v7957_v25 }
 0xc82   : > { %8074 = vmatprep.subr.mxu1 %v11627_v0 }
 0xc83   : > { %8075 = vmatpush1.msra.mxu1 %v7956_v59 }
 0xc84   : > { %8076 = vmatprep.subr.mxu1 %v11627_v0 }
 0xc85   : > { %8077 = vmatpush1.msra.mxu1 %v7955_v50 }
 0xc86   : > { %8078 = vmatprep.subr.mxu1 %v11627_v0 }
 0xc87   : > { %8079 = vmatpush1.msra.mxu1 %v7954_v49 }
 0xc88   : > { %8080 = vmatprep.subr.mxu1 %v11627_v0 }
 0xc89   : > { %8081 = vmatpush1.msra.mxu1 %v7953_v18 }
 0xc8a   : > { %8106 = vmatprep.subr.mxu1 %v11627_v0 }
 0xc8b   : > { %8107 = vmatpush2.msra.mxu1 %v7972_v5 }
 0xc8c   : > { %8108 = vmatprep.subr.mxu1 %v11627_v0 }
 0xc8d   : > { %8109 = vmatpush2.msra.mxu1 %v7971_v6 }
 0xc8e   : > { %8110 = vmatprep.subr.mxu1 %v11627_v0 }
 0xc8f   : > { %8111 = vmatpush2.msra.mxu1 %v7970_v51 }
 0xc90   : > { %8112 = vmatprep.subr.mxu1 %v11627_v0 }
 0xc91   : > { %8113 = vmatpush2.msra.mxu1 %v7969_v55 }
 0xc95   : > { %v7707_v11 = vpop.f32.mrf.mxu0 }
 0xc97   : > { %v7709_v7 = vpop.f32.mrf.mxu0 }
 0xc99   : > { %v7711_v4 = vpop.f32.mrf.mxu0 }
 0xc9a   : > { %v7728_v14 = vadd.f32 %v7711_v4, %v13250_v38 }
 0xc9b   : > { %v7713_v62 = vpop.f32.mrf.mxu0 }
 0xc9c   : > { %v7729_v60 = vadd.f32 %v7713_v62, %v13252_v21 }
 0xc9d   : > { %v7717_v15 = vpop.f32.mrf.mxu0 }
 0xc9e   : > { %v7730_v63 = vadd.f32 %v7717_v15, %v13254_v13 }
 0xc9f   : > { %v7719_v61 = vpop.f32.mrf.mxu0 }
 0xca0   : > { %v7731_v16 = vadd.f32 %v7719_v61, %v13256_v42 }
 0xca1   : > { %v7721_v33 = vpop.f32.mrf.mxu0 }
 0xca2   : > { %v7732_v24 = vadd.f32 %v7721_v33, %v13258_v30  ;;  %v7727_v30 = vadd.f32 %v7709_v7, %v13248_v23 }
 0xca3   : > { %v7723_v57 = vpop.f32.mrf.mxu0 }
 0xca4   : > { %v7733_v46 = vadd.f32 %v7723_v57, %v13260_v28  ;;  %v7726_v28 = vadd.f32 %v7707_v11, %v13246_v43  ;;  %v7952_v43 = vld [vmem:[#allocation27] sm:$0x3] }
 0xd28   : > { %v7917_v10 = vpop.f32.mrf.mxu0 }
 0xd29   : > { %v7918_v12 = vadd.f32 %v7917_v10, %v7820_v37 }
 0xd2a   : > { %v7919_v39 = vpop.f32.mrf.mxu0 }
 0xd2b   : > { %v7920_v47 = vadd.f32 %v7919_v39, %v7824_v45  ;;  %v7936_v21 = vadd.f32 %v7918_v12, %v7726_v28 }
 0xd2c   : > { %v7921_v2 = vpop.f32.mrf.mxu0 }
 0xd2d   : > { %v7922_v36 = vadd.f32 %v7921_v2, %v7820_v37  ;;  %v7937_v13 = vadd.f32 %v7920_v47, %v7727_v30  ;;  %v7944_v23 = vmax.f32 %v7936_v21, 0.0 }
 0xd2e   : > { %v7923_v22 = vpop.f32.mrf.mxu0 }
 0xd2f   : > { %v7924_v52 = vadd.f32 %v7923_v22, %v7824_v45  ;;  %v7938_v56 = vadd.f32 %v7922_v36, %v7728_v14  ;;  %v7945_v3 = vmax.f32 %v7937_v13, 0.0 }
 0xd30   : > { %v7927_v27 = vpop.f32.mrf.mxu0 }
 0xd31   : > { %v7928_v44 = vadd.f32 %v7927_v27, %v7820_v37  ;;  %v7939_v42 = vadd.f32 %v7924_v52, %v7729_v60  ;;  %v7946_v38 = vmax.f32 %v7938_v56, 0.0 }
 0xd32   : > { %v7929_v35 = vpop.f32.mrf.mxu0 }
 0xd33   : > { %v7930_v20 = vadd.f32 %v7929_v35, %v7824_v45  ;;  %v7940_v29 = vadd.f32 %v7928_v44, %v7730_v63  ;;  %v7947_v1 = vmax.f32 %v7939_v42, 0.0 }
 0xd34   : > { %v7931_v53 = vpop.f32.mrf.mxu0 }
 0xd35   : > { %v7932_v31 = vadd.f32 %v7931_v53, %v7820_v37  ;;  %v7941_v54 = vadd.f32 %v7930_v20, %v7731_v16  ;;  %v7948_v26 = vmax.f32 %v7940_v29, 0.0 }
 0xd36   : > { %v7933_v19 = vpop.f32.mrf.mxu0 }
 0xd37   : > { %v7934_v58 = vadd.f32 %v7933_v19, %v7824_v45  ;;  %v7942_v34 = vadd.f32 %v7932_v31, %v7732_v24  ;;  %v7949_v48 = vmax.f32 %v7941_v54, 0.0 }
 0xd39   : > { %v7943_v8 = vadd.f32 %v7934_v58, %v7733_v46  ;;  %v7950_v17 = vmax.f32 %v7942_v34, 0.0 }
 0xd3b   : > { %v7951_v9 = vmax.f32 %v7943_v8, 0.0 }
 0xd3d   : > { %8000 = vmatprep.subr.mxu0 %v7951_v9 }
 0xd3e   : > { %8001 = vmatpush1.msra.mxu0 %v7950_v17 }
 0xd3f   : > { %8002 = vmatprep.subr.mxu0 %v7949_v48 }
 0xd40   : > { %8003 = vmatpush1.msra.mxu0 %v7948_v26 }
 0xd41   : > { %8004 = vmatprep.subr.mxu0 %v7947_v1 }
 0xd42   : > { %8005 = vmatpush1.msra.mxu0 %v7946_v38 }
 0xd43   : > { %8006 = vmatprep.subr.mxu0 %v7945_v3 }
 0xd44   : > { %8007 = vmatpush1.msra.mxu0 %v7944_v23 }
 0xd45   : > { %9496 = vmatmul.mubr.msk.f32.vlgmr.msra.gmra.mxu0 %vm6151_vm3, %v7952_v43 }
 0xe05   : > { %v8042_v32 = vpop.f32.mrf.mxu0 }
 0xe07   : > { %v8044_v40 = vpop.f32.mrf.mxu0 }
 0xe08   : > { %9497 = vmatprep.mubr.msk.f32.mxu1 %vm6151_vm3, %v8044_v40 }
 0xe09   : > { %8115 = vmatmul.mubr.f32.vlgmr.msra.gmra.mxu1 %v8042_v32 }
 0xec9   : > { %v8116_v25 = vpop.f32.mrf.mxu1 }
 0xeca   : > { %8121 = vst.msk [vmem:[%s1308_s20] sm:$0x3] %vm8120_vm4, %v8116_v25 }
 0xecb   : > { %v8118_v59 = vpop.f32.mrf.mxu1 }
 0xecc PF: > { %s13498_s30 = sld [smem:[#allocation51_spill]] }
 0xecd   : > { %s13499_s3 = sld [smem:[#allocation48_spill]] }
 0xece   : > { %s13500_s28 = sld [smem:[#allocation49_spill]] }
 0xecf   : > { %s13501_s29 = sld [smem:[#allocation52_spill]] }
 0xed2   : > { %p46_p3 = scmp.ge.s32.totalorder %s13498_s30, 4  }
 0xed4   :  { %48 = sbr.rel (!%p46_p3) target bundleno = 32 (0x20), region = 365 }
 0xed9   :  { %8141 = vsyncpa [#allocation3], 1 }
 0xeda   :  { %8143 = vsyncpa [#allocation3 + $0x1], 1 }
 0xedb   :  { %8144 = vsyncpa [#allocation5], 1 }
 0xedc   :  { %8146 = vsyncpa [#allocation5 + $0x1], 1 }
 0xedd   :  { %8147 = vsyncpa [#allocation8], 1 }
 0xede   :  { %8148 = vsyncpa [#allocation15], 1 }
 0xedf   :  { %8150 = vsyncpa [#allocation15 + $0x1], 1 }
 0xee0   :  { %8151 = vsyncpa [#allocation18], 1 }
 0xee1   :  { %8153 = vsyncpa [#allocation18 + $0x1], 1 }
 0xee2   :  { %8154 = vsyncpa [#allocation21], 1 }
 0xee3   :  { %8155 = vsyncpa [#allocation29], 1 }
 0xee4   :  { %8157 = vsyncpa [#allocation29 + $0x1], 1 }

</bundles_post_ra>
